<compile_context>
chip_gen: v5e
topology: v5e:2x2
jax: 0.10.0
libtpu: 0.0.40
codegen_flags: <defaults>
</compile_context>

<pallas_src>
import functools
import math

import jax
import jax.numpy as jnp
from jax.experimental import pallas as pl
from jax.experimental.pallas import tpu as pltpu

_VMEM_LIMIT = 64 * 1024 * 1024  # <= physical VMEM on every generation (v7x: 64 MiB)


# ------------------------------ tiling helpers ------------------------------

def _pick_tile(dim, desired, align, min_blocks=1):
    """Largest tile <= desired that divides dim and is align-aligned, else full dim.

    If min_blocks > 1 and there is room, also ensure dim/tile >= min_blocks so a
    'parallel' grid axis has work for both v7x TensorCores."""
    if min_blocks > 1 and dim >= min_blocks * align:
        desired = min(desired, dim // min_blocks)
    if dim <= desired:
        return dim
    t = (desired // align) * align
    while t >= align:
        if dim % t == 0:
            return t
        t -= align
    return dim


# ------------------------- dense (tiled MXU matmul) -------------------------

def _dense_kernel(x_ref, w_ref, b_ref, o_ref, acc_ref, *, activation):
    @pl.when(pl.program_id(2) == 0)
    def _():
        acc_ref[...] = jnp.zeros_like(acc_ref)

    # x and w arrive bf16; accumulate f32 on the MXU.
    acc_ref[...] += jnp.dot(x_ref[...], w_ref[...],
                            preferred_element_type=jnp.float32)

    @pl.when(pl.program_id(2) == pl.num_programs(2) - 1)
    def _():
        y = acc_ref[...] + b_ref[...]
        if activation == "gelu":
            # exact (erf) GELU, matching HF ELECTRA's default activation
            y = 0.5 * y * (1.0 + jax.lax.erf(y * (1.0 / math.sqrt(2.0))))
        o_ref[...] = y.astype(o_ref.dtype)


def dense(x, w, b, activation=None, *, tm=512, tn=512, tk=512):
    """y = act(x @ w + b). x: [M, K] bf16, w: [K, N] bf16, b: [N] f32 -> bf16."""
    M, K = x.shape
    K2, N = w.shape
    assert K == K2
    tm = _pick_tile(M, tm, 16, min_blocks=2)
    tn = _pick_tile(N, tn, 128)
    tk = _pick_tile(K, tk, 128)
    grid = (M // tm, N // tn, K // tk)
    return pl.pallas_call(
        functools.partial(_dense_kernel, activation=activation),
        out_shape=jax.ShapeDtypeStruct((M, N), jnp.bfloat16),
        grid=grid,
        in_specs=[
            pl.BlockSpec((tm, tk), lambda i, j, k: (i, k)),
            pl.BlockSpec((tk, tn), lambda i, j, k: (k, j)),
            pl.BlockSpec((1, tn), lambda i, j, k: (0, j)),
        ],
        out_specs=pl.BlockSpec((tm, tn), lambda i, j, k: (i, j)),
        scratch_shapes=[pltpu.VMEM((tm, tn), jnp.float32)],
        compiler_params=pltpu.CompilerParams(
            dimension_semantics=("parallel", "parallel", "arbitrary"),
            vmem_limit_bytes=_VMEM_LIMIT),
    )(x, w, b.reshape(1, N))


# ----------------- matmul + residual + LayerNorm (fused epilogue) -----------------

def _dense_res_ln_kernel(x_ref, w_ref, b_ref, r_ref, g_ref, be_ref, o_ref,
                         acc_ref, *, eps):
    @pl.when(pl.program_id(1) == 0)
    def _():
        acc_ref[...] = jnp.zeros_like(acc_ref)

    acc_ref[...] += jnp.dot(x_ref[...], w_ref[...],
                            preferred_element_type=jnp.float32)

    @pl.when(pl.program_id(1) == pl.num_programs(1) - 1)
    def _():
        y = acc_ref[...] + b_ref[...] + r_ref[...].astype(jnp.float32)
        mean = jnp.mean(y, axis=-1, keepdims=True)
        var = jnp.mean(jnp.square(y - mean), axis=-1, keepdims=True)
        inv = jax.lax.rsqrt(var + eps)
        o_ref[...] = ((y - mean) * inv * g_ref[...] + be_ref[...]).astype(o_ref.dtype)


def dense_residual_layernorm(x, w, b, res, gamma, beta, *, eps=1e-12,
                             tm=256, tk=512):
    """LayerNorm(res + x @ w + b) -> bf16.  N (=hidden) kept whole so the row-wise
    LayerNorm fuses into the matmul epilogue (fine for H<=1024); tm capped for
    v7x's 64 MiB VMEM."""
    # TODO(synk): the residual block is only read on the last k step; a manual
    # late async_copy would free its VMEM residency during the K loop on v7x.
    M, K = x.shape
    K2, N = w.shape
    assert K == K2 and res.shape == (M, N)
    tm = _pick_tile(M, tm, 16, min_blocks=2)
    tk = _pick_tile(K, tk, 128)
    grid = (M // tm, K // tk)
    return pl.pallas_call(
        functools.partial(_dense_res_ln_kernel, eps=eps),
        out_shape=jax.ShapeDtypeStruct((M, N), jnp.bfloat16),
        grid=grid,
        in_specs=[
            pl.BlockSpec((tm, tk), lambda i, k: (i, k)),
            pl.BlockSpec((tk, N), lambda i, k: (k, 0)),
            pl.BlockSpec((1, N), lambda i, k: (0, 0)),
            pl.BlockSpec((tm, N), lambda i, k: (i, 0)),
            pl.BlockSpec((1, N), lambda i, k: (0, 0)),
            pl.BlockSpec((1, N), lambda i, k: (0, 0)),
        ],
        out_specs=pl.BlockSpec((tm, N), lambda i, k: (i, 0)),
        scratch_shapes=[pltpu.VMEM((tm, N), jnp.float32)],
        compiler_params=pltpu.CompilerParams(
            dimension_semantics=("parallel", "arbitrary"),
            vmem_limit_bytes=_VMEM_LIMIT),
    )(x, w, b.reshape(1, N), res, gamma.reshape(1, N), beta.reshape(1, N))


# ------------------------------ LayerNorm (tiled) ------------------------------

def _ln_kernel(x_ref, g_ref, b_ref, o_ref, *, eps):
    x = x_ref[...].astype(jnp.float32)
    mean = jnp.mean(x, axis=-1, keepdims=True)
    var = jnp.mean(jnp.square(x - mean), axis=-1, keepdims=True)
    inv = jax.lax.rsqrt(var + eps)
    o_ref[...] = ((x - mean) * inv * g_ref[...] + b_ref[...]).astype(o_ref.dtype)


def layernorm(x, g, b, *, eps=1e-12, tm=512):
    """Row-wise LayerNorm of the f32 embedding sum, written bf16 (purely
    HBM-bound, so the half-width output is a straight bandwidth win)."""
    M, H = x.shape
    tm = _pick_tile(M, tm, 16, min_blocks=2)
    return pl.pallas_call(
        functools.partial(_ln_kernel, eps=eps),
        out_shape=jax.ShapeDtypeStruct((M, H), jnp.bfloat16),
        grid=(M // tm,),
        in_specs=[
            pl.BlockSpec((tm, H), lambda i: (i, 0)),
            pl.BlockSpec((1, H), lambda i: (0, 0)),
            pl.BlockSpec((1, H), lambda i: (0, 0)),
        ],
        out_specs=pl.BlockSpec((tm, H), lambda i: (i, 0)),
        compiler_params=pltpu.CompilerParams(
            dimension_semantics=("parallel",)),
    )(x, g.reshape(1, H), b.reshape(1, H))


# ------------------------ transpose-free multi-head attention ------------------------

def _attn_kernel(q_ref, k_ref, v_ref, m_ref, o_ref, *, scale):
    q = q_ref[...]                               # [tq, Dh] bf16
    k = k_ref[...]                               # [S,  Dh] bf16
    v = v_ref[...]                               # [S,  Dh] bf16
    # q @ k^T (contracted on k's minor dim); tq = min(S, 512) keeps this to one
    # invocation per (b, h) so the K slab is only reshaped/transposed once.
    s = jax.lax.dot_general(q, k, (((1,), (1,)), ((), ())),
                            preferred_element_type=jnp.float32)      # [tq, S] f32
    s = s * scale + m_ref[...]                   # additive mask broadcast [1, S]
    s = s - jnp.max(s, axis=-1, keepdims=True)
    p = jnp.exp(s)
    # approx reciprocal runs on the EUP slot; ~1e-3 rel error vs exact divide.
    inv = pl.reciprocal(jnp.sum(p, axis=-1, keepdims=True), approx=True)
    p = (p * inv).astype(jnp.bfloat16)
    o_ref[...] = jnp.dot(p, v, preferred_element_type=jnp.float32).astype(o_ref.dtype)


def multi_head_attention(qkv, add_mask, *, n_heads, tq=512):
    """qkv: [B, S, 3H] bf16 (fused projection output); add_mask: [B, 1, S] f32.
    Reads per-head Q/K/V slabs straight from the fused tensor and writes the
    context directly in [B, S, H] layout (no head split / merge transposes)."""
    B, S, H3 = qkv.shape
    H = H3 // 3
    Dh = H // n_heads
    scale = 1.0 / math.sqrt(Dh)
    tq = _pick_tile(S, tq, 16)
    nH = n_heads
    grid = (B, nH, S // tq)
    # TODO(synk): for very long S this holds full K/V per head in VMEM; a
    # flash-style online-softmax tiling of the KV axis (with a pre-transposed
    # [Dh, S] K slab) would remove that limit.
    q_spec = pl.BlockSpec((None, tq, Dh), lambda b, h, qi: (b, qi, h))
    k_spec = pl.BlockSpec((None, S, Dh), lambda b, h, qi: (b, 0, nH + h))
    v_spec = pl.BlockSpec((None, S, Dh), lambda b, h, qi: (b, 0, 2 * nH + h))
    m_spec = pl.BlockSpec((None, 1, S), lambda b, h, qi: (b, 0, 0))
    o_spec = pl.BlockSpec((None, tq, Dh), lambda b, h, qi: (b, qi, h))
    return pl.pallas_call(
        functools.partial(_attn_kernel, scale=scale),
        out_shape=jax.ShapeDtypeStruct((B, S, H), jnp.bfloat16),
        grid=grid,
        in_specs=[q_spec, k_spec, v_spec, m_spec],
        out_specs=o_spec,
        compiler_params=pltpu.CompilerParams(
            dimension_semantics=("parallel", "parallel", "parallel"),
            vmem_limit_bytes=_VMEM_LIMIT),
    )(qkv, qkv, qkv, add_mask)


# ------------------------------ parameter setup ------------------------------

def init_params(key, *, vocab_size, max_pos, type_vocab, hidden, ffn,
                n_layers, num_classes):
    def normal(k, shape):
        return 0.02 * jax.random.normal(k, shape, dtype=jnp.float32)

    keys = jax.random.split(key, 4 + n_layers)
    params = {
        "word_emb": normal(keys[0], (vocab_size, hidden)),
        "pos_emb": normal(keys[1], (max_pos, hidden)),
        "type_emb": normal(keys[2], (type_vocab, hidden)),
        "emb_ln_g": jnp.ones((hidden,), jnp.float32),
        "emb_ln_b": jnp.zeros((hidden,), jnp.float32),
        "layers": [],
    }
    for li in range(n_layers):
        lk = jax.random.split(keys[3 + li], 6)
        wq = normal(lk[0], (hidden, hidden))
        wk = normal(lk[1], (hidden, hidden))
        wv = normal(lk[2], (hidden, hidden))
        params["layers"].append({
            # fused Q/K/V projection weight [H, 3H], stored bf16 for the MXU
            "wqkv": jnp.concatenate([wq, wk, wv], axis=1).astype(jnp.bfloat16),
            "bqkv": jnp.zeros((3 * hidden,), jnp.float32),
            "wo": normal(lk[3], (hidden, hidden)).astype(jnp.bfloat16),
            "bo": jnp.zeros((hidden,), jnp.float32),
            "ln1_g": jnp.ones((hidden,), jnp.float32),
            "ln1_b": jnp.zeros((hidden,), jnp.float32),
            "w1": normal(lk[4], (hidden, ffn)).astype(jnp.bfloat16),
            "b1": jnp.zeros((ffn,), jnp.float32),
            "w2": normal(lk[5], (ffn, hidden)).astype(jnp.bfloat16),
            "b2": jnp.zeros((hidden,), jnp.float32),
            "ln2_g": jnp.ones((hidden,), jnp.float32),
            "ln2_b": jnp.zeros((hidden,), jnp.float32),
        })
    ck = jax.random.split(keys[-1], 2)
    # Classifier nn.Linear(hidden, num_classes): stays f32 and runs in plain
    # XLA (a few-row GEMM is pure launch overhead as a pallas_call).
    params["cls_w"] = normal(ck[0], (hidden, num_classes))
    params["cls_b"] = jnp.zeros((num_classes,), jnp.float32)
    return params


# ------------------------------ forward pass ------------------------------

def electra_classifier_forward(params, token_ids, attention_mask, segment_ids,
                               *, n_heads, num_classes):
    B, S = token_ids.shape
    H = params["word_emb"].shape[1]

    # Embedding lookups stay in XLA glue (gather has no clean Pallas form here).
    emb = (params["word_emb"][token_ids]
           + params["pos_emb"][jnp.arange(S)][None, :, :]
           + params["type_emb"][segment_ids.astype(jnp.int32)])     # .long() in torch
    x = layernorm(emb.reshape(B * S, H), params["emb_ln_g"], params["emb_ln_b"])  # bf16

    # Additive attention mask: 0 where attended, -1e4 where padded.
    add_mask = ((1.0 - attention_mask.astype(jnp.float32)) * -1e4).reshape(B, 1, S)

    for layer in params["layers"]:
        # --- self attention: fused QKV projection + transpose-free attention ---
        qkv = dense(x, layer["wqkv"], layer["bqkv"])               # bf16 [B*S, 3H]
        ctx = multi_head_attention(qkv.reshape(B, S, 3 * H), add_mask,
                                   n_heads=n_heads)                # bf16 [B, S, H]
        # output projection + residual + post-LN, fused in one kernel
        x = dense_residual_layernorm(ctx.reshape(B * S, H), layer["wo"],
                                     layer["bo"], x,
                                     layer["ln1_g"], layer["ln1_b"])
        # --- feed forward: GELU fused into matmul 1, residual+LN into matmul 2 ---
        h = dense(x, layer["w1"], layer["b1"], activation="gelu")
        x = dense_residual_layernorm(h, layer["w2"], layer["b2"], x,
                                     layer["ln2_g"], layer["ln2_b"])

    cls = x.reshape(B, S, H)[:, 0, :].astype(jnp.float32)          # out[0][:, 0, :]
    # dr_rate=None in the reference module -> no dropout branch.
    logits = cls @ params["cls_w"] + params["cls_b"]               # tiny GEMM in XLA
    return logits


# ------------------------------ main ------------------------------

if __name__ == "__main__":
    B, S = 2, 8
    HIDDEN, N_HEADS, FFN, N_LAYERS = 256, 2, 512, 2      # head dim = 128 (lane-dense)
    VOCAB, MAX_POS, TYPE_VOCAB, NUM_CLASSES = 100, 64, 2, 10

    root = jax.random.PRNGKey(0)
    pk, ik = jax.random.split(root)

    params = init_params(pk, vocab_size=VOCAB, max_pos=MAX_POS,
                         type_vocab=TYPE_VOCAB, hidden=HIDDEN, ffn=FFN,
                         n_layers=N_LAYERS, num_classes=NUM_CLASSES)

    tk, _ = jax.random.split(ik)
    token_ids = jax.random.randint(tk, (B, S), 0, VOCAB, dtype=jnp.int32)
    attention_mask = jnp.array([[1, 1, 1, 1, 1, 1, 1, 1],
                                [1, 1, 1, 1, 1, 0, 0, 0]], dtype=jnp.int32)
    segment_ids = jnp.zeros((B, S), dtype=jnp.int32)

    fwd = jax.jit(functools.partial(electra_classifier_forward,
                                    n_heads=N_HEADS, num_classes=NUM_CLASSES))
    logits = jax.block_until_ready(fwd(params, token_ids, attention_mask,
                                       segment_ids))
    assert logits.shape == (B, NUM_CLASSES)
    assert bool(jnp.all(jnp.isfinite(logits)))
    print("KERNEL_OK")
</pallas_src>

<mosaic_0001>
module attributes {stable_mosaic.version = 11 : i64} {
  func.func @_ln_kernel(%arg0: i32, %arg1: memref<16x256xf32, #tpu.memory_space<vmem>>, %arg2: memref<1x256xf32, #tpu.memory_space<vmem>>, %arg3: memref<1x256xf32, #tpu.memory_space<vmem>>, %arg4: memref<16x256xbf16, #tpu.memory_space<vmem>>) attributes {dimension_semantics = [#tpu.dimension_semantics<parallel>], iteration_bounds = array<i64: 1>, scalar_prefetch = 0 : i64, scratch_operands = 0 : i64, tpu.core_type = #tpu.core_type<tc>, window_params = [{transform_indices = @transform_0, window_bounds = array<i64: 16, 256>}, {pipeline_mode = #tpu.pipeline_mode<synchronous>, transform_indices = @transform_1, window_bounds = array<i64: 1, 256>}, {pipeline_mode = #tpu.pipeline_mode<synchronous>, transform_indices = @transform_2, window_bounds = array<i64: 1, 256>}, {transform_indices = @transform_3, window_bounds = array<i64: 16, 256>}]} {
    %c0 = arith.constant 0 : index
    %c0_0 = arith.constant 0 : index
    %0 = vector.load %arg1[%c0, %c0_0] : memref<16x256xf32, #tpu.memory_space<vmem>>, vector<16x256xf32>
    %cst = arith.constant dense<0.000000e+00> : vector<16xf32>
    %1 = vector.multi_reduction <add>, %0, %cst [1] : vector<16x256xf32> to vector<16xf32>
    %2 = vector.shape_cast %1 : vector<16xf32> to vector<16x1xf32>
    %cst_1 = arith.constant 2.560000e+02 : f32
    %3 = vector.broadcast %cst_1 : f32 to vector<16x1xf32>
    %4 = arith.divf %2, %3 : vector<16x1xf32>
    %5 = vector.broadcast %4 : vector<16x1xf32> to vector<16x256xf32>
    %6 = arith.subf %0, %5 : vector<16x256xf32>
    %7 = arith.mulf %6, %6 : vector<16x256xf32>
    %cst_2 = arith.constant dense<0.000000e+00> : vector<16xf32>
    %8 = vector.multi_reduction <add>, %7, %cst_2 [1] : vector<16x256xf32> to vector<16xf32>
    %9 = vector.shape_cast %8 : vector<16xf32> to vector<16x1xf32>
    %cst_3 = arith.constant 2.560000e+02 : f32
    %10 = vector.broadcast %cst_3 : f32 to vector<16x1xf32>
    %11 = arith.divf %9, %10 : vector<16x1xf32>
    %cst_4 = arith.constant 9.99999996E-13 : f32
    %12 = vector.broadcast %cst_4 : f32 to vector<16x1xf32>
    %13 = arith.addf %11, %12 : vector<16x1xf32>
    %14 = math.rsqrt %13 : vector<16x1xf32>
    %15 = vector.broadcast %4 : vector<16x1xf32> to vector<16x256xf32>
    %16 = arith.subf %0, %15 : vector<16x256xf32>
    %17 = vector.broadcast %14 : vector<16x1xf32> to vector<16x256xf32>
    %18 = arith.mulf %16, %17 : vector<16x256xf32>
    %c0_5 = arith.constant 0 : index
    %c0_6 = arith.constant 0 : index
    %19 = vector.load %arg2[%c0_5, %c0_6] : memref<1x256xf32, #tpu.memory_space<vmem>>, vector<1x256xf32>
    %20 = vector.broadcast %19 : vector<1x256xf32> to vector<16x256xf32>
    %21 = arith.mulf %18, %20 : vector<16x256xf32>
    %c0_7 = arith.constant 0 : index
    %c0_8 = arith.constant 0 : index
    %22 = vector.load %arg3[%c0_7, %c0_8] : memref<1x256xf32, #tpu.memory_space<vmem>>, vector<1x256xf32>
    %23 = vector.broadcast %22 : vector<1x256xf32> to vector<16x256xf32>
    %24 = arith.addf %21, %23 : vector<16x256xf32>
    %25 = arith.truncf %24 : vector<16x256xf32> to vector<16x256xbf16>
    %c0_9 = arith.constant 0 : index
    %c0_10 = arith.constant 0 : index
    %26 = vector.load %arg4[%c0_9, %c0_10] : memref<16x256xbf16, #tpu.memory_space<vmem>>, vector<16x256xbf16>
    tpu.vector_store %arg4[%c0_9, %c0_10], %25 {strides = array<i32>} : memref<16x256xbf16, #tpu.memory_space<vmem>>, vector<16x256xbf16>,
    return
  }
  func.func @transform_0(%arg0: i32) -> (i32, i32) {
    %c0_i32 = arith.constant 0 : i32
    %c0_i32_0 = arith.constant 0 : i32
    return %arg0, %c0_i32 : i32, i32
  }
  func.func @transform_1(%arg0: i32) -> (i32, i32) {
    %c0_i32 = arith.constant 0 : i32
    %c0_i32_0 = arith.constant 0 : i32
    %c0_i32_1 = arith.constant 0 : i32
    return %c0_i32, %c0_i32_0 : i32, i32
  }
  func.func @transform_2(%arg0: i32) -> (i32, i32) {
    %c0_i32 = arith.constant 0 : i32
    %c0_i32_0 = arith.constant 0 : i32
    %c0_i32_1 = arith.constant 0 : i32
    return %c0_i32, %c0_i32_0 : i32, i32
  }
  func.func @transform_3(%arg0: i32) -> (i32, i32) {
    %c0_i32 = arith.constant 0 : i32
    %c0_i32_0 = arith.constant 0 : i32
    return %arg0, %c0_i32 : i32, i32
  }
}

module attributes {stable_mosaic.version = 11 : i64} {
  func.func @_dense_kernel(%arg0: i32, %arg1: i32, %arg2: i32, %arg3: memref<16x256xbf16, #tpu.memory_space<vmem>>, %arg4: memref<256x384xbf16, #tpu.memory_space<vmem>>, %arg5: memref<1x384xf32, #tpu.memory_space<vmem>>, %arg6: memref<16x384xbf16, #tpu.memory_space<vmem>>, %arg7: memref<16x384xf32, #tpu.memory_space<vmem>>) attributes {dimension_semantics = [#tpu.dimension_semantics<parallel>, #tpu.dimension_semantics<parallel>, #tpu.dimension_semantics<arbitrary>], iteration_bounds = array<i64: 1, 2, 1>, scalar_prefetch = 0 : i64, scratch_operands = 1 : i64, tpu.core_type = #tpu.core_type<tc>, window_params = [{transform_indices = @transform_0, window_bounds = array<i64: 16, 256>}, {transform_indices = @transform_1, window_bounds = array<i64: 256, 384>}, {transform_indices = @transform_2, window_bounds = array<i64: 1, 384>}, {transform_indices = @transform_3, window_bounds = array<i64: 16, 384>}]} {
    %c0_i32 = arith.constant 0 : i32
    %0 = arith.cmpi eq, %arg2, %c0_i32 : i32
    %1 = arith.extui %0 : i1 to i32
    %c0_i32_0 = arith.constant 0 : i32
    %2 = arith.cmpi ne, %1, %c0_i32_0 : i32
    scf.if %2 {
      %cst_10 = arith.constant 0.000000e+00 : f32
      %12 = vector.broadcast %cst_10 : f32 to vector<16x384xf32>
      %c0_11 = arith.constant 0 : index
      %c0_12 = arith.constant 0 : index
      %13 = vector.load %arg7[%c0_11, %c0_12] : memref<16x384xf32, #tpu.memory_space<vmem>>, vector<16x384xf32>
      tpu.vector_store %arg7[%c0_11, %c0_12], %12 {strides = array<i32>} : memref<16x384xf32, #tpu.memory_space<vmem>>, vector<16x384xf32>,
    } else {
    }
    %c0 = arith.constant 0 : index
    %c0_1 = arith.constant 0 : index
    %3 = vector.load %arg7[%c0, %c0_1] : memref<16x384xf32, #tpu.memory_space<vmem>>, vector<16x384xf32>
    %c0_2 = arith.constant 0 : index
    %c0_3 = arith.constant 0 : index
    %4 = vector.load %arg3[%c0_2, %c0_3] : memref<16x256xbf16, #tpu.memory_space<vmem>>, vector<16x256xbf16>
    %c0_4 = arith.constant 0 : index
    %c0_5 = arith.constant 0 : index
    %5 = vector.load %arg4[%c0_4, %c0_5] : memref<256x384xbf16, #tpu.memory_space<vmem>>, vector<256x384xbf16>
    %cst = arith.constant dense<0.000000e+00> : vector<16x384xf32>
    %6 = tpu.matmul %4, %5, %cst {dimension_numbers = #tpu.dot_dimension_numbers<[1], [0], [0], [1], [0, 0, 1, 1], [], []>} : vector<16x256xbf16>, vector<256x384xbf16>, vector<16x384xf32> -> vector<16x384xf32>
    %7 = arith.addf %3, %6 : vector<16x384xf32>
    %c0_6 = arith.constant 0 : index
    %c0_7 = arith.constant 0 : index
    %8 = vector.load %arg7[%c0_6, %c0_7] : memref<16x384xf32, #tpu.memory_space<vmem>>, vector<16x384xf32>
    tpu.vector_store %arg7[%c0_6, %c0_7], %7 {strides = array<i32>} : memref<16x384xf32, #tpu.memory_space<vmem>>, vector<16x384xf32>,
    %c0_i32_8 = arith.constant 0 : i32
    %9 = arith.cmpi eq, %arg2, %c0_i32_8 : i32
    %10 = arith.extui %9 : i1 to i32
    %c0_i32_9 = arith.constant 0 : i32
    %11 = arith.cmpi ne, %10, %c0_i32_9 : i32
    scf.if %11 {
      %c0_10 = arith.constant 0 : index
      %c0_11 = arith.constant 0 : index
      %12 = vector.load %arg7[%c0_10, %c0_11] : memref<16x384xf32, #tpu.memory_space<vmem>>, vector<16x384xf32>
      %c0_12 = arith.constant 0 : index
      %c0_13 = arith.constant 0 : index
      %13 = vector.load %arg5[%c0_12, %c0_13] : memref<1x384xf32, #tpu.memory_space<vmem>>, vector<1x384xf32>
      %14 = vector.broadcast %13 : vector<1x384xf32> to vector<16x384xf32>
      %15 = arith.addf %12, %14 : vector<16x384xf32>
      %16 = arith.truncf %15 : vector<16x384xf32> to vector<16x384xbf16>
      %c0_14 = arith.constant 0 : index
      %c0_15 = arith.constant 0 : index
      %17 = vector.load %arg6[%c0_14, %c0_15] : memref<16x384xbf16, #tpu.memory_space<vmem>>, vector<16x384xbf16>
      tpu.vector_store %arg6[%c0_14, %c0_15], %16 {strides = array<i32>} : memref<16x384xbf16, #tpu.memory_space<vmem>>, vector<16x384xbf16>,
    } else {
    }
    return
  }
  func.func @transform_0(%arg0: i32, %arg1: i32, %arg2: i32) -> (i32, i32) {
    %c0_i32 = arith.constant 0 : i32
    return %arg0, %arg2 : i32, i32
  }
  func.func @transform_1(%arg0: i32, %arg1: i32, %arg2: i32) -> (i32, i32) {
    %c0_i32 = arith.constant 0 : i32
    return %arg2, %arg1 : i32, i32
  }
  func.func @transform_2(%arg0: i32, %arg1: i32, %arg2: i32) -> (i32, i32) {
    %c0_i32 = arith.constant 0 : i32
    %c0_i32_0 = arith.constant 0 : i32
    return %c0_i32, %arg1 : i32, i32
  }
  func.func @transform_3(%arg0: i32, %arg1: i32, %arg2: i32) -> (i32, i32) {
    %c0_i32 = arith.constant 0 : i32
    return %arg0, %arg1 : i32, i32
  }
}

module attributes {stable_mosaic.version = 11 : i64} {
  func.func @_attn_kernel(%arg0: i32, %arg1: i32, %arg2: i32, %arg3: memref<1x8x128xbf16, #tpu.memory_space<vmem>>, %arg4: memref<1x8x128xbf16, #tpu.memory_space<vmem>>, %arg5: memref<1x8x128xbf16, #tpu.memory_space<vmem>>, %arg6: memref<1x1x8xf32, #tpu.memory_space<vmem>>, %arg7: memref<1x8x128xbf16, #tpu.memory_space<vmem>>) attributes {dimension_semantics = [#tpu.dimension_semantics<parallel>, #tpu.dimension_semantics<parallel>, #tpu.dimension_semantics<parallel>], iteration_bounds = array<i64: 2, 2, 1>, scalar_prefetch = 0 : i64, scratch_operands = 0 : i64, tpu.core_type = #tpu.core_type<tc>, window_params = [{transform_indices = @transform_0, window_bounds = array<i64: 1, 8, 128>}, {transform_indices = @transform_1, window_bounds = array<i64: 1, 8, 128>}, {transform_indices = @transform_2, window_bounds = array<i64: 1, 8, 128>}, {transform_indices = @transform_3, window_bounds = array<i64: 1, 1, 8>}, {transform_indices = @transform_4, window_bounds = array<i64: 1, 8, 128>}]} {
    %c0 = arith.constant 0 : index
    %c0_0 = arith.constant 0 : index
    %c0_1 = arith.constant 0 : index
    %0 = vector.load %arg3[%c0, %c0_0, %c0_1] : memref<1x8x128xbf16, #tpu.memory_space<vmem>>, vector<1x8x128xbf16>
    %1 = vector.shape_cast %0 : vector<1x8x128xbf16> to vector<8x128xbf16>
    %c0_2 = arith.constant 0 : index
    %c0_3 = arith.constant 0 : index
    %c0_4 = arith.constant 0 : index
    %2 = vector.load %arg4[%c0_2, %c0_3, %c0_4] : memref<1x8x128xbf16, #tpu.memory_space<vmem>>, vector<1x8x128xbf16>
    %3 = vector.shape_cast %2 : vector<1x8x128xbf16> to vector<8x128xbf16>
    %c0_5 = arith.constant 0 : index
    %c0_6 = arith.constant 0 : index
    %c0_7 = arith.constant 0 : index
    %4 = vector.load %arg5[%c0_5, %c0_6, %c0_7] : memref<1x8x128xbf16, #tpu.memory_space<vmem>>, vector<1x8x128xbf16>
    %5 = vector.shape_cast %4 : vector<1x8x128xbf16> to vector<8x128xbf16>
    %cst = arith.constant dense<0.000000e+00> : vector<8x8xf32>
    %6 = tpu.matmul %1, %3, %cst {dimension_numbers = #tpu.dot_dimension_numbers<[1], [1], [0], [0], [0, 0, 1, 0], [], []>} : vector<8x128xbf16>, vector<8x128xbf16>, vector<8x8xf32> -> vector<8x8xf32>
    %cst_8 = arith.constant 0.0883883461 : f32
    %7 = vector.broadcast %cst_8 : f32 to vector<8x8xf32>
    %8 = arith.mulf %6, %7 : vector<8x8xf32>
    %c0_9 = arith.constant 0 : index
    %c0_10 = arith.constant 0 : index
    %c0_11 = arith.constant 0 : index
    %9 = vector.load %arg6[%c0_9, %c0_10, %c0_11] : memref<1x1x8xf32, #tpu.memory_space<vmem>>, vector<1x1x8xf32>
    %10 = vector.shape_cast %9 : vector<1x1x8xf32> to vector<1x8xf32>
    %11 = vector.broadcast %10 : vector<1x8xf32> to vector<8x8xf32>
    %12 = arith.addf %8, %11 : vector<8x8xf32>
    %cst_12 = arith.constant dense<0xFF800000> : vector<8xf32>
    %13 = vector.multi_reduction <maximumf>, %12, %cst_12 [1] : vector<8x8xf32> to vector<8xf32>
    %14 = vector.shape_cast %13 : vector<8xf32> to vector<8x1xf32>
    %15 = vector.broadcast %14 : vector<8x1xf32> to vector<8x8xf32>
    %16 = arith.subf %12, %15 : vector<8x8xf32>
    %17 = math.exp %16 : vector<8x8xf32>
    %cst_13 = arith.constant dense<0.000000e+00> : vector<8xf32>
    %18 = vector.multi_reduction <add>, %17, %cst_13 [1] : vector<8x8xf32> to vector<8xf32>
    %19 = vector.shape_cast %18 : vector<8xf32> to vector<8x1xf32>
    %20 = tpu.reciprocal %19 {approx = true} : vector<8x1xf32> -> vector<8x1xf32>
    %21 = vector.broadcast %20 : vector<8x1xf32> to vector<8x8xf32>
    %22 = arith.mulf %17, %21 : vector<8x8xf32>
    %23 = arith.truncf %22 : vector<8x8xf32> to vector<8x8xbf16>
    %cst_14 = arith.constant dense<0.000000e+00> : vector<8x128xf32>
    %24 = tpu.matmul %23, %5, %cst_14 {dimension_numbers = #tpu.dot_dimension_numbers<[1], [0], [0], [1], [0, 0, 1, 1], [], []>} : vector<8x8xbf16>, vector<8x128xbf16>, vector<8x128xf32> -> vector<8x128xf32>
    %25 = arith.truncf %24 : vector<8x128xf32> to vector<8x128xbf16>
    %c0_15 = arith.constant 0 : index
    %c0_16 = arith.constant 0 : index
    %c0_17 = arith.constant 0 : index
    %26 = vector.load %arg7[%c0_15, %c0_16, %c0_17] : memref<1x8x128xbf16, #tpu.memory_space<vmem>>, vector<1x8x128xbf16>
    %27 = vector.shape_cast %26 : vector<1x8x128xbf16> to vector<8x128xbf16>
    %28 = vector.shape_cast %25 : vector<8x128xbf16> to vector<1x8x128xbf16>
    tpu.vector_store %arg7[%c0_15, %c0_16, %c0_17], %28 {strides = array<i32>} : memref<1x8x128xbf16, #tpu.memory_space<vmem>>, vector<1x8x128xbf16>,
    return
  }
  func.func @transform_0(%arg0: i32, %arg1: i32, %arg2: i32) -> (i32, i32, i32) {
    %c0_i32 = arith.constant 0 : i32
    return %arg0, %arg2, %arg1 : i32, i32, i32
  }
  func.func @transform_1(%arg0: i32, %arg1: i32, %arg2: i32) -> (i32, i32, i32) {
    %c2_i32 = arith.constant 2 : i32
    %0 = arith.addi %c2_i32, %arg1 : i32
    %c0_i32 = arith.constant 0 : i32
    %c0_i32_0 = arith.constant 0 : i32
    return %arg0, %c0_i32, %0 : i32, i32, i32
  }
  func.func @transform_2(%arg0: i32, %arg1: i32, %arg2: i32) -> (i32, i32, i32) {
    %c4_i32 = arith.constant 4 : i32
    %0 = arith.addi %c4_i32, %arg1 : i32
    %c0_i32 = arith.constant 0 : i32
    %c0_i32_0 = arith.constant 0 : i32
    return %arg0, %c0_i32, %0 : i32, i32, i32
  }
  func.func @transform_3(%arg0: i32, %arg1: i32, %arg2: i32) -> (i32, i32, i32) {
    %c0_i32 = arith.constant 0 : i32
    %c0_i32_0 = arith.constant 0 : i32
    %c0_i32_1 = arith.constant 0 : i32
    return %arg0, %c0_i32, %c0_i32_0 : i32, i32, i32
  }
  func.func @transform_4(%arg0: i32, %arg1: i32, %arg2: i32) -> (i32, i32, i32) {
    %c0_i32 = arith.constant 0 : i32
    return %arg0, %arg2, %arg1 : i32, i32, i32
  }
}

module attributes {stable_mosaic.version = 11 : i64} {
  func.func @_dense_res_ln_kernel(%arg0: i32, %arg1: i32, %arg2: memref<16x256xbf16, #tpu.memory_space<vmem>>, %arg3: memref<256x256xbf16, #tpu.memory_space<vmem>>, %arg4: memref<1x256xf32, #tpu.memory_space<vmem>>, %arg5: memref<16x256xbf16, #tpu.memory_space<vmem>>, %arg6: memref<1x256xf32, #tpu.memory_space<vmem>>, %arg7: memref<1x256xf32, #tpu.memory_space<vmem>>, %arg8: memref<16x256xbf16, #tpu.memory_space<vmem>>, %arg9: memref<16x256xf32, #tpu.memory_space<vmem>>) attributes {dimension_semantics = [#tpu.dimension_semantics<parallel>, #tpu.dimension_semantics<arbitrary>], iteration_bounds = array<i64: 1, 1>, scalar_prefetch = 0 : i64, scratch_operands = 1 : i64, tpu.core_type = #tpu.core_type<tc>, window_params = [{transform_indices = @transform_0, window_bounds = array<i64: 16, 256>}, {transform_indices = @transform_1, window_bounds = array<i64: 256, 256>}, {pipeline_mode = #tpu.pipeline_mode<synchronous>, transform_indices = @transform_2, window_bounds = array<i64: 1, 256>}, {transform_indices = @transform_3, window_bounds = array<i64: 16, 256>}, {pipeline_mode = #tpu.pipeline_mode<synchronous>, transform_indices = @transform_4, window_bounds = array<i64: 1, 256>}, {pipeline_mode = #tpu.pipeline_mode<synchronous>, transform_indices = @transform_5, window_bounds = array<i64: 1, 256>}, {transform_indices = @transform_6, window_bounds = array<i64: 16, 256>}]} {
    %c0_i32 = arith.constant 0 : i32
    %0 = arith.cmpi eq, %arg1, %c0_i32 : i32
    %1 = arith.extui %0 : i1 to i32
    %c0_i32_0 = arith.constant 0 : i32
    %2 = arith.cmpi ne, %1, %c0_i32_0 : i32
    scf.if %2 {
      %cst_10 = arith.constant 0.000000e+00 : f32
      %12 = vector.broadcast %cst_10 : f32 to vector<16x256xf32>
      %c0_11 = arith.constant 0 : index
      %c0_12 = arith.constant 0 : index
      %13 = vector.load %arg9[%c0_11, %c0_12] : memref<16x256xf32, #tpu.memory_space<vmem>>, vector<16x256xf32>
      tpu.vector_store %arg9[%c0_11, %c0_12], %12 {strides = array<i32>} : memref<16x256xf32, #tpu.memory_space<vmem>>, vector<16x256xf32>,
    } else {
    }
    %c0 = arith.constant 0 : index
    %c0_1 = arith.constant 0 : index
    %3 = vector.load %arg9[%c0, %c0_1] : memref<16x256xf32, #tpu.memory_space<vmem>>, vector<16x256xf32>
    %c0_2 = arith.constant 0 : index
    %c0_3 = arith.constant 0 : index
    %4 = vector.load %arg2[%c0_2, %c0_3] : memref<16x256xbf16, #tpu.memory_space<vmem>>, vector<16x256xbf16>
    %c0_4 = arith.constant 0 : index
    %c0_5 = arith.constant 0 : index
    %5 = vector.load %arg3[%c0_4, %c0_5] : memref<256x256xbf16, #tpu.memory_space<vmem>>, vector<256x256xbf16>
    %cst = arith.constant dense<0.000000e+00> : vector<16x256xf32>
    %6 = tpu.matmul %4, %5, %cst {dimension_numbers = #tpu.dot_dimension_numbers<[1], [0], [0], [1], [0, 0, 1, 1], [], []>} : vector<16x256xbf16>, vector<256x256xbf16>, vector<16x256xf32> -> vector<16x256xf32>
    %7 = arith.addf %3, %6 : vector<16x256xf32>
    %c0_6 = arith.constant 0 : index
    %c0_7 = arith.constant 0 : index
    %8 = vector.load %arg9[%c0_6, %c0_7] : memref<16x256xf32, #tpu.memory_space<vmem>>, vector<16x256xf32>
    tpu.vector_store %arg9[%c0_6, %c0_7], %7 {strides = array<i32>} : memref<16x256xf32, #tpu.memory_space<vmem>>, vector<16x256xf32>,
    %c0_i32_8 = arith.constant 0 : i32
    %9 = arith.cmpi eq, %arg1, %c0_i32_8 : i32
    %10 = arith.extui %9 : i1 to i32
    %c0_i32_9 = arith.constant 0 : i32
    %11 = arith.cmpi ne, %10, %c0_i32_9 : i32
    scf.if %11 {
      %c0_10 = arith.constant 0 : index
      %c0_11 = arith.constant 0 : index
      %12 = vector.load %arg9[%c0_10, %c0_11] : memref<16x256xf32, #tpu.memory_space<vmem>>, vector<16x256xf32>
      %c0_12 = arith.constant 0 : index
      %c0_13 = arith.constant 0 : index
      %13 = vector.load %arg4[%c0_12, %c0_13] : memref<1x256xf32, #tpu.memory_space<vmem>>, vector<1x256xf32>
      %14 = vector.broadcast %13 : vector<1x256xf32> to vector<16x256xf32>
      %15 = arith.addf %12, %14 : vector<16x256xf32>
      %c0_14 = arith.constant 0 : index
      %c0_15 = arith.constant 0 : index
      %16 = vector.load %arg5[%c0_14, %c0_15] : memref<16x256xbf16, #tpu.memory_space<vmem>>, vector<16x256xbf16>
      %17 = arith.extf %16 : vector<16x256xbf16> to vector<16x256xf32>
      %18 = arith.addf %15, %17 : vector<16x256xf32>
      %cst_16 = arith.constant dense<0.000000e+00> : vector<16xf32>
      %19 = vector.multi_reduction <add>, %18, %cst_16 [1] : vector<16x256xf32> to vector<16xf32>
      %20 = vector.shape_cast %19 : vector<16xf32> to vector<16x1xf32>
      %cst_17 = arith.constant 2.560000e+02 : f32
      %21 = vector.broadcast %cst_17 : f32 to vector<16x1xf32>
      %22 = arith.divf %20, %21 : vector<16x1xf32>
      %23 = vector.broadcast %22 : vector<16x1xf32> to vector<16x256xf32>
      %24 = arith.subf %18, %23 : vector<16x256xf32>
      %25 = arith.mulf %24, %24 : vector<16x256xf32>
      %cst_18 = arith.constant dense<0.000000e+00> : vector<16xf32>
      %26 = vector.multi_reduction <add>, %25, %cst_18 [1] : vector<16x256xf32> to vector<16xf32>
      %27 = vector.shape_cast %26 : vector<16xf32> to vector<16x1xf32>
      %cst_19 = arith.constant 2.560000e+02 : f32
      %28 = vector.broadcast %cst_19 : f32 to vector<16x1xf32>
      %29 = arith.divf %27, %28 : vector<16x1xf32>
      %cst_20 = arith.constant 9.99999996E-13 : f32
      %30 = vector.broadcast %cst_20 : f32 to vector<16x1xf32>
      %31 = arith.addf %29, %30 : vector<16x1xf32>
      %32 = math.rsqrt %31 : vector<16x1xf32>
      %33 = vector.broadcast %22 : vector<16x1xf32> to vector<16x256xf32>
      %34 = arith.subf %18, %33 : vector<16x256xf32>
      %35 = vector.broadcast %32 : vector<16x1xf32> to vector<16x256xf32>
      %36 = arith.mulf %34, %35 : vector<16x256xf32>
      %c0_21 = arith.constant 0 : index
      %c0_22 = arith.constant 0 : index
      %37 = vector.load %arg6[%c0_21, %c0_22] : memref<1x256xf32, #tpu.memory_space<vmem>>, vector<1x256xf32>
      %38 = vector.broadcast %37 : vector<1x256xf32> to vector<16x256xf32>
      %39 = arith.mulf %36, %38 : vector<16x256xf32>
      %c0_23 = arith.constant 0 : index
      %c0_24 = arith.constant 0 : index
      %40 = vector.load %arg7[%c0_23, %c0_24] : memref<1x256xf32, #tpu.memory_space<vmem>>, vector<1x256xf32>
      %41 = vector.broadcast %40 : vector<1x256xf32> to vector<16x256xf32>
      %42 = arith.addf %39, %41 : vector<16x256xf32>
      %43 = arith.truncf %42 : vector<16x256xf32> to vector<16x256xbf16>
      %c0_25 = arith.constant 0 : index
      %c0_26 = arith.constant 0 : index
      %44 = vector.load %arg8[%c0_25, %c0_26] : memref<16x256xbf16, #tpu.memory_space<vmem>>, vector<16x256xbf16>
      tpu.vector_store %arg8[%c0_25, %c0_26], %43 {strides = array<i32>} : memref<16x256xbf16, #tpu.memory_space<vmem>>, vector<16x256xbf16>,
    } else {
    }
    return
  }
  func.func @transform_0(%arg0: i32, %arg1: i32) -> (i32, i32) {
    %c0_i32 = arith.constant 0 : i32
    return %arg0, %arg1 : i32, i32
  }
  func.func @transform_1(%arg0: i32, %arg1: i32) -> (i32, i32) {
    %c0_i32 = arith.constant 0 : i32
    %c0_i32_0 = arith.constant 0 : i32
    return %arg1, %c0_i32 : i32, i32
  }
  func.func @transform_2(%arg0: i32, %arg1: i32) -> (i32, i32) {
    %c0_i32 = arith.constant 0 : i32
    %c0_i32_0 = arith.constant 0 : i32
    %c0_i32_1 = arith.constant 0 : i32
    return %c0_i32, %c0_i32_0 : i32, i32
  }
  func.func @transform_3(%arg0: i32, %arg1: i32) -> (i32, i32) {
    %c0_i32 = arith.constant 0 : i32
    %c0_i32_0 = arith.constant 0 : i32
    return %arg0, %c0_i32 : i32, i32
  }
  func.func @transform_4(%arg0: i32, %arg1: i32) -> (i32, i32) {
    %c0_i32 = arith.constant 0 : i32
    %c0_i32_0 = arith.constant 0 : i32
    %c0_i32_1 = arith.constant 0 : i32
    return %c0_i32, %c0_i32_0 : i32, i32
  }
  func.func @transform_5(%arg0: i32, %arg1: i32) -> (i32, i32) {
    %c0_i32 = arith.constant 0 : i32
    %c0_i32_0 = arith.constant 0 : i32
    %c0_i32_1 = arith.constant 0 : i32
    return %c0_i32, %c0_i32_0 : i32, i32
  }
  func.func @transform_6(%arg0: i32, %arg1: i32) -> (i32, i32) {
    %c0_i32 = arith.constant 0 : i32
    %c0_i32_0 = arith.constant 0 : i32
    return %arg0, %c0_i32 : i32, i32
  }
}

module attributes {stable_mosaic.version = 11 : i64} {
  func.func @_dense_kernel(%arg0: i32, %arg1: i32, %arg2: i32, %arg3: memref<16x256xbf16, #tpu.memory_space<vmem>>, %arg4: memref<256x512xbf16, #tpu.memory_space<vmem>>, %arg5: memref<1x512xf32, #tpu.memory_space<vmem>>, %arg6: memref<16x512xbf16, #tpu.memory_space<vmem>>, %arg7: memref<16x512xf32, #tpu.memory_space<vmem>>) attributes {dimension_semantics = [#tpu.dimension_semantics<parallel>, #tpu.dimension_semantics<parallel>, #tpu.dimension_semantics<arbitrary>], iteration_bounds = array<i64: 1, 1, 1>, scalar_prefetch = 0 : i64, scratch_operands = 1 : i64, tpu.core_type = #tpu.core_type<tc>, window_params = [{transform_indices = @transform_0, window_bounds = array<i64: 16, 256>}, {transform_indices = @transform_1, window_bounds = array<i64: 256, 512>}, {transform_indices = @transform_2, window_bounds = array<i64: 1, 512>}, {transform_indices = @transform_3, window_bounds = array<i64: 16, 512>}]} {
    %c0_i32 = arith.constant 0 : i32
    %0 = arith.cmpi eq, %arg2, %c0_i32 : i32
    %1 = arith.extui %0 : i1 to i32
    %c0_i32_0 = arith.constant 0 : i32
    %2 = arith.cmpi ne, %1, %c0_i32_0 : i32
    scf.if %2 {
      %cst_10 = arith.constant 0.000000e+00 : f32
      %12 = vector.broadcast %cst_10 : f32 to vector<16x512xf32>
      %c0_11 = arith.constant 0 : index
      %c0_12 = arith.constant 0 : index
      %13 = vector.load %arg7[%c0_11, %c0_12] : memref<16x512xf32, #tpu.memory_space<vmem>>, vector<16x512xf32>
      tpu.vector_store %arg7[%c0_11, %c0_12], %12 {strides = array<i32>} : memref<16x512xf32, #tpu.memory_space<vmem>>, vector<16x512xf32>,
    } else {
    }
    %c0 = arith.constant 0 : index
    %c0_1 = arith.constant 0 : index
    %3 = vector.load %arg7[%c0, %c0_1] : memref<16x512xf32, #tpu.memory_space<vmem>>, vector<16x512xf32>
    %c0_2 = arith.constant 0 : index
    %c0_3 = arith.constant 0 : index
    %4 = vector.load %arg3[%c0_2, %c0_3] : memref<16x256xbf16, #tpu.memory_space<vmem>>, vector<16x256xbf16>
    %c0_4 = arith.constant 0 : index
    %c0_5 = arith.constant 0 : index
    %5 = vector.load %arg4[%c0_4, %c0_5] : memref<256x512xbf16, #tpu.memory_space<vmem>>, vector<256x512xbf16>
    %cst = arith.constant dense<0.000000e+00> : vector<16x512xf32>
    %6 = tpu.matmul %4, %5, %cst {dimension_numbers = #tpu.dot_dimension_numbers<[1], [0], [0], [1], [0, 0, 1, 1], [], []>} : vector<16x256xbf16>, vector<256x512xbf16>, vector<16x512xf32> -> vector<16x512xf32>
    %7 = arith.addf %3, %6 : vector<16x512xf32>
    %c0_6 = arith.constant 0 : index
    %c0_7 = arith.constant 0 : index
    %8 = vector.load %arg7[%c0_6, %c0_7] : memref<16x512xf32, #tpu.memory_space<vmem>>, vector<16x512xf32>
    tpu.vector_store %arg7[%c0_6, %c0_7], %7 {strides = array<i32>} : memref<16x512xf32, #tpu.memory_space<vmem>>, vector<16x512xf32>,
    %c0_i32_8 = arith.constant 0 : i32
    %9 = arith.cmpi eq, %arg2, %c0_i32_8 : i32
    %10 = arith.extui %9 : i1 to i32
    %c0_i32_9 = arith.constant 0 : i32
    %11 = arith.cmpi ne, %10, %c0_i32_9 : i32
    scf.if %11 {
      %c0_10 = arith.constant 0 : index
      %c0_11 = arith.constant 0 : index
      %12 = vector.load %arg7[%c0_10, %c0_11] : memref<16x512xf32, #tpu.memory_space<vmem>>, vector<16x512xf32>
      %c0_12 = arith.constant 0 : index
      %c0_13 = arith.constant 0 : index
      %13 = vector.load %arg5[%c0_12, %c0_13] : memref<1x512xf32, #tpu.memory_space<vmem>>, vector<1x512xf32>
      %14 = vector.broadcast %13 : vector<1x512xf32> to vector<16x512xf32>
      %15 = arith.addf %12, %14 : vector<16x512xf32>
      %cst_14 = arith.constant 5.000000e-01 : f32
      %16 = vector.broadcast %cst_14 : f32 to vector<16x512xf32>
      %17 = arith.mulf %16, %15 : vector<16x512xf32>
      %cst_15 = arith.constant 0.707106769 : f32
      %18 = vector.broadcast %cst_15 : f32 to vector<16x512xf32>
      %19 = arith.mulf %15, %18 : vector<16x512xf32>
      %20 = math.erf %19 : vector<16x512xf32>
      %cst_16 = arith.constant 1.000000e+00 : f32
      %21 = vector.broadcast %cst_16 : f32 to vector<16x512xf32>
      %22 = arith.addf %21, %20 : vector<16x512xf32>
      %23 = arith.mulf %17, %22 : vector<16x512xf32>
      %24 = arith.truncf %23 : vector<16x512xf32> to vector<16x512xbf16>
      %c0_17 = arith.constant 0 : index
      %c0_18 = arith.constant 0 : index
      %25 = vector.load %arg6[%c0_17, %c0_18] : memref<16x512xbf16, #tpu.memory_space<vmem>>, vector<16x512xbf16>
      tpu.vector_store %arg6[%c0_17, %c0_18], %24 {strides = array<i32>} : memref<16x512xbf16, #tpu.memory_space<vmem>>, vector<16x512xbf16>,
    } else {
    }
    return
  }
  func.func @transform_0(%arg0: i32, %arg1: i32, %arg2: i32) -> (i32, i32) {
    %c0_i32 = arith.constant 0 : i32
    return %arg0, %arg2 : i32, i32
  }
  func.func @transform_1(%arg0: i32, %arg1: i32, %arg2: i32) -> (i32, i32) {
    %c0_i32 = arith.constant 0 : i32
    return %arg2, %arg1 : i32, i32
  }
  func.func @transform_2(%arg0: i32, %arg1: i32, %arg2: i32) -> (i32, i32) {
    %c0_i32 = arith.constant 0 : i32
    %c0_i32_0 = arith.constant 0 : i32
    return %c0_i32, %arg1 : i32, i32
  }
  func.func @transform_3(%arg0: i32, %arg1: i32, %arg2: i32) -> (i32, i32) {
    %c0_i32 = arith.constant 0 : i32
    return %arg0, %arg1 : i32, i32
  }
}

module attributes {stable_mosaic.version = 11 : i64} {
  func.func @_dense_res_ln_kernel(%arg0: i32, %arg1: i32, %arg2: memref<16x512xbf16, #tpu.memory_space<vmem>>, %arg3: memref<512x256xbf16, #tpu.memory_space<vmem>>, %arg4: memref<1x256xf32, #tpu.memory_space<vmem>>, %arg5: memref<16x256xbf16, #tpu.memory_space<vmem>>, %arg6: memref<1x256xf32, #tpu.memory_space<vmem>>, %arg7: memref<1x256xf32, #tpu.memory_space<vmem>>, %arg8: memref<16x256xbf16, #tpu.memory_space<vmem>>, %arg9: memref<16x256xf32, #tpu.memory_space<vmem>>) attributes {dimension_semantics = [#tpu.dimension_semantics<parallel>, #tpu.dimension_semantics<arbitrary>], iteration_bounds = array<i64: 1, 1>, scalar_prefetch = 0 : i64, scratch_operands = 1 : i64, tpu.core_type = #tpu.core_type<tc>, window_params = [{transform_indices = @transform_0, window_bounds = array<i64: 16, 512>}, {transform_indices = @transform_1, window_bounds = array<i64: 512, 256>}, {pipeline_mode = #tpu.pipeline_mode<synchronous>, transform_indices = @transform_2, window_bounds = array<i64: 1, 256>}, {transform_indices = @transform_3, window_bounds = array<i64: 16, 256>}, {pipeline_mode = #tpu.pipeline_mode<synchronous>, transform_indices = @transform_4, window_bounds = array<i64: 1, 256>}, {pipeline_mode = #tpu.pipeline_mode<synchronous>, transform_indices = @transform_5, window_bounds = array<i64: 1, 256>}, {transform_indices = @transform_6, window_bounds = array<i64: 16, 256>}]} {
    %c0_i32 = arith.constant 0 : i32
    %0 = arith.cmpi eq, %arg1, %c0_i32 : i32
    %1 = arith.extui %0 : i1 to i32
    %c0_i32_0 = arith.constant 0 : i32
    %2 = arith.cmpi ne, %1, %c0_i32_0 : i32
    scf.if %2 {
      %cst_10 = arith.constant 0.000000e+00 : f32
      %12 = vector.broadcast %cst_10 : f32 to vector<16x256xf32>
      %c0_11 = arith.constant 0 : index
      %c0_12 = arith.constant 0 : index
      %13 = vector.load %arg9[%c0_11, %c0_12] : memref<16x256xf32, #tpu.memory_space<vmem>>, vector<16x256xf32>
      tpu.vector_store %arg9[%c0_11, %c0_12], %12 {strides = array<i32>} : memref<16x256xf32, #tpu.memory_space<vmem>>, vector<16x256xf32>,
    } else {
    }
    %c0 = arith.constant 0 : index
    %c0_1 = arith.constant 0 : index
    %3 = vector.load %arg9[%c0, %c0_1] : memref<16x256xf32, #tpu.memory_space<vmem>>, vector<16x256xf32>
    %c0_2 = arith.constant 0 : index
    %c0_3 = arith.constant 0 : index
    %4 = vector.load %arg2[%c0_2, %c0_3] : memref<16x512xbf16, #tpu.memory_space<vmem>>, vector<16x512xbf16>
    %c0_4 = arith.constant 0 : index
    %c0_5 = arith.constant 0 : index
    %5 = vector.load %arg3[%c0_4, %c0_5] : memref<512x256xbf16, #tpu.memory_space<vmem>>, vector<512x256xbf16>
    %cst = arith.constant dense<0.000000e+00> : vector<16x256xf32>
    %6 = tpu.matmul %4, %5, %cst {dimension_numbers = #tpu.dot_dimension_numbers<[1], [0], [0], [1], [0, 0, 1, 1], [], []>} : vector<16x512xbf16>, vector<512x256xbf16>, vector<16x256xf32> -> vector<16x256xf32>
    %7 = arith.addf %3, %6 : vector<16x256xf32>
    %c0_6 = arith.constant 0 : index
    %c0_7 = arith.constant 0 : index
    %8 = vector.load %arg9[%c0_6, %c0_7] : memref<16x256xf32, #tpu.memory_space<vmem>>, vector<16x256xf32>
    tpu.vector_store %arg9[%c0_6, %c0_7], %7 {strides = array<i32>} : memref<16x256xf32, #tpu.memory_space<vmem>>, vector<16x256xf32>,
    %c0_i32_8 = arith.constant 0 : i32
    %9 = arith.cmpi eq, %arg1, %c0_i32_8 : i32
    %10 = arith.extui %9 : i1 to i32
    %c0_i32_9 = arith.constant 0 : i32
    %11 = arith.cmpi ne, %10, %c0_i32_9 : i32
    scf.if %11 {
      %c0_10 = arith.constant 0 : index
      %c0_11 = arith.constant 0 : index
      %12 = vector.load %arg9[%c0_10, %c0_11] : memref<16x256xf32, #tpu.memory_space<vmem>>, vector<16x256xf32>
      %c0_12 = arith.constant 0 : index
      %c0_13 = arith.constant 0 : index
      %13 = vector.load %arg4[%c0_12, %c0_13] : memref<1x256xf32, #tpu.memory_space<vmem>>, vector<1x256xf32>
      %14 = vector.broadcast %13 : vector<1x256xf32> to vector<16x256xf32>
      %15 = arith.addf %12, %14 : vector<16x256xf32>
      %c0_14 = arith.constant 0 : index
      %c0_15 = arith.constant 0 : index
      %16 = vector.load %arg5[%c0_14, %c0_15] : memref<16x256xbf16, #tpu.memory_space<vmem>>, vector<16x256xbf16>
      %17 = arith.extf %16 : vector<16x256xbf16> to vector<16x256xf32>
      %18 = arith.addf %15, %17 : vector<16x256xf32>
      %cst_16 = arith.constant dense<0.000000e+00> : vector<16xf32>
      %19 = vector.multi_reduction <add>, %18, %cst_16 [1] : vector<16x256xf32> to vector<16xf32>
      %20 = vector.shape_cast %19 : vector<16xf32> to vector<16x1xf32>
      %cst_17 = arith.constant 2.560000e+02 : f32
      %21 = vector.broadcast %cst_17 : f32 to vector<16x1xf32>
      %22 = arith.divf %20, %21 : vector<16x1xf32>
      %23 = vector.broadcast %22 : vector<16x1xf32> to vector<16x256xf32>
      %24 = arith.subf %18, %23 : vector<16x256xf32>
      %25 = arith.mulf %24, %24 : vector<16x256xf32>
      %cst_18 = arith.constant dense<0.000000e+00> : vector<16xf32>
      %26 = vector.multi_reduction <add>, %25, %cst_18 [1] : vector<16x256xf32> to vector<16xf32>
      %27 = vector.shape_cast %26 : vector<16xf32> to vector<16x1xf32>
      %cst_19 = arith.constant 2.560000e+02 : f32
      %28 = vector.broadcast %cst_19 : f32 to vector<16x1xf32>
      %29 = arith.divf %27, %28 : vector<16x1xf32>
      %cst_20 = arith.constant 9.99999996E-13 : f32
      %30 = vector.broadcast %cst_20 : f32 to vector<16x1xf32>
      %31 = arith.addf %29, %30 : vector<16x1xf32>
      %32 = math.rsqrt %31 : vector<16x1xf32>
      %33 = vector.broadcast %22 : vector<16x1xf32> to vector<16x256xf32>
      %34 = arith.subf %18, %33 : vector<16x256xf32>
      %35 = vector.broadcast %32 : vector<16x1xf32> to vector<16x256xf32>
      %36 = arith.mulf %34, %35 : vector<16x256xf32>
      %c0_21 = arith.constant 0 : index
      %c0_22 = arith.constant 0 : index
      %37 = vector.load %arg6[%c0_21, %c0_22] : memref<1x256xf32, #tpu.memory_space<vmem>>, vector<1x256xf32>
      %38 = vector.broadcast %37 : vector<1x256xf32> to vector<16x256xf32>
      %39 = arith.mulf %36, %38 : vector<16x256xf32>
      %c0_23 = arith.constant 0 : index
      %c0_24 = arith.constant 0 : index
      %40 = vector.load %arg7[%c0_23, %c0_24] : memref<1x256xf32, #tpu.memory_space<vmem>>, vector<1x256xf32>
      %41 = vector.broadcast %40 : vector<1x256xf32> to vector<16x256xf32>
      %42 = arith.addf %39, %41 : vector<16x256xf32>
      %43 = arith.truncf %42 : vector<16x256xf32> to vector<16x256xbf16>
      %c0_25 = arith.constant 0 : index
      %c0_26 = arith.constant 0 : index
      %44 = vector.load %arg8[%c0_25, %c0_26] : memref<16x256xbf16, #tpu.memory_space<vmem>>, vector<16x256xbf16>
      tpu.vector_store %arg8[%c0_25, %c0_26], %43 {strides = array<i32>} : memref<16x256xbf16, #tpu.memory_space<vmem>>, vector<16x256xbf16>,
    } else {
    }
    return
  }
  func.func @transform_0(%arg0: i32, %arg1: i32) -> (i32, i32) {
    %c0_i32 = arith.constant 0 : i32
    return %arg0, %arg1 : i32, i32
  }
  func.func @transform_1(%arg0: i32, %arg1: i32) -> (i32, i32) {
    %c0_i32 = arith.constant 0 : i32
    %c0_i32_0 = arith.constant 0 : i32
    return %arg1, %c0_i32 : i32, i32
  }
  func.func @transform_2(%arg0: i32, %arg1: i32) -> (i32, i32) {
    %c0_i32 = arith.constant 0 : i32
    %c0_i32_0 = arith.constant 0 : i32
    %c0_i32_1 = arith.constant 0 : i32
    return %c0_i32, %c0_i32_0 : i32, i32
  }
  func.func @transform_3(%arg0: i32, %arg1: i32) -> (i32, i32) {
    %c0_i32 = arith.constant 0 : i32
    %c0_i32_0 = arith.constant 0 : i32
    return %arg0, %c0_i32 : i32, i32
  }
  func.func @transform_4(%arg0: i32, %arg1: i32) -> (i32, i32) {
    %c0_i32 = arith.constant 0 : i32
    %c0_i32_0 = arith.constant 0 : i32
    %c0_i32_1 = arith.constant 0 : i32
    return %c0_i32, %c0_i32_0 : i32, i32
  }
  func.func @transform_5(%arg0: i32, %arg1: i32) -> (i32, i32) {
    %c0_i32 = arith.constant 0 : i32
    %c0_i32_0 = arith.constant 0 : i32
    %c0_i32_1 = arith.constant 0 : i32
    return %c0_i32, %c0_i32_0 : i32, i32
  }
  func.func @transform_6(%arg0: i32, %arg1: i32) -> (i32, i32) {
    %c0_i32 = arith.constant 0 : i32
    %c0_i32_0 = arith.constant 0 : i32
    return %arg0, %c0_i32 : i32, i32
  }
}

</mosaic_0001>

<bundles_post_ra>
// kernel: electra_classifier_forward.11
= control target key start
LH: loop header
LB: loop body
LE: loop exit
PB: predicated region body
PF: predicated region fallthrough
CT: control target
= control target key end

     0   :  { %v110_v6 = vmov 256.0   ;;  %s155_s0 = inlined_call_operand.vmem [shape: f32[16,256], index: 0, kind: input, shape index: {}]   ;;  %s156_s1 = inlined_call_operand.vmem [shape: f32[1,256], index: 1, kind: input, shape index: {}]   ;;  %s157_s2 = inlined_call_operand.vmem [shape: f32[1,256], index: 2, kind: input, shape index: {}]   ;;  %s158_s3 = inlined_call_operand.vmem [shape: bf16[16,256], index: 3, kind: output, shape index: {}]  }
   0x1   :  { %v14_v0 = vld [vmem:[%s155_s0] sm:$0xff]  ;;  %v15_v1 = vld [vmem:[%s155_s0 + $0x8] sm:$0xff]  ;;  %v16_v3 = vld [vmem:[%s155_s0 + $0x10] sm:$0xff]  ;;  %104 = vrcp.f32 %v110_v6 }
   0x2   :  { %v18_v2 = vadd.f32 %v15_v1, %v14_v0  ;;  %v17_v4 = vld [vmem:[%s155_s0 + $0x18] sm:$0xff]  ;;  %v75_v37 = vld [vmem:[%s156_s1] sm:$0x3] }
   0x3   :  { %v21_v5 = vadd.f32 %v17_v4, %v16_v3  ;;  %v85_v40 = vld [vmem:[%s157_s2] sm:$0x3]  ;;  %v77_v43 = vperm.slane %v75_v37, 0  ;;  %v78_v44 = vperm.slane %v75_v37, 1 }
   0x4   :  { %19 = vadd.xlane.f32.xlu0 %v18_v2  ;;  %v87_v47 = vperm.slane %v85_v40, 0  ;;  %v88_v48 = vperm.slane %v85_v40, 1 }
   0x7   :  { %v105_v7 = vpop.eup %104 }
   0x8   :  { %v25_v8 = vmul.f32 256.0, %v105_v7  ;;  %vm29_vm0 = vweird.f32 %v105_v7 }
   0xa   :  { %v26_v9 = vsub.f32 1.0, %v25_v8 }
   0xc   :  { %22 = vadd.xlane.f32.xlu0 %v21_v5  ;;  %v27_v10 = vmul.f32 %v105_v7, %v26_v9 }
   0xe   :  { %v28_v11 = vadd.f32 %v105_v7, %v27_v10 }
  0x10   :  { %v30_v12 = vsel %vm29_vm0, %v105_v7, %v28_v11 }
  0x77   :  { %v20_v13 = vpop.xlane.xlu0 %19 }
  0x78   :  { %v31_v14 = vmul.f32 %v30_v12, %v20_v13 }
  0x7a   :  { %v33_v15 = vsub.f32 %v14_v0, %v31_v14  ;;  %v34_v16 = vsub.f32 %v15_v1, %v31_v14 }
  0x7c   :  { %v37_v17 = vmul.f32 %v33_v15, %v33_v15  ;;  %v38_v18 = vmul.f32 %v34_v16, %v34_v16 }
  0x7e   :  { %v41_v19 = vadd.f32 %v38_v18, %v37_v17 }
  0x7f   :  { %v23_v20 = vpop.xlane.xlu0 %22 }
  0x80   :  { %v32_v21 = vmul.f32 %v30_v12, %v23_v20  ;;  %42 = vadd.xlane.f32.xlu1 %v41_v19 }
  0x82   :  { %v35_v22 = vsub.f32 %v16_v3, %v32_v21  ;;  %v36_v23 = vsub.f32 %v17_v4, %v32_v21 }
  0x84   :  { %v39_v24 = vmul.f32 %v35_v22, %v35_v22  ;;  %v40_v25 = vmul.f32 %v36_v23, %v36_v23 }
  0x86   :  { %v44_v26 = vadd.f32 %v40_v25, %v39_v24 }
  0x88   :  { %45 = vadd.xlane.f32.xlu1 %v44_v26 }
  0xf3   :  { %v43_v27 = vpop.xlane.xlu1 %42 }
  0xf4   :  { %v47_v28 = vmul.f32 %v43_v27, %v30_v12 }
  0xf6   :  { %v49_v29 = vadd.f32 1e-12, %v47_v28 }
  0xf8   :  { %106 = vrsqrt.f32 %v49_v29  ;;  %vm57_vm2 = vweird.f32 %v49_v29 }
  0xfb   :  { %v46_v30 = vpop.xlane.xlu1 %45 }
  0xfc   :  { %v48_v31 = vmul.f32 %v46_v30, %v30_v12 }
  0xfe   :  { %v107_v32 = vpop.eup %106  ;;  %v50_v33 = vadd.f32 1e-12, %v48_v31 }
  0xff   :  { %v52_v34 = vmul.f32 %v107_v32, %v49_v29  ;;  %vm58_vm1 = vweird.f32 %v107_v32 }
 0x100   :  { %108 = vrsqrt.f32 %v50_v33  ;;  %vm59_vm3 = vmor %vm57_vm2, %vm58_vm1  ;;  %vm67_vm5 = vweird.f32 %v50_v33 }
 0x101   :  { %v53_v35 = vmul.f32 %v107_v32, %v52_v34 }
 0x103   :  { %v54_v36 = vmul.f32 0.5, %v53_v35 }
 0x105   :  { %v55_v38 = vsub.f32 1.5, %v54_v36 }
 0x106   :  { %v109_v39 = vpop.eup %108 }
 0x107   :  { %v56_v41 = vmul.f32 %v107_v32, %v55_v38  ;;  %v62_v42 = vmul.f32 %v109_v39, %v50_v33  ;;  %vm68_vm4 = vweird.f32 %v109_v39 }
 0x108   :  { %vm69_vm6 = vmor %vm67_vm5, %vm68_vm4 }
 0x109   :  { %v60_v45 = vsel %vm59_vm3, %v107_v32, %v56_v41  ;;  %v63_v46 = vmul.f32 %v109_v39, %v62_v42 }
 0x10a   :  { %v71_v49 = vmul.f32 %v60_v45, %v33_v15  ;;  %v72_v50 = vmul.f32 %v60_v45, %v34_v16 }
 0x10b   :  { %v64_v51 = vmul.f32 0.5, %v63_v46 }
 0x10c   :  { %v81_v52 = vmul.f32 %v77_v43, %v71_v49  ;;  %v82_v53 = vmul.f32 %v78_v44, %v72_v50 }
 0x10d   :  { %v65_v54 = vsub.f32 1.5, %v64_v51 }
 0x10e   :  { %v91_v55 = vadd.f32 %v87_v47, %v81_v52  ;;  %v92_v56 = vadd.f32 %v88_v48, %v82_v53 }
 0x10f   :  { %v66_v57 = vmul.f32 %v109_v39, %v65_v54 }
 0x110   :  { %v95_v58 = vpack.c.bf16 %v92_v56, %v91_v55 }
 0x111   :  { %v70_v59 = vsel %vm69_vm6, %v109_v39, %v66_v57 }
 0x112   :  { %97 = vst [vmem:[%s158_s3] sm:$0xff] %v95_v58  ;;  %v73_v60 = vmul.f32 %v70_v59, %v35_v22  ;;  %v74_v61 = vmul.f32 %v70_v59, %v36_v23 }
 0x114   :  { %v83_v62 = vmul.f32 %v77_v43, %v73_v60  ;;  %v84_v63 = vmul.f32 %v78_v44, %v74_v61 }
 0x116   :  { %v93_v0 = vadd.f32 %v87_v47, %v83_v62  ;;  %v94_v1 = vadd.f32 %v88_v48, %v84_v63 }
 0x118   :  { %v96_v2 = vpack.c.bf16 %v94_v1, %v93_v0 }
 0x11a   :  { %98 = vst [vmem:[%s158_s3 + $0x8] sm:$0xff] %v96_v2 }

// kernel: electra_classifier_forward.13
= control target key start
LH: loop header
LB: loop body
LE: loop exit
PB: predicated region body
PF: predicated region fallthrough
CT: control target
= control target key end

     0   :  { %s688_s15 = smov 0   ;;  %s690_s16 = smov 0   ;;  %s769_s0 = inlined_call_operand.vmem [shape: bf16[2,8,768], index: 0, kind: input, shape index: {}, may-alias: {0,1,2}]   ;;  %s770_s1 = inlined_call_operand.vmem [shape: bf16[2,8,768], index: 1, kind: input, shape index: {}, may-alias: {0,1,2}]   ;;  %s771_s2 = inlined_call_operand.vmem [shape: bf16[2,8,768], index: 2, kind: input, shape index: {}, may-alias: {0,1,2}]   ;;  %s772_s3 = inlined_call_operand.vmem [shape: f32[2,1,8], index: 3, kind: input, shape index: {}]   ;;  %s773_s4 = inlined_call_operand.vmem [shape: bf16[2,8,256], index: 4, kind: output, shape index: {}]  }
   0x1   :  { %s692_s17 = smov 0   ;;  %s694_s18 = smov 0  }
   0x2   :  { %s696_s19 = smov 0  }
   0x3 LB: > { %s29_s20 = sadd.s32 1, %s653_s17  ;;  %s33_s21 = sadd.s32 1, %s657_s18  ;;  %s661_s19 = sphi %s696_s19, %s14_s19   ;;  %s657_s18 = sphi %s694_s18, %s777_s18   ;;  %s653_s17 = sphi %s692_s17, %s776_s17   ;;  %s649_s16 = sphi %s690_s16, %s775_s16   ;;  %s645_s15 = sphi %s688_s15, %s774_s15  }
   0x4   : > { %p31_p0 = scmp.ge.s32.totalorder %s29_s20, 2  ;;  %p568_p1 = scmp.ge.s32.totalorder %s661_s19, 1 }
   0x5   : > { %p242_p2 = scmp.lt.s32.totalorder %s661_s19, 5 }
   0x6   : > { %s779_s20 = smov (%p31_p0, %s29_s20), 0  ;;  %s781_s21 = smov (!%p31_p0, %s33_s21), %s657_s18 }
   0x7   : > { %p243_p3 = pnand %p568_p1, %p242_p2  ;;  %p35_p4 = scmp.ge.s32.totalorder %s781_s21, 2 }
   0x8   : > { %p303_p5 = scmp.lt.s32.totalorder (!%p243_p3), %s649_s16, 1  ;;  %s315_s22 = sadd.s32 (!%p243_p3), 2, %s645_s15 }
   0x9   : > { %s783_s21 = smov (%p35_p4, %s781_s21), 0  ;;  %246 = sbr.rel (%p243_p3) target bundleno = 548 (0x224), region = 36 }
   0xa   : > { %p318_p6 = scmp.lt.s32.totalorder (!%p243_p3), %s315_s22, 5  ;;  %p307_p7 = scmp.lt.s32.totalorder (!%p243_p3), %s645_s15, 5 }
   0xb   : > { %s325_s12 = sadd.s32 (!%p243_p3), 4, %s645_s15  ;;  %p342_p9 = scmp.lt.s32.totalorder (!%p243_p3), %s645_s15, 1 }
   0xc   : > { %p328_p8 = scmp.lt.s32.totalorder (!%p243_p3), %s325_s12, 5 }
   0xe   : > { %s785_s16 = smov (!%p303_p5, %s649_s16), 1  ;;  %s787_s22 = smov (!%p318_p6, %s315_s22), 5  ;;  %vm373_vm0 = vcmask 64512   ;;  %vm389_vm1 = vcmask 1043456  }
   0xf   : > { %s725_s23 = smul.u32 6, %s785_s16  ;;  %s337_s11 = scalar_lea.vmem %s772_s3, %s785_s16 }
  0x10   : > { %s308_s24 = scalar_select %p307_p7, %s645_s15, 5  ;;  %v618_v2 = vld [vmem:[%s337_s11] ss:$0 sm:$0xff] }
  0x11   : > { %s321_s25 = sadd.s32 %s725_s23, %s787_s22  ;;  %s789_s12 = smov (!%p328_p8, %s325_s12), 5 }
  0x12   : > { %s570_s26 = sshll.u32 %s321_s25, 2  ;;  %s312_s27 = sadd.s32 %s725_s23, %s308_s24 }
  0x13   : > { %s323_s30 = scalar_lea.vmem %s770_s1, %s570_s26  ;;  %s569_s5 = sshll.u32 %s312_s27, 2 }
  0x14   : > { %v352_v0 = vld [vmem:[%s323_s30] sm:$0xf]  ;;  %s314_s8 = scalar_lea.vmem %s769_s0, %s569_s5  ;;  %s331_s13 = sadd.s32 %s725_s23, %s789_s12 }
  0x15   : > { %361 = vmatpush.bf16.xpose.msra.mxu0 %v352_v0  ;;  %v351_v1 = vld [vmem:[%s314_s8] sm:$0xf]  ;;  %s571_s14 = sshll.u32 %s331_s13, 2  ;;  %s791_s15 = smov (!%p342_p9, %s645_s15), 1 }
  0x16   : > { %s333_s25 = scalar_lea.vmem %s771_s2, %s571_s14  ;;  %s572_s26 = sshll.u32 %s785_s16, 1 }
  0x17   : > { %v353_v13 = vld [vmem:[%s333_s25] sm:$0xf]  ;;  %s347_s23 = sadd.s32 %s572_s26, %s791_s15 }
  0x18   : > { %v391_v14 = vsel %vm389_vm1, %v353_v13, 0  ;;  %s573_s27 = sshll.u32 %s347_s23, 2 }
  0x19   : > { %400 = vmatpush.bf16.msra.mxu1 %v391_v14  ;;  %s349_s30 = scalar_lea.vmem %s773_s4, %s573_s27 }
  0x1c   : > { %362 = vmatmul.bf16.vlgmr.msra.gmra.mxu0 %v351_v1 }
  0x99   : > { %v363_v3 = vpop.f32.mrf.mxu0 }
  0x9a   : > { %v367_v4 = vmul.f32 0.088388346, %v363_v3 }
  0x9c   : > { %v372_v5 = vadd.f32 %v618_v2, %v367_v4 }
  0x9e   : > { %v374_v6 = vsel %vm373_vm0, %v372_v5, -inf }
  0x9f   : > { %375 = vmax.xlane.f32.xlu0 %v374_v6 }
  0xa1   : > { %v365_v7 = vpop.f32.mrf.mxu0 }
 0x112   : > { %v376_v8 = vpop.xlane.xlu0 %375 }
 0x113   : > { %v377_v9 = vsub.f32 %v372_v5, %v376_v8 }
 0x115   : > { %v378_v10 = vmul.f32 1.442695, %v377_v9 }
 0x117   : > { %619 = vpow2.f32 %v378_v10 }
 0x11d   : > { %v620_v11 = vpop.eup %619 }
 0x11e   : > { %v380_v12 = vsel %vm373_vm0, %v620_v11, 0.0 }
 0x11f   : > { %381 = vadd.xlane.f32.xlu0 %v380_v12 }
 0x192   : > { %v382_v15 = vpop.xlane.xlu0 %381 }
 0x193   : > { %621 = vrcp.f32 %v382_v15 }
 0x199   : > { %v622_v16 = vpop.eup %621 }
 0x19a   : > { %v384_v17 = vmul.f32 %v622_v16, %v620_v11 }
 0x19c   : > { %v385_v18 = vpack.c.bf16 %v384_v17, %v384_v17 }
 0x19e   : > { %574 = vmatmul.msk.bf16.vlgmr.msra.gmra.mxu1 %vm373_vm0, %v385_v18 }
 0x21b   : > { %v402_v19 = vpop.f32.mrf.mxu1 }
 0x21c   : > { %v406_v20 = vpack.c.bf16 %v402_v19, %v402_v19 }
 0x21e   : > { %407 = vst [vmem:[%s349_s30] sm:$0xf] %v406_v20 }
 0x223   : > { %v404_v21 = vpop.f32.mrf.mxu1 }
 0x224 PF: > { %s14_s19 = sadd.s32 1, %s661_s19   ;;  %s774_s15 = smov %s653_s17 }
 0x225   : > { %p11_p10 = scmp.ge.s32.totalorder %s14_s19, 6   ;;  %s775_s16 = smov %s657_s18 }
 0x226   : > { %s776_s17 = smov %s779_s20  ;;  %s777_s18 = smov %s783_s21 }
 0x227   :  { %13 = sbr.rel (!%p11_p10) target bundleno = 3 (0x3), region = 75 }

// kernel: electra_classifier_forward.12
= control target key start
LH: loop header
LB: loop body
LE: loop exit
PB: predicated region body
PF: predicated region fallthrough
CT: control target
= control target key end

     0   :  { %8 = vsyncpa [#allocation4], 0  ;;  %s1560_s0 = inlined_call_operand.vmem [shape: bf16[16,256], index: 0, kind: input, shape index: {}]   ;;  %s1561_s1 = inlined_call_operand.hbm [shape: bf16[256,768], index: 1, kind: input, shape index: {}]   ;;  %s1562_s2 = inlined_call_operand.vmem [shape: f32[1,768], index: 2, kind: input, shape index: {}]   ;;  %s1563_s3 = inlined_call_operand.vmem [shape: bf16[16,768], index: 3, kind: output, shape index: {}]  }
   0x1   :  { %10 = vsyncpa [#allocation4 + $0x1], 0  ;;  %s1343_s12 = smov 0   ;;  %s1345_s13 = smov 0  }
   0x2   :  { %s1347_s14 = smov 0   ;;  %s1349_s15 = smov 0  }
   0x3   :  { %s1351_s16 = smov 0   ;;  %s1353_s17 = smov 0  }
   0x4 LB: > { %s911_s18 = sadd.s32 4294967295, %s1318_s17   ;;  %s31_s19 = sadd.s32 1, %s1314_s16  ;;  %s1318_s17 = sphi %s1353_s17, %s16_s17   ;;  %s1314_s16 = sphi %s1351_s16, %s1571_s16   ;;  %s1310_s15 = sphi %s1349_s15, %s1570_s15   ;;  %s1306_s14 = sphi %s1347_s14, %s1569_s14   ;;  %s1302_s13 = sphi %s1345_s13, %s1568_s13   ;;  %s1298_s12 = sphi %s1343_s12, %s1567_s12  }
   0x5   : > { %p33_p0 = scmp.ge.s32.totalorder %s31_s19, 2  ;;  %s72_s20 = sadd.s32 1, %s1306_s14 }
   0x6   : > { %p79_p1 = scmp.ne.s32.totalorder %s1306_s14, %s1302_s13  ;;  %p80_p2 = scmp.eq.s32.totalorder %s1318_s17, 0 }
   0x7   : > { %s1573_s19 = smov (%p33_p0, %s31_s19), 0  ;;  %p85_p4 = scmp.ne.s32.totalorder %s1302_s13, %s1298_s12 }
   0x8   : > { %p1379_p3 = por %p80_p2, %p79_p1  ;;  %s68_s22 = ssub.s32 %s1314_s16, %s1573_s19 }
   0x9   : > { %p86_p5 = scmp.eq.s32.totalorder %s911_s18, 0  ;;  %p70_p6 = scmp.eq.s32.totalorder %s68_s22, 0 }
   0xa   : > { %p137_p7 = scmp.eq.s32.totalorder %s911_s18, 1  ;;  %p1186_p10 = scmp.lt.s32.totalorder %s1318_s17, 2 }
   0xb   : > { %p1386_p8 = por %p86_p5, %p85_p4  ;;  %s178_s26 = sand.u32 1, %s1306_s14  }
   0xc   : > { %s1391_s24 = scalar_select %p70_p6, %s1306_s14, %s72_s20  }
   0xd   : > { %p1393_p9 = por %p137_p7, %p79_p1  ;;  %s1125_s27 = smul.u32 12, %s1314_s16 }
   0xe   : > { %s1177_s28 = smul.u32 384, %s178_s26  ;;  %p1183_p11 = pnand %p1186_p10, %p1379_p3 }
   0xf   : > { %s190_s4 = scalar_lea.hbm %s1561_s1, %s1125_s27  ;;  %p917_p12 = scmp.ge.s32.totalorder %s1318_s17, 1 }
  0x10   : > { %s191_s5 = sshll.u32 %s190_s4, 4  ;;  %s182_s6 = scalar_lea.vmem [#allocation3], %s1177_s28  ;;  %s192_s5 = int_to_ptr.hbm [resolvable:$true] %s191_s5 }
  0x11   : > { %s193_s7 = sshll.u32 %s182_s6, 4  ;;  %s179_s8 = scalar_lea.sflag [#allocation4], %s178_s26  ;;  %s194_s7 = int_to_ptr.vmem [resolvable:$true] %s193_s7 }
  0x12   : > { %s1320_s9 = smov 384   ;;  %s1321_s10 = smov 192  }
  0x13   : > { %s1322_s11 = smov 12   ;;  %p209_p13 = scmp.lt.s32.totalorder %s1318_s17, 3 }
  0x14   : > { %1185 = dma.hbm_to_vmem [thread:$0]  (!%p1183_p11), %s192_s5, 6144, %s194_s7, %s179_s8, %s1320_s9, %s1321_s10, %s1322_s11  }
  0x15   : > { %p210_p0 = pnand %p917_p12, %p209_p13 }
  0x16   : > { %s1408_s12 = sand.u32 (!%p210_p0), 1, %s1302_s13  }
  0x17   : > { %213 = sbr.rel (%p210_p0) target bundleno = 245 (0xf5), region = 32  ;;  %s216_s20 = scalar_lea.sflag (!%p210_p0), [#allocation4], %s1408_s12 }
  0x18   : > { %s1178_s18 = smul.u32 (!%p210_p0), 384, %s1408_s12 }
  0x1a   : > { %s1412_s21 = scalar_lea.vmem (!%p210_p0), [#allocation3], %s1178_s18 }
  0x1c   : > { %1293 = dma.done.wait (%p1386_p8), %s216_s20, 6144  }
  0x1d   : > { %1295 = vsyncadd (%p1386_p8), %s216_s20, 4294961152  ;;  %v1012_v0 = vld [vmem:[%s1412_s21 + $0xa8] sm:$0xf]  ;;  %v1150_v1 = vld [vmem:[%s1412_s21 + $0xb0] sm:$0xf0]  ;;  %s270_s5 = smul.u32 3, %s1310_s15 }
  0x1e   : > { %v1108_v2 = vld [vmem:[%s1412_s21 + $0x168] sm:$0xf]  ;;  %v1013_v3 = vor.u32 %v1150_v1, %v1012_v0  ;;  %v1174_v4 = vld [vmem:[%s1412_s21 + $0x170] sm:$0xf0]  ;;  %v1149_v5 = vld [vmem:[%s1412_s21 + $0xac] sm:$0xf] }
  0x1f   : > { %v1014_v6 = vld [vmem:[%s1412_s21 + $0xb4] sm:$0xf0]  ;;  %v1109_v7 = vor.u32 %v1174_v4, %v1108_v2  ;;  %v1173_v9 = vld [vmem:[%s1412_s21 + $0x16c] sm:$0xf]  ;;  %v1000_v11 = vld [vmem:[%s1412_s21 + $0x90] sm:$0xf] }
  0x20   : > { %v1017_v8 = vor.u32 %v1149_v5, %v1014_v6  ;;  %v1110_v10 = vld [vmem:[%s1412_s21 + $0x174] sm:$0xf0]  ;;  %625 = vmatpush.bf16.msra.mxu0 %v1013_v3  ;;  %v1147_v13 = vld [vmem:[%s1412_s21 + $0x98] sm:$0xf0]  ;;  %v1096_v14 = vld [vmem:[%s1412_s21 + $0x150] sm:$0xf] }
  0x21   : > { %v1113_v12 = vor.u32 %v1173_v9, %v1110_v10  ;;  %v1171_v15 = vld [vmem:[%s1412_s21 + $0x158] sm:$0xf0]  ;;  %639 = vmatpush.bf16.msra.mxu1 %v1109_v7  ;;  %v1001_v16 = vor.u32 %v1147_v13, %v1000_v11  ;;  %v1146_v18 = vld [vmem:[%s1412_s21 + $0x94] sm:$0xf]  ;;  %v1002_v19 = vld [vmem:[%s1412_s21 + $0x9c] sm:$0xf0] }
  0x22   : > { %653 = vmatpush.bf16.msra.mxu2 %v1017_v8  ;;  %v1097_v17 = vor.u32 %v1171_v15, %v1096_v14  ;;  %v1170_v20 = vld [vmem:[%s1412_s21 + $0x154] sm:$0xf]  ;;  %v1005_v21 = vor.u32 %v1146_v18, %v1002_v19  ;;  %v1098_v22 = vld [vmem:[%s1412_s21 + $0x15c] sm:$0xf0]  ;;  %v988_v23 = vld [vmem:[%s1412_s21 + $0x78] sm:$0xf] }
  0x23   : > { %667 = vmatpush.bf16.msra.mxu3 %v1113_v12  ;;  %v1144_v24 = vld [vmem:[%s1412_s21 + $0x80] sm:$0xf0]  ;;  %v1101_v25 = vor.u32 %v1170_v20, %v1098_v22  ;;  %v1084_v26 = vld [vmem:[%s1412_s21 + $0x138] sm:$0xf]  ;;  %v1143_v28 = vld [vmem:[%s1412_s21 + $0x7c] sm:$0xf] }
  0x24   : > { %v1168_v27 = vld [vmem:[%s1412_s21 + $0x140] sm:$0xf0]  ;;  %626 = vmatpush.bf16.msra.mxu0 %v1001_v16  ;;  %v989_v29 = vor.u32 %v1144_v24, %v988_v23  ;;  %v990_v30 = vld [vmem:[%s1412_s21 + $0x84] sm:$0xf0]  ;;  %v1167_v31 = vld [vmem:[%s1412_s21 + $0x13c] sm:$0xf] }
  0x25   : > { %v1086_v32 = vld [vmem:[%s1412_s21 + $0x144] sm:$0xf0]  ;;  %640 = vmatpush.bf16.msra.mxu1 %v1097_v17  ;;  %v1085_v33 = vor.u32 %v1168_v27, %v1084_v26  ;;  %v993_v34 = vor.u32 %v1143_v28, %v990_v30  ;;  %v976_v35 = vld [vmem:[%s1412_s21 + $0x60] sm:$0xf]  ;;  %v1141_v36 = vld [vmem:[%s1412_s21 + $0x68] sm:$0xf0] }
  0x26   : > { %654 = vmatpush.bf16.msra.mxu2 %v1005_v21  ;;  %v1072_v37 = vld [vmem:[%s1412_s21 + $0x120] sm:$0xf]  ;;  %v1089_v38 = vor.u32 %v1167_v31, %v1086_v32  ;;  %v1165_v39 = vld [vmem:[%s1412_s21 + $0x128] sm:$0xf0]  ;;  %v1140_v40 = vld [vmem:[%s1412_s21 + $0x64] sm:$0xf]  ;;  %v977_v44 = vor.u32 %v1141_v36, %v976_v35 }
  0x27   : > { %668 = vmatpush.bf16.msra.mxu3 %v1101_v25  ;;  %v978_v41 = vld [vmem:[%s1412_s21 + $0x6c] sm:$0xf0]  ;;  %v1164_v42 = vld [vmem:[%s1412_s21 + $0x124] sm:$0xf]  ;;  %v1073_v45 = vor.u32 %v1165_v39, %v1072_v37  ;;  %v964_v47 = vld [vmem:[%s1412_s21 + $0x48] sm:$0xf] }
  0x28   : > { %v1074_v43 = vld [vmem:[%s1412_s21 + $0x12c] sm:$0xf0]  ;;  %627 = vmatpush.bf16.msra.mxu0 %v989_v29  ;;  %v981_v46 = vor.u32 %v1140_v40, %v978_v41  ;;  %v1138_v48 = vld [vmem:[%s1412_s21 + $0x50] sm:$0xf0]  ;;  %v1060_v49 = vld [vmem:[%s1412_s21 + $0x108] sm:$0xf] }
  0x29   : > { %641 = vmatpush.bf16.msra.mxu1 %v1085_v33  ;;  %v1077_v50 = vor.u32 %v1164_v42, %v1074_v43  ;;  %v1162_v51 = vld [vmem:[%s1412_s21 + $0x110] sm:$0xf0]  ;;  %v1137_v52 = vld [vmem:[%s1412_s21 + $0x4c] sm:$0xf]  ;;  %v966_v53 = vld [vmem:[%s1412_s21 + $0x54] sm:$0xf0]  ;;  %v965_v56 = vor.u32 %v1138_v48, %v964_v47 }
  0x2a   : > { %655 = vmatpush.bf16.msra.mxu2 %v993_v34  ;;  %v1161_v54 = vld [vmem:[%s1412_s21 + $0x10c] sm:$0xf]  ;;  %v1062_v55 = vld [vmem:[%s1412_s21 + $0x114] sm:$0xf0]  ;;  %v1061_v57 = vor.u32 %v1162_v51, %v1060_v49  ;;  %v969_v58 = vor.u32 %v1137_v52, %v966_v53  ;;  %v952_v59 = vld [vmem:[%s1412_s21 + $0x30] sm:$0xf] }
  0x2b   : > { %669 = vmatpush.bf16.msra.mxu3 %v1089_v38  ;;  %v1135_v60 = vld [vmem:[%s1412_s21 + $0x38] sm:$0xf0]  ;;  %v1048_v61 = vld [vmem:[%s1412_s21 + $0xf0] sm:$0xf]  ;;  %v1065_v62 = vor.u32 %v1161_v54, %v1062_v55  ;;  %v1134_v0 = vld [vmem:[%s1412_s21 + $0x34] sm:$0xf] }
  0x2c   : > { %628 = vmatpush.bf16.msra.mxu0 %v977_v44  ;;  %v1159_v63 = vld [vmem:[%s1412_s21 + $0xf8] sm:$0xf0]  ;;  %v954_v1 = vld [vmem:[%s1412_s21 + $0x3c] sm:$0xf0]  ;;  %v1158_v2 = vld [vmem:[%s1412_s21 + $0xf4] sm:$0xf]  ;;  %v953_v4 = vor.u32 %v1135_v60, %v952_v59 }
  0x2d   : > { %642 = vmatpush.bf16.msra.mxu1 %v1073_v45  ;;  %v1050_v3 = vld [vmem:[%s1412_s21 + $0xfc] sm:$0xf0]  ;;  %v1049_v5 = vor.u32 %v1159_v63, %v1048_v61  ;;  %v957_v6 = vor.u32 %v1134_v0, %v954_v1  ;;  %v940_v7 = vld [vmem:[%s1412_s21 + $0x18] sm:$0xf]  ;;  %v1132_v8 = vld [vmem:[%s1412_s21 + $0x20] sm:$0xf0] }
  0x2e   : > { %656 = vmatpush.bf16.msra.mxu2 %v981_v46  ;;  %v1036_v9 = vld [vmem:[%s1412_s21 + $0xd8] sm:$0xf]  ;;  %v1053_v10 = vor.u32 %v1158_v2, %v1050_v3  ;;  %v1156_v11 = vld [vmem:[%s1412_s21 + $0xe0] sm:$0xf0]  ;;  %v1131_v12 = vld [vmem:[%s1412_s21 + $0x1c] sm:$0xf]  ;;  %v941_v16 = vor.u32 %v1132_v8, %v940_v7 }
  0x2f   : > { %670 = vmatpush.bf16.msra.mxu3 %v1077_v50  ;;  %v942_v13 = vld [vmem:[%s1412_s21 + $0x24] sm:$0xf0]  ;;  %v1155_v14 = vld [vmem:[%s1412_s21 + $0xdc] sm:$0xf]  ;;  %v928_v17 = vld [vmem:[%s1412_s21] sm:$0xf]  ;;  %v1037_v18 = vor.u32 %v1156_v11, %v1036_v9 }
  0x30   : > { %629 = vmatpush.bf16.msra.mxu0 %v965_v56  ;;  %v1038_v15 = vld [vmem:[%s1412_s21 + $0xe4] sm:$0xf0]  ;;  %v945_v19 = vor.u32 %v1131_v12, %v942_v13  ;;  %v1129_v20 = vld [vmem:[%s1412_s21 + $0x8] sm:$0xf0]  ;;  %v1024_v21 = vld [vmem:[%s1412_s21 + $0xc0] sm:$0xf] }
  0x31   : > { %643 = vmatpush.bf16.msra.mxu1 %v1061_v57  ;;  %v1153_v22 = vld [vmem:[%s1412_s21 + $0xc8] sm:$0xf0]  ;;  %v1041_v23 = vor.u32 %v1155_v14, %v1038_v15  ;;  %v1128_v24 = vld [vmem:[%s1412_s21 + $0x4] sm:$0xf]  ;;  %v930_v25 = vld [vmem:[%s1412_s21 + $0xc] sm:$0xf0]  ;;  %v929_v30 = vor.u32 %v1129_v20, %v928_v17 }
  0x32   : > { %657 = vmatpush.bf16.msra.mxu2 %v969_v58  ;;  %v1152_v26 = vld [vmem:[%s1412_s21 + $0xc4] sm:$0xf]  ;;  %v1026_v27 = vld [vmem:[%s1412_s21 + $0xcc] sm:$0xf0]  ;;  %v1151_v29 = vld [vmem:[%s1412_s21 + $0xb8] sm:$0xf0]  ;;  %v1025_v33 = vor.u32 %v1153_v22, %v1024_v21  ;;  %v933_v34 = vor.u32 %v1128_v24, %v930_v25 }
  0x33   : > { %671 = vmatpush.bf16.msra.mxu3 %v1065_v62  ;;  %v1020_v28 = vld [vmem:[%s1412_s21 + $0xb0] sm:$0xf]  ;;  %v1175_v32 = vld [vmem:[%s1412_s21 + $0x178] sm:$0xf0]  ;;  %v920_v35 = vld [vmem:[%s1560_s0] sm:$0xf]  ;;  %v1029_v37 = vor.u32 %v1152_v26, %v1026_v27 }
  0x34   : > { %630 = vmatpush.bf16.msra.mxu0 %v953_v4  ;;  %v1116_v31 = vld [vmem:[%s1412_s21 + $0x170] sm:$0xf]  ;;  %v1127_v36 = vld [vmem:[%s1560_s0 + $0x4] sm:$0xf0]  ;;  %v1021_v38 = vor.u32 %v1151_v29, %v1020_v28  ;;  %v1126_v39 = vld [vmem:[%s1560_s0 + $0x4] sm:$0xf] }
  0x35   : > { %644 = vmatpush.bf16.msra.mxu1 %v1049_v5  ;;  %v922_v40 = vld [vmem:[%s1560_s0 + $0x8] sm:$0xf0]  ;;  %v1117_v41 = vor.u32 %v1175_v32, %v1116_v31  ;;  %v1008_v42 = vld [vmem:[%s1412_s21 + $0x98] sm:$0xf]  ;;  %v1148_v43 = vld [vmem:[%s1412_s21 + $0xa0] sm:$0xf0]  ;;  %v1500_v44 = vor.u32 %v1127_v36, %v920_v35 }
  0x36   : > { %658 = vmatpush.bf16.msra.mxu2 %v957_v6  ;;  %v1104_v45 = vld [vmem:[%s1412_s21 + $0x158] sm:$0xf]  ;;  %v1172_v46 = vld [vmem:[%s1412_s21 + $0x160] sm:$0xf0]  ;;  %v925_v47 = vor.u32 %v1126_v39, %v922_v40  ;;  %v1009_v48 = vor.u32 %v1148_v43, %v1008_v42  ;;  %v996_v50 = vld [vmem:[%s1412_s21 + $0x80] sm:$0xf] }
  0x37   : > { %672 = vmatpush.bf16.msra.mxu3 %v1053_v10  ;;  %v1105_v49 = vor.u32 %v1172_v46, %v1104_v45  ;;  %v1145_v51 = vld [vmem:[%s1412_s21 + $0x88] sm:$0xf0]  ;;  %v1092_v52 = vld [vmem:[%s1412_s21 + $0x140] sm:$0xf]  ;;  %v984_v56 = vld [vmem:[%s1412_s21 + $0x68] sm:$0xf] }
  0x38   : > { %631 = vmatpush.bf16.msra.mxu0 %v941_v16  ;;  %v1169_v53 = vld [vmem:[%s1412_s21 + $0x148] sm:$0xf0]  ;;  %v997_v54 = vor.u32 %v1145_v51, %v996_v50  ;;  %v1142_v57 = vld [vmem:[%s1412_s21 + $0x70] sm:$0xf0]  ;;  %v1080_v58 = vld [vmem:[%s1412_s21 + $0x128] sm:$0xf] }
  0x39   : > { %645 = vmatpush.bf16.msra.mxu1 %v1037_v18  ;;  %v1093_v55 = vor.u32 %v1169_v53, %v1092_v52  ;;  %v1166_v59 = vld [vmem:[%s1412_s21 + $0x130] sm:$0xf0]  ;;  %v985_v60 = vor.u32 %v1142_v57, %v984_v56  ;;  %v972_v62 = vld [vmem:[%s1412_s21 + $0x50] sm:$0xf]  ;;  %v1139_v63 = vld [vmem:[%s1412_s21 + $0x58] sm:$0xf0] }
  0x3a   : > { %659 = vmatpush.bf16.msra.mxu2 %v945_v19  ;;  %v1081_v61 = vor.u32 %v1166_v59, %v1080_v58  ;;  %v1068_v0 = vld [vmem:[%s1412_s21 + $0x110] sm:$0xf]  ;;  %v1163_v1 = vld [vmem:[%s1412_s21 + $0x118] sm:$0xf0]  ;;  %v973_v2 = vor.u32 %v1139_v63, %v972_v62  ;;  %v960_v4 = vld [vmem:[%s1412_s21 + $0x38] sm:$0xf] }
  0x3b   : > { %673 = vmatpush.bf16.msra.mxu3 %v1041_v23  ;;  %v1069_v3 = vor.u32 %v1163_v1, %v1068_v0  ;;  %v1136_v5 = vld [vmem:[%s1412_s21 + $0x40] sm:$0xf0]  ;;  %v1056_v6 = vld [vmem:[%s1412_s21 + $0xf8] sm:$0xf]  ;;  %v948_v10 = vld [vmem:[%s1412_s21 + $0x20] sm:$0xf] }
  0x3c   : > { %632 = vmatpush.bf16.msra.mxu0 %v929_v30  ;;  %v1160_v7 = vld [vmem:[%s1412_s21 + $0x100] sm:$0xf0]  ;;  %v961_v8 = vor.u32 %v1136_v5, %v960_v4  ;;  %v1133_v11 = vld [vmem:[%s1412_s21 + $0x28] sm:$0xf0]  ;;  %v1044_v12 = vld [vmem:[%s1412_s21 + $0xe0] sm:$0xf] }
  0x3d   : > { %646 = vmatpush.bf16.msra.mxu1 %v1025_v33  ;;  %v1057_v9 = vor.u32 %v1160_v7, %v1056_v6  ;;  %v1157_v13 = vld [vmem:[%s1412_s21 + $0xe8] sm:$0xf0]  ;;  %v949_v14 = vor.u32 %v1133_v11, %v948_v10  ;;  %v936_v16 = vld [vmem:[%s1412_s21 + $0x8] sm:$0xf]  ;;  %v1130_v17 = vld [vmem:[%s1412_s21 + $0x10] sm:$0xf0] }
  0x3e   : > { %660 = vmatpush.bf16.msra.mxu2 %v933_v34  ;;  %v1045_v15 = vor.u32 %v1157_v13, %v1044_v12  ;;  %v1032_v18 = vld [vmem:[%s1412_s21 + $0xc8] sm:$0xf]  ;;  %v1154_v19 = vld [vmem:[%s1412_s21 + $0xd0] sm:$0xf0]  ;;  %v937_v20 = vor.u32 %v1130_v17, %v936_v16  ;;  %p271_p1 = scmp.lt.s32.totalorder %s270_s5, 5  ;;  %s1179_s9 = smul.u32 24, %s1408_s12 }
  0x3f   : > { %674 = vmatpush.bf16.msra.mxu3 %v1029_v37  ;;  %633 = vmatmul.bf16.vlgmr.msra.gmra.mxu0 %v1500_v44  ;;  %v1033_v21 = vor.u32 %v1154_v19, %v1032_v18  ;;  %s1176_s11 = smul.u32 (%p1393_p9), 12, %s1310_s15 }
  0x40   : > { %681 = vmatpush.bf16.msrb.mxu0 %v1021_v38  ;;  %647 = vmatmul.bf16.vlgmr.msra.gmra.mxu1 %v925_v47  ;;  %s1575_s5 = smov (!%p271_p1, %s270_s5), 5  ;;  %s255_s10 = scalar_lea.vmem [#allocation5], %s1179_s9 }
  0x41   : > { %695 = vmatpush.bf16.msrb.mxu1 %v1117_v41  ;;  %661 = vmatmul.bf16.vlgmr.msra.gmra.mxu2 %v1500_v44  ;;  %s273_s8 = scalar_lea.vmem %s1562_s2, %s1575_s5  ;;  %s764_s20 = scalar_lea.vmem (%p1393_p9), %s1563_s3, %s1176_s11 }
  0x42   : > { %675 = vmatmul.bf16.vlgmr.msra.gmra.mxu3 %v925_v47  ;;  %v730_v24 = vld [vmem:[%s273_s8] sm:$0x7] }
  0x43   : > { %v732_v26 = vperm.slane %v730_v24, 0  ;;  %v733_v28 = vperm.slane %v730_v24, 1 }
  0x44   : > { %682 = vmatpush.bf16.msrb.mxu0 %v1009_v48 }
  0x45   : > { %696 = vmatpush.bf16.msrb.mxu1 %v1105_v49 }
  0x48   : > { %683 = vmatpush.bf16.msrb.mxu0 %v997_v54 }
  0x49   : > { %697 = vmatpush.bf16.msrb.mxu1 %v1093_v55 }
  0x4c   : > { %684 = vmatpush.bf16.msrb.mxu0 %v985_v60 }
  0x4d   : > { %698 = vmatpush.bf16.msrb.mxu1 %v1081_v61 }
  0x50   : > { %685 = vmatpush.bf16.msrb.mxu0 %v973_v2 }
  0x51   : > { %699 = vmatpush.bf16.msrb.mxu1 %v1069_v3 }
  0x54   : > { %686 = vmatpush.bf16.msrb.mxu0 %v961_v8 }
  0x55   : > { %700 = vmatpush.bf16.msrb.mxu1 %v1057_v9 }
  0x58   : > { %687 = vmatpush.bf16.msrb.mxu0 %v949_v14 }
  0x59   : > { %701 = vmatpush.bf16.msrb.mxu1 %v1045_v15 }
  0x5c   : > { %688 = vmatpush.bf16.msrb.mxu0 %v937_v20 }
  0x5d   : > { %702 = vmatpush.bf16.msrb.mxu1 %v1033_v21 }
  0x5f   : > { %689 = vmatmul.bf16.vlgmr.msrb.gmra.mxu0 %v1500_v44  ;;  %v734_v44 = vperm.slane %v730_v24, 2 }
  0x60   : > { %703 = vmatmul.bf16.vlgmr.msrb.gmra.mxu1 %v925_v47 }
  0xbc   : > { %v634_v22 = vpop.f32.mrf.mxu0 }
  0xbd   : > { %v648_v23 = vpop.f32.mrf.mxu1 }
  0xbe   : > { %v649_v25 = vadd.f32 %v648_v23, %v634_v22 }
  0xc0   : > { %v738_v30 = vadd.f32 %v732_v26, %v649_v25 }
  0xc4   : > { %v662_v27 = vpop.f32.mrf.mxu2  ;;  %v636_v32 = vpop.f32.mrf.mxu0 }
  0xc5   : > { %v676_v29 = vpop.f32.mrf.mxu3  ;;  %v650_v33 = vpop.f32.mrf.mxu1 }
  0xc6   : > { %v677_v31 = vadd.f32 %v676_v29, %v662_v27  ;;  %v651_v36 = vadd.f32 %v650_v33, %v636_v32 }
  0xc8   : > { %v739_v34 = vadd.f32 %v733_v28, %v677_v31  ;;  %v741_v39 = vadd.f32 %v732_v26, %v651_v36 }
  0xca   : > { %v744_v35 = vpack.c.bf16 %v739_v34, %v738_v30 }
  0xcc   : > { %748 = vst [vmem:[%s255_s10] sm:$0xff] %v744_v35  ;;  %v664_v37 = vpop.f32.mrf.mxu2 }
  0xcd   : > { %v678_v38 = vpop.f32.mrf.mxu3 }
  0xce   : > { %v679_v40 = vadd.f32 %v678_v38, %v664_v37 }
  0xd0   : > { %v742_v41 = vadd.f32 %v733_v28, %v679_v40 }
  0xd2   : > { %v746_v42 = vpack.c.bf16 %v742_v41, %v741_v39 }
  0xd3   : > { %v779_v54 = vld [vmem:[%s255_s10] sm:$0xff] (%p1393_p9) }
  0xd4   : > { %750 = vst [vmem:[%s255_s10 + $0xc] sm:$0xff] %v746_v42 }
  0xd5   : > { %780 = vst [vmem:[%s764_s20] sm:$0xff] (%p1393_p9), %v779_v54 }
  0xdb   : > { %v781_v55 = vld [vmem:[%s255_s10 + $0xc] sm:$0xff] (%p1393_p9) }
  0xdc   : > { %v690_v43 = vpop.f32.mrf.mxu0  ;;  %782 = vst [vmem:[%s764_s20 + $0x18] sm:$0xff] (%p1393_p9), %v781_v55 }
  0xdd   : > { %v704_v45 = vpop.f32.mrf.mxu1 }
  0xde   : > { %v705_v46 = vadd.f32 %v704_v45, %v690_v43 }
  0xe0   : > { %v740_v47 = vadd.f32 %v734_v44, %v705_v46 }
  0xe2   : > { %v745_v48 = vpack.c.bf16 %v740_v47, %v740_v47 }
  0xe4   : > { %749 = vst [vmem:[%s255_s10 + $0x8] sm:$0xf] %v745_v48  ;;  %v692_v49 = vpop.f32.mrf.mxu0 }
  0xe5   : > { %v706_v50 = vpop.f32.mrf.mxu1 }
  0xe6   : > { %v707_v51 = vadd.f32 %v706_v50, %v692_v49 }
  0xe8   : > { %v743_v52 = vadd.f32 %v734_v44, %v707_v51  ;;  %758 = sbr.rel (!%p1393_p9) target bundleno = 245 (0xf5), region = 48 }
  0xea   : > { %v747_v53 = vpack.c.bf16 %v743_v52, %v743_v52 }
  0xeb   : > { %v1119_v56 = vld [vmem:[%s255_s10 + $0x8] sm:$0xf] (%p1393_p9) }
  0xec   : > { %751 = vst [vmem:[%s255_s10 + $0x14] sm:$0xf] %v747_v53 }
  0xed   : > { %1120 = vst [vmem:[%s764_s20 + $0x8] sm:$0xf] %v1119_v56 }
  0xf3   : > { %v1121_v57 = vld [vmem:[%s255_s10 + $0x14] sm:$0xf] }
  0xf4   : > { %1122 = vst [vmem:[%s764_s20 + $0x20] sm:$0xf] %v1121_v57 }
  0xf5 PF: > { %s16_s17 = sadd.s32 1, %s1318_s17   ;;  %s1567_s12 = smov %s1302_s13 }
  0xf6   : > { %p13_p2 = scmp.ge.s32.totalorder %s16_s17, 4   ;;  %s1568_s13 = smov %s1306_s14 }
  0xf7   : > { %s1569_s14 = smov %s1391_s24  ;;  %s1570_s15 = smov %s1314_s16 }
  0xf8   : > { %s1571_s16 = smov %s1573_s19  ;;  %15 = sbr.rel (!%p13_p2) target bundleno = 4 (0x4), region = 118 }
  0xfd   :  { %810 = vsyncpa [#allocation4], 1 }
  0xfe   :  { %812 = vsyncpa [#allocation4 + $0x1], 1 }

// kernel: electra_classifier_forward.14
= control target key start
LH: loop header
LB: loop body
LE: loop exit
PB: predicated region body
PF: predicated region fallthrough
CT: control target
= control target key end

     0   :  { %s853_s1 = inlined_call_operand.vmem [shape: bf16[256,256], index: 1, kind: input, shape index: {}]   ;;  %s854_s0 = inlined_call_operand.vmem [shape: bf16[16,256], index: 0, kind: input, shape index: {}]   ;;  %s855_s2 = inlined_call_operand.vmem [shape: f32[1,256], index: 2, kind: input, shape index: {}]   ;;  %s856_s3 = inlined_call_operand.vmem [shape: bf16[16,256], index: 3, kind: input, shape index: {}]   ;;  %s857_s4 = inlined_call_operand.vmem [shape: f32[1,256], index: 4, kind: input, shape index: {}]   ;;  %s858_s5 = inlined_call_operand.vmem [shape: f32[1,256], index: 5, kind: input, shape index: {}]   ;;  %s859_s6 = inlined_call_operand.vmem [shape: bf16[16,256], index: 6, kind: output, shape index: {}]  }
   0x1   :  { %v481_v0 = vld [vmem:[%s853_s1 + $0x70] sm:$0xf]  ;;  %v568_v1 = vld [vmem:[%s853_s1 + $0x74] sm:$0xf0]  ;;  %v567_v5 = vld [vmem:[%s853_s1 + $0x74] sm:$0xf] }
   0x2   :  { %v545_v2 = vld [vmem:[%s853_s1 + $0xf0] sm:$0xf]  ;;  %v482_v3 = vor.u32 %v568_v1, %v481_v0  ;;  %v584_v4 = vld [vmem:[%s853_s1 + $0xf4] sm:$0xf0]  ;;  %v483_v6 = vld [vmem:[%s853_s1 + $0x78] sm:$0xf0] }
   0x3   :  { %v546_v7 = vor.u32 %v584_v4, %v545_v2  ;;  %v486_v8 = vor.u32 %v567_v5, %v483_v6  ;;  %v583_v9 = vld [vmem:[%s853_s1 + $0xf4] sm:$0xf]  ;;  %v547_v10 = vld [vmem:[%s853_s1 + $0xf8] sm:$0xf0]  ;;  %v473_v11 = vld [vmem:[%s853_s1 + $0x60] sm:$0xf] }
   0x4   :  { %239 = vmatpush.bf16.msra.mxu0 %v482_v3  ;;  %v550_v12 = vor.u32 %v583_v9, %v547_v10  ;;  %v566_v13 = vld [vmem:[%s853_s1 + $0x64] sm:$0xf0]  ;;  %v537_v14 = vld [vmem:[%s853_s1 + $0xe0] sm:$0xf]  ;;  %v565_v18 = vld [vmem:[%s853_s1 + $0x64] sm:$0xf] }
   0x5   :  { %v582_v15 = vld [vmem:[%s853_s1 + $0xe4] sm:$0xf0]  ;;  %253 = vmatpush.bf16.msra.mxu1 %v546_v7  ;;  %267 = vmatpush.bf16.msra.mxu2 %v486_v8  ;;  %v474_v16 = vor.u32 %v566_v13, %v473_v11  ;;  %v475_v19 = vld [vmem:[%s853_s1 + $0x68] sm:$0xf0]  ;;  %v581_v20 = vld [vmem:[%s853_s1 + $0xe4] sm:$0xf] }
   0x6   :  { %v538_v17 = vor.u32 %v582_v15, %v537_v14  ;;  %281 = vmatpush.bf16.msra.mxu3 %v550_v12  ;;  %v478_v21 = vor.u32 %v565_v18, %v475_v19  ;;  %v539_v22 = vld [vmem:[%s853_s1 + $0xe8] sm:$0xf0]  ;;  %v465_v23 = vld [vmem:[%s853_s1 + $0x50] sm:$0xf]  ;;  %v564_v24 = vld [vmem:[%s853_s1 + $0x54] sm:$0xf0] }
   0x7   :  { %v542_v25 = vor.u32 %v581_v20, %v539_v22  ;;  %v529_v26 = vld [vmem:[%s853_s1 + $0xd0] sm:$0xf]  ;;  %v580_v27 = vld [vmem:[%s853_s1 + $0xd4] sm:$0xf0]  ;;  %v563_v28 = vld [vmem:[%s853_s1 + $0x54] sm:$0xf]  ;;  %v466_v29 = vor.u32 %v564_v24, %v465_v23 }
   0x8   :  { %240 = vmatpush.bf16.msra.mxu0 %v474_v16  ;;  %v467_v30 = vld [vmem:[%s853_s1 + $0x58] sm:$0xf0]  ;;  %v579_v31 = vld [vmem:[%s853_s1 + $0xd4] sm:$0xf]  ;;  %v530_v33 = vor.u32 %v580_v27, %v529_v26  ;;  %v457_v35 = vld [vmem:[%s853_s1 + $0x40] sm:$0xf] }
   0x9   :  { %v531_v32 = vld [vmem:[%s853_s1 + $0xd8] sm:$0xf0]  ;;  %254 = vmatpush.bf16.msra.mxu1 %v538_v17  ;;  %268 = vmatpush.bf16.msra.mxu2 %v478_v21  ;;  %v470_v34 = vor.u32 %v563_v28, %v467_v30  ;;  %v562_v36 = vld [vmem:[%s853_s1 + $0x44] sm:$0xf0]  ;;  %v521_v37 = vld [vmem:[%s853_s1 + $0xc0] sm:$0xf] }
   0xa   :  { %282 = vmatpush.bf16.msra.mxu3 %v542_v25  ;;  %v534_v38 = vor.u32 %v579_v31, %v531_v32  ;;  %v578_v39 = vld [vmem:[%s853_s1 + $0xc4] sm:$0xf0]  ;;  %v561_v40 = vld [vmem:[%s853_s1 + $0x44] sm:$0xf]  ;;  %v459_v41 = vld [vmem:[%s853_s1 + $0x48] sm:$0xf0]  ;;  %v458_v44 = vor.u32 %v562_v36, %v457_v35 }
   0xb   :  { %v577_v42 = vld [vmem:[%s853_s1 + $0xc4] sm:$0xf]  ;;  %v523_v43 = vld [vmem:[%s853_s1 + $0xc8] sm:$0xf0]  ;;  %v522_v45 = vor.u32 %v578_v39, %v521_v37  ;;  %v462_v46 = vor.u32 %v561_v40, %v459_v41  ;;  %v449_v47 = vld [vmem:[%s853_s1 + $0x30] sm:$0xf] }
   0xc   :  { %241 = vmatpush.bf16.msra.mxu0 %v466_v29  ;;  %v560_v48 = vld [vmem:[%s853_s1 + $0x34] sm:$0xf0]  ;;  %v513_v49 = vld [vmem:[%s853_s1 + $0xb0] sm:$0xf]  ;;  %v526_v50 = vor.u32 %v577_v42, %v523_v43  ;;  %v559_v52 = vld [vmem:[%s853_s1 + $0x34] sm:$0xf] }
   0xd   :  { %255 = vmatpush.bf16.msra.mxu1 %v530_v33  ;;  %269 = vmatpush.bf16.msra.mxu2 %v470_v34  ;;  %v576_v51 = vld [vmem:[%s853_s1 + $0xb4] sm:$0xf0]  ;;  %v451_v53 = vld [vmem:[%s853_s1 + $0x38] sm:$0xf0]  ;;  %v575_v54 = vld [vmem:[%s853_s1 + $0xb4] sm:$0xf]  ;;  %v450_v56 = vor.u32 %v560_v48, %v449_v47 }
   0xe   :  { %283 = vmatpush.bf16.msra.mxu3 %v534_v38  ;;  %v515_v55 = vld [vmem:[%s853_s1 + $0xb8] sm:$0xf0]  ;;  %v514_v57 = vor.u32 %v576_v51, %v513_v49  ;;  %v454_v58 = vor.u32 %v559_v52, %v451_v53  ;;  %v441_v59 = vld [vmem:[%s853_s1 + $0x20] sm:$0xf]  ;;  %v558_v60 = vld [vmem:[%s853_s1 + $0x24] sm:$0xf0] }
   0xf   :  { %v505_v61 = vld [vmem:[%s853_s1 + $0xa0] sm:$0xf]  ;;  %v518_v62 = vor.u32 %v575_v54, %v515_v55  ;;  %v574_v63 = vld [vmem:[%s853_s1 + $0xa4] sm:$0xf0]  ;;  %v557_v0 = vld [vmem:[%s853_s1 + $0x24] sm:$0xf]  ;;  %v442_v4 = vor.u32 %v558_v60, %v441_v59 }
  0x10   :  { %242 = vmatpush.bf16.msra.mxu0 %v458_v44  ;;  %v443_v1 = vld [vmem:[%s853_s1 + $0x28] sm:$0xf0]  ;;  %v573_v2 = vld [vmem:[%s853_s1 + $0xa4] sm:$0xf]  ;;  %v506_v5 = vor.u32 %v574_v63, %v505_v61  ;;  %v433_v7 = vld [vmem:[%s853_s1 + $0x10] sm:$0xf] }
  0x11   :  { %256 = vmatpush.bf16.msra.mxu1 %v522_v45  ;;  %270 = vmatpush.bf16.msra.mxu2 %v462_v46  ;;  %v507_v3 = vld [vmem:[%s853_s1 + $0xa8] sm:$0xf0]  ;;  %v446_v6 = vor.u32 %v557_v0, %v443_v1  ;;  %v556_v8 = vld [vmem:[%s853_s1 + $0x14] sm:$0xf0]  ;;  %v497_v9 = vld [vmem:[%s853_s1 + $0x90] sm:$0xf] }
  0x12   :  { %284 = vmatpush.bf16.msra.mxu3 %v526_v50  ;;  %v510_v10 = vor.u32 %v573_v2, %v507_v3  ;;  %v572_v11 = vld [vmem:[%s853_s1 + $0x94] sm:$0xf0]  ;;  %v555_v12 = vld [vmem:[%s853_s1 + $0x14] sm:$0xf]  ;;  %v435_v13 = vld [vmem:[%s853_s1 + $0x18] sm:$0xf0]  ;;  %v434_v16 = vor.u32 %v556_v8, %v433_v7 }
  0x13   :  { %v571_v14 = vld [vmem:[%s853_s1 + $0x94] sm:$0xf]  ;;  %v499_v15 = vld [vmem:[%s853_s1 + $0x98] sm:$0xf0]  ;;  %v498_v17 = vor.u32 %v572_v11, %v497_v9  ;;  %v438_v18 = vor.u32 %v555_v12, %v435_v13  ;;  %v425_v19 = vld [vmem:[%s853_s1] sm:$0xf] }
  0x14   :  { %243 = vmatpush.bf16.msra.mxu0 %v450_v56  ;;  %v554_v20 = vld [vmem:[%s853_s1 + $0x4] sm:$0xf0]  ;;  %v489_v21 = vld [vmem:[%s853_s1 + $0x80] sm:$0xf]  ;;  %v502_v22 = vor.u32 %v571_v14, %v499_v15  ;;  %v553_v24 = vld [vmem:[%s853_s1 + $0x4] sm:$0xf] }
  0x15   :  { %257 = vmatpush.bf16.msra.mxu1 %v514_v57  ;;  %271 = vmatpush.bf16.msra.mxu2 %v454_v58  ;;  %v570_v23 = vld [vmem:[%s853_s1 + $0x84] sm:$0xf0]  ;;  %v427_v25 = vld [vmem:[%s853_s1 + $0x8] sm:$0xf0]  ;;  %v569_v26 = vld [vmem:[%s853_s1 + $0x84] sm:$0xf]  ;;  %v426_v28 = vor.u32 %v554_v20, %v425_v19 }
  0x16   :  { %285 = vmatpush.bf16.msra.mxu3 %v518_v62  ;;  %v491_v27 = vld [vmem:[%s853_s1 + $0x88] sm:$0xf0]  ;;  %v417_v29 = vld [vmem:[%s854_s0] sm:$0xf]  ;;  %v552_v30 = vld [vmem:[%s854_s0 + $0x4] sm:$0xf0]  ;;  %v490_v31 = vor.u32 %v570_v23, %v489_v21  ;;  %v430_v32 = vor.u32 %v553_v24, %v427_v25 }
  0x17   :  { %v551_v33 = vld [vmem:[%s854_s0 + $0x4] sm:$0xf]  ;;  %v419_v34 = vld [vmem:[%s854_s0 + $0x8] sm:$0xf0]  ;;  %v494_v35 = vor.u32 %v569_v26, %v491_v27  ;;  %v418_v36 = vor.u32 %v552_v30, %v417_v29  ;;  %v310_v39 = vld [vmem:[%s855_s2] sm:$0x3] }
  0x18   :  { %244 = vmatpush.bf16.msra.mxu0 %v442_v4  ;;  %v422_v37 = vor.u32 %v551_v33, %v419_v34  ;;  %v312_v42 = vperm.slane %v310_v39, 0  ;;  %v320_v43 = vld [vmem:[%s856_s3] sm:$0xff]  ;;  %v313_v46 = vperm.slane %v310_v39, 1  ;;  %v321_v57 = vld [vmem:[%s856_s3 + $0x8] sm:$0xff] }
  0x19   :  { %258 = vmatpush.bf16.msra.mxu1 %v506_v5  ;;  %272 = vmatpush.bf16.msra.mxu2 %v446_v6  ;;  %v322_v47 = vunpack.c.l.bf16 %v320_v43  ;;  %v323_v50 = vunpack.c.h.bf16 %v320_v43  ;;  %v324_v63 = vunpack.c.l.bf16 %v321_v57  ;;  %v325_v0 = vunpack.c.h.bf16 %v321_v57  ;;  %v397_v39 = vld [vmem:[%s858_s5] sm:$0x3] }
  0x1a   :  { %286 = vmatpush.bf16.msra.mxu3 %v510_v10  ;;  %v592_v5 = vmov 256.0  }
  0x1b   :  { %586 = vrcp.f32 %v592_v5 }
  0x1c   :  { %245 = vmatpush.bf16.msra.mxu0 %v434_v16 }
  0x1d   :  { %259 = vmatpush.bf16.msra.mxu1 %v498_v17  ;;  %273 = vmatpush.bf16.msra.mxu2 %v438_v18 }
  0x1e   :  { %287 = vmatpush.bf16.msra.mxu3 %v502_v22 }
  0x20   :  { %246 = vmatpush.bf16.msra.mxu0 %v426_v28 }
  0x21   :  { %260 = vmatpush.bf16.msra.mxu1 %v490_v31  ;;  %274 = vmatpush.bf16.msra.mxu2 %v430_v32  ;;  %v587_v6 = vpop.eup %586 }
  0x22   :  { %288 = vmatpush.bf16.msra.mxu3 %v494_v35  ;;  %v337_v7 = vmul.f32 256.0, %v587_v6  ;;  %vm341_vm0 = vweird.f32 %v587_v6 }
  0x23   :  { %247 = vmatmul.bf16.vlgmr.msra.gmra.mxu0 %v418_v36 }
  0x24   :  { %261 = vmatmul.bf16.vlgmr.msra.gmra.mxu1 %v422_v37  ;;  %275 = vmatmul.bf16.vlgmr.msra.gmra.mxu2 %v418_v36  ;;  %v338_v8 = vsub.f32 1.0, %v337_v7  ;;  %v387_v36 = vld [vmem:[%s857_s4] sm:$0x3] }
  0x25   :  { %289 = vmatmul.bf16.vlgmr.msra.gmra.mxu3 %v422_v37  ;;  %v390_v43 = vperm.slane %v387_v36, 1 }
  0x26   :  { %v339_v9 = vmul.f32 %v587_v6, %v338_v8 }
  0x28   :  { %v340_v10 = vadd.f32 %v587_v6, %v339_v9 }
  0x2a   :  { %v342_v11 = vsel %vm341_vm0, %v587_v6, %v340_v10 }
  0xa0   :  { %v248_v38 = vpop.f32.mrf.mxu0 }
  0xa1   :  { %v262_v40 = vpop.f32.mrf.mxu1 }
  0xa2   :  { %v263_v41 = vadd.f32 %v262_v40, %v248_v38 }
  0xa4   :  { %v316_v44 = vadd.f32 %v312_v42, %v263_v41 }
  0xa6   :  { %v326_v54 = vadd.f32 %v322_v47, %v316_v44  ;;  %v400_v47 = vperm.slane %v397_v39, 1 }
  0xa7   :  { %v276_v45 = vpop.f32.mrf.mxu2 }
  0xa8   :  { %v290_v48 = vpop.f32.mrf.mxu3  ;;  %v250_v51 = vpop.f32.mrf.mxu0 }
  0xa9   :  { %v291_v49 = vadd.f32 %v290_v48, %v276_v45  ;;  %v264_v52 = vpop.f32.mrf.mxu1 }
  0xaa   :  { %v265_v55 = vadd.f32 %v264_v52, %v250_v51 }
  0xab   :  { %v317_v53 = vadd.f32 %v313_v46, %v291_v49 }
  0xac   :  { %v318_v61 = vadd.f32 %v312_v42, %v265_v55  ;;  %v389_v42 = vperm.slane %v387_v36, 0 }
  0xad   :  { %v327_v56 = vadd.f32 %v323_v50, %v317_v53 }
  0xae   :  { %v328_v2 = vadd.f32 %v324_v63, %v318_v61 }
  0xaf   :  { %v278_v58 = vpop.f32.mrf.mxu2  ;;  %v330_v59 = vadd.f32 %v327_v56, %v326_v54 }
  0xb0   :  { %v292_v60 = vpop.f32.mrf.mxu3 }
  0xb1   :  { %v293_v62 = vadd.f32 %v292_v60, %v278_v58  ;;  %331 = vadd.xlane.f32.xlu0 %v330_v59 }
  0xb3   :  { %v319_v1 = vadd.f32 %v313_v46, %v293_v62  ;;  %v399_v46 = vperm.slane %v397_v39, 0 }
  0xb5   :  { %v329_v3 = vadd.f32 %v325_v0, %v319_v1 }
  0xb7   :  { %v333_v4 = vadd.f32 %v329_v3, %v328_v2 }
  0xb9   :  { %334 = vadd.xlane.f32.xlu0 %v333_v4 }
 0x124   :  { %v332_v12 = vpop.xlane.xlu0 %331 }
 0x125   :  { %v343_v13 = vmul.f32 %v342_v11, %v332_v12 }
 0x127   :  { %v345_v14 = vsub.f32 %v326_v54, %v343_v13  ;;  %v346_v15 = vsub.f32 %v327_v56, %v343_v13 }
 0x129   :  { %v349_v16 = vmul.f32 %v345_v14, %v345_v14  ;;  %v350_v17 = vmul.f32 %v346_v15, %v346_v15 }
 0x12b   :  { %v353_v18 = vadd.f32 %v350_v17, %v349_v16 }
 0x12c   :  { %v335_v19 = vpop.xlane.xlu0 %334 }
 0x12d   :  { %v344_v20 = vmul.f32 %v342_v11, %v335_v19  ;;  %354 = vadd.xlane.f32.xlu1 %v353_v18 }
 0x12f   :  { %v347_v21 = vsub.f32 %v328_v2, %v344_v20  ;;  %v348_v22 = vsub.f32 %v329_v3, %v344_v20 }
 0x131   :  { %v351_v23 = vmul.f32 %v347_v21, %v347_v21  ;;  %v352_v24 = vmul.f32 %v348_v22, %v348_v22 }
 0x133   :  { %v356_v25 = vadd.f32 %v352_v24, %v351_v23 }
 0x135   :  { %357 = vadd.xlane.f32.xlu1 %v356_v25 }
 0x1a0   :  { %v355_v26 = vpop.xlane.xlu1 %354 }
 0x1a1   :  { %v359_v27 = vmul.f32 %v355_v26, %v342_v11 }
 0x1a3   :  { %v361_v28 = vadd.f32 1e-12, %v359_v27 }
 0x1a5   :  { %588 = vrsqrt.f32 %v361_v28  ;;  %vm369_vm2 = vweird.f32 %v361_v28 }
 0x1a8   :  { %v358_v29 = vpop.xlane.xlu1 %357 }
 0x1a9   :  { %v360_v30 = vmul.f32 %v358_v29, %v342_v11 }
 0x1ab   :  { %v589_v31 = vpop.eup %588  ;;  %v362_v32 = vadd.f32 1e-12, %v360_v30 }
 0x1ac   :  { %v364_v33 = vmul.f32 %v589_v31, %v361_v28  ;;  %vm370_vm1 = vweird.f32 %v589_v31 }
 0x1ad   :  { %590 = vrsqrt.f32 %v362_v32  ;;  %vm371_vm3 = vmor %vm369_vm2, %vm370_vm1  ;;  %vm379_vm5 = vweird.f32 %v362_v32 }
 0x1ae   :  { %v365_v34 = vmul.f32 %v589_v31, %v364_v33 }
 0x1b0   :  { %v366_v35 = vmul.f32 0.5, %v365_v34 }
 0x1b2   :  { %v367_v37 = vsub.f32 1.5, %v366_v35 }
 0x1b3   :  { %v591_v38 = vpop.eup %590 }
 0x1b4   :  { %v368_v40 = vmul.f32 %v589_v31, %v367_v37  ;;  %v374_v41 = vmul.f32 %v591_v38, %v362_v32  ;;  %vm380_vm4 = vweird.f32 %v591_v38 }
 0x1b5   :  { %vm381_vm6 = vmor %vm379_vm5, %vm380_vm4 }
 0x1b6   :  { %v372_v44 = vsel %vm371_vm3, %v589_v31, %v368_v40  ;;  %v375_v45 = vmul.f32 %v591_v38, %v374_v41 }
 0x1b7   :  { %v383_v48 = vmul.f32 %v372_v44, %v345_v14  ;;  %v384_v49 = vmul.f32 %v372_v44, %v346_v15 }
 0x1b8   :  { %v376_v50 = vmul.f32 0.5, %v375_v45 }
 0x1b9   :  { %v393_v51 = vmul.f32 %v389_v42, %v383_v48  ;;  %v394_v52 = vmul.f32 %v390_v43, %v384_v49 }
 0x1ba   :  { %v377_v53 = vsub.f32 1.5, %v376_v50 }
 0x1bb   :  { %v403_v54 = vadd.f32 %v399_v46, %v393_v51  ;;  %v404_v55 = vadd.f32 %v400_v47, %v394_v52 }
 0x1bc   :  { %v378_v56 = vmul.f32 %v591_v38, %v377_v53 }
 0x1bd   :  { %v407_v57 = vpack.c.bf16 %v404_v55, %v403_v54 }
 0x1be   :  { %v382_v58 = vsel %vm381_vm6, %v591_v38, %v378_v56 }
 0x1bf   :  { %409 = vst [vmem:[%s859_s6] sm:$0xff] %v407_v57  ;;  %v385_v59 = vmul.f32 %v382_v58, %v347_v21  ;;  %v386_v60 = vmul.f32 %v382_v58, %v348_v22 }
 0x1c1   :  { %v395_v61 = vmul.f32 %v389_v42, %v385_v59  ;;  %v396_v62 = vmul.f32 %v390_v43, %v386_v60 }
 0x1c3   :  { %v405_v63 = vadd.f32 %v399_v46, %v395_v61  ;;  %v406_v0 = vadd.f32 %v400_v47, %v396_v62 }
 0x1c5   :  { %v408_v1 = vpack.c.bf16 %v406_v0, %v405_v63 }
 0x1c7   :  { %410 = vst [vmem:[%s859_s6 + $0x8] sm:$0xff] %v408_v1 }

// kernel: electra_classifier_forward.16
= control target key start
LH: loop header
LB: loop body
LE: loop exit
PB: predicated region body
PF: predicated region fallthrough
CT: control target
= control target key end

     0   :  { %11 = vsyncpa [#allocation4], 0  ;;  %s1068_s24 = smov [#allocation3]   ;;  %s1069_s26 = smov 128   ;;  %s1171_s0 = inlined_call_operand.vmem [shape: bf16[16,512], index: 0, kind: input, shape index: {}]   ;;  %s1172_s1 = inlined_call_operand.hbm [shape: bf16[512,256], index: 1, kind: input, shape index: {}]   ;;  %s1173_s2 = inlined_call_operand.vmem [shape: f32[1,256], index: 2, kind: input, shape index: {}]   ;;  %s1174_s3 = inlined_call_operand.vmem [shape: bf16[16,256], index: 3, kind: input, shape index: {}]   ;;  %s1175_s4 = inlined_call_operand.vmem [shape: f32[1,256], index: 4, kind: input, shape index: {}]   ;;  %s1176_s5 = inlined_call_operand.vmem [shape: f32[1,256], index: 5, kind: input, shape index: {}]   ;;  %s1177_s6 = inlined_call_operand.vmem [shape: bf16[16,256], index: 6, kind: output, shape index: {}]  }
   0x1   :  { %s18_s23 = sshll.u32 %s1172_s1, 4  ;;  %s20_s25 = sshll.u32 %s1068_s24, 4  ;;  %s19_s23 = int_to_ptr.hbm [resolvable:$true] %s18_s23  ;;  %s21_s25 = int_to_ptr.vmem [resolvable:$true] %s20_s25 }
   0x2   :  { %s1070_s27 = smov 8  }
   0x3   :  { %26 = dma.hbm_to_vmem [thread:$0]  %s19_s23, 8192, %s21_s25, [#allocation4], %s1069_s26, %s1069_s26, %s1070_s27  }
   0x4   :  { %1066 = dma.done.wait [#allocation4], 8192  }
   0x5   :  { %1067 = vsyncadd [#allocation4], 4294959104  ;;  %v766_v0 = vld [vmem:[#allocation3 + $0x70] sm:$0xf]  ;;  %v983_v1 = vld [vmem:[#allocation3 + $0x74] sm:$0xf0] }
   0x6   :  { %v830_v2 = vld [vmem:[#allocation3 + $0xf0] sm:$0xf]  ;;  %v767_v3 = vor.u32 %v983_v1, %v766_v0  ;;  %v999_v4 = vld [vmem:[#allocation3 + $0xf4] sm:$0xf0]  ;;  %v758_v11 = vld [vmem:[#allocation3 + $0x60] sm:$0xf] }
   0x7   :  { %v894_v5 = vld [vmem:[#allocation3 + $0x170] sm:$0xf]  ;;  %v1015_v6 = vld [vmem:[#allocation3 + $0x174] sm:$0xf0]  ;;  %v831_v7 = vor.u32 %v999_v4, %v830_v2  ;;  %v981_v13 = vld [vmem:[#allocation3 + $0x64] sm:$0xf0] }
   0x8   :  { %v895_v8 = vor.u32 %v1015_v6, %v894_v5  ;;  %v958_v9 = vld [vmem:[#allocation3 + $0x1f0] sm:$0xf]  ;;  %v1031_v10 = vld [vmem:[#allocation3 + $0x1f4] sm:$0xf0]  ;;  %459 = vmatpush.bf16.msra.mxu0 %v767_v3  ;;  %v822_v14 = vld [vmem:[#allocation3 + $0xe0] sm:$0xf]  ;;  %v759_v16 = vor.u32 %v981_v13, %v758_v11 }
   0x9   :  { %v959_v12 = vor.u32 %v1031_v10, %v958_v9  ;;  %v997_v15 = vld [vmem:[#allocation3 + $0xe4] sm:$0xf0]  ;;  %473 = vmatpush.bf16.msra.mxu1 %v831_v7  ;;  %v886_v18 = vld [vmem:[#allocation3 + $0x160] sm:$0xf]  ;;  %v750_v23 = vld [vmem:[#allocation3 + $0x50] sm:$0xf] }
   0xa   :  { %487 = vmatpush.bf16.msra.mxu2 %v895_v8  ;;  %v823_v17 = vor.u32 %v997_v15, %v822_v14  ;;  %v1013_v19 = vld [vmem:[#allocation3 + $0x164] sm:$0xf0]  ;;  %v950_v20 = vld [vmem:[#allocation3 + $0x1e0] sm:$0xf]  ;;  %v979_v24 = vld [vmem:[#allocation3 + $0x54] sm:$0xf0] }
   0xb   :  { %501 = vmatpush.bf16.msra.mxu3 %v959_v12  ;;  %v887_v21 = vor.u32 %v1013_v19, %v886_v18  ;;  %v1029_v22 = vld [vmem:[#allocation3 + $0x1e4] sm:$0xf0]  ;;  %v814_v26 = vld [vmem:[#allocation3 + $0xd0] sm:$0xf]  ;;  %v995_v27 = vld [vmem:[#allocation3 + $0xd4] sm:$0xf0]  ;;  %v751_v29 = vor.u32 %v979_v24, %v750_v23 }
   0xc   :  { %v951_v25 = vor.u32 %v1029_v22, %v950_v20  ;;  %v878_v28 = vld [vmem:[#allocation3 + $0x150] sm:$0xf]  ;;  %460 = vmatpush.bf16.msra.mxu0 %v759_v16  ;;  %v1011_v30 = vld [vmem:[#allocation3 + $0x154] sm:$0xf0]  ;;  %v815_v33 = vor.u32 %v995_v27, %v814_v26  ;;  %v742_v35 = vld [vmem:[#allocation3 + $0x40] sm:$0xf] }
   0xd   :  { %v942_v31 = vld [vmem:[#allocation3 + $0x1d0] sm:$0xf]  ;;  %v1027_v32 = vld [vmem:[#allocation3 + $0x1d4] sm:$0xf0]  ;;  %474 = vmatpush.bf16.msra.mxu1 %v823_v17  ;;  %v879_v34 = vor.u32 %v1011_v30, %v878_v28  ;;  %v977_v36 = vld [vmem:[#allocation3 + $0x44] sm:$0xf0] }
   0xe   :  { %488 = vmatpush.bf16.msra.mxu2 %v887_v21  ;;  %v806_v37 = vld [vmem:[#allocation3 + $0xc0] sm:$0xf]  ;;  %v943_v38 = vor.u32 %v1027_v32, %v942_v31  ;;  %v993_v39 = vld [vmem:[#allocation3 + $0xc4] sm:$0xf0]  ;;  %v743_v44 = vor.u32 %v977_v36, %v742_v35  ;;  %v734_v47 = vld [vmem:[#allocation3 + $0x30] sm:$0xf] }
   0xf   :  { %502 = vmatpush.bf16.msra.mxu3 %v951_v25  ;;  %v870_v40 = vld [vmem:[#allocation3 + $0x140] sm:$0xf]  ;;  %v1009_v41 = vld [vmem:[#allocation3 + $0x144] sm:$0xf0]  ;;  %v807_v45 = vor.u32 %v993_v39, %v806_v37  ;;  %v975_v48 = vld [vmem:[#allocation3 + $0x34] sm:$0xf0] }
  0x10   :  { %v934_v42 = vld [vmem:[#allocation3 + $0x1c0] sm:$0xf]  ;;  %v1025_v43 = vld [vmem:[#allocation3 + $0x1c4] sm:$0xf0]  ;;  %461 = vmatpush.bf16.msra.mxu0 %v751_v29  ;;  %v871_v46 = vor.u32 %v1009_v41, %v870_v40  ;;  %v798_v49 = vld [vmem:[#allocation3 + $0xb0] sm:$0xf]  ;;  %v735_v56 = vor.u32 %v975_v48, %v734_v47 }
  0x11   :  { %475 = vmatpush.bf16.msra.mxu1 %v815_v33  ;;  %v935_v50 = vor.u32 %v1025_v43, %v934_v42  ;;  %v991_v51 = vld [vmem:[#allocation3 + $0xb4] sm:$0xf0]  ;;  %v862_v52 = vld [vmem:[#allocation3 + $0x130] sm:$0xf]  ;;  %v726_v59 = vld [vmem:[#allocation3 + $0x20] sm:$0xf] }
  0x12   :  { %489 = vmatpush.bf16.msra.mxu2 %v879_v34  ;;  %v1007_v53 = vld [vmem:[#allocation3 + $0x134] sm:$0xf0]  ;;  %v926_v54 = vld [vmem:[#allocation3 + $0x1b0] sm:$0xf]  ;;  %v799_v57 = vor.u32 %v991_v51, %v798_v49  ;;  %v973_v60 = vld [vmem:[#allocation3 + $0x24] sm:$0xf0] }
  0x13   :  { %503 = vmatpush.bf16.msra.mxu3 %v943_v38  ;;  %v1023_v55 = vld [vmem:[#allocation3 + $0x1b4] sm:$0xf0]  ;;  %v863_v58 = vor.u32 %v1007_v53, %v862_v52  ;;  %v790_v61 = vld [vmem:[#allocation3 + $0xa0] sm:$0xf]  ;;  %v989_v63 = vld [vmem:[#allocation3 + $0xa4] sm:$0xf0]  ;;  %v727_v4 = vor.u32 %v973_v60, %v726_v59 }
  0x14   :  { %462 = vmatpush.bf16.msra.mxu0 %v743_v44  ;;  %v927_v62 = vor.u32 %v1023_v55, %v926_v54  ;;  %v854_v0 = vld [vmem:[#allocation3 + $0x120] sm:$0xf]  ;;  %v1005_v1 = vld [vmem:[#allocation3 + $0x124] sm:$0xf0]  ;;  %v791_v5 = vor.u32 %v989_v63, %v790_v61  ;;  %v718_v7 = vld [vmem:[#allocation3 + $0x10] sm:$0xf] }
  0x15   :  { %476 = vmatpush.bf16.msra.mxu1 %v807_v45  ;;  %v918_v2 = vld [vmem:[#allocation3 + $0x1a0] sm:$0xf]  ;;  %v1021_v3 = vld [vmem:[#allocation3 + $0x1a4] sm:$0xf0]  ;;  %v855_v6 = vor.u32 %v1005_v1, %v854_v0  ;;  %v971_v8 = vld [vmem:[#allocation3 + $0x14] sm:$0xf0] }
  0x16   :  { %490 = vmatpush.bf16.msra.mxu2 %v871_v46  ;;  %v782_v9 = vld [vmem:[#allocation3 + $0x90] sm:$0xf]  ;;  %v919_v10 = vor.u32 %v1021_v3, %v918_v2  ;;  %v987_v11 = vld [vmem:[#allocation3 + $0x94] sm:$0xf0]  ;;  %v710_v16 = vld [vmem:[#allocation3] sm:$0xf]  ;;  %v719_v17 = vor.u32 %v971_v8, %v718_v7 }
  0x17   :  { %504 = vmatpush.bf16.msra.mxu3 %v935_v50  ;;  %v846_v12 = vld [vmem:[#allocation3 + $0x110] sm:$0xf]  ;;  %v1003_v13 = vld [vmem:[#allocation3 + $0x114] sm:$0xf0]  ;;  %v969_v18 = vld [vmem:[#allocation3 + $0x4] sm:$0xf0]  ;;  %v783_v21 = vor.u32 %v987_v11, %v782_v9 }
  0x18   :  { %463 = vmatpush.bf16.msra.mxu0 %v735_v56  ;;  %v910_v14 = vld [vmem:[#allocation3 + $0x190] sm:$0xf]  ;;  %v1019_v15 = vld [vmem:[#allocation3 + $0x194] sm:$0xf0]  ;;  %v774_v19 = vld [vmem:[#allocation3 + $0x80] sm:$0xf]  ;;  %v847_v22 = vor.u32 %v1003_v13, %v846_v12  ;;  %v711_v33 = vor.u32 %v969_v18, %v710_v16 }
  0x19   :  { %477 = vmatpush.bf16.msra.mxu1 %v799_v57  ;;  %v985_v20 = vld [vmem:[#allocation3 + $0x84] sm:$0xf0]  ;;  %v838_v23 = vld [vmem:[#allocation3 + $0x100] sm:$0xf]  ;;  %v911_v26 = vor.u32 %v1019_v15, %v910_v14  ;;  %v982_v28 = vld [vmem:[#allocation3 + $0x74] sm:$0xf] }
  0x1a   :  { %491 = vmatpush.bf16.msra.mxu2 %v863_v58  ;;  %v1001_v24 = vld [vmem:[#allocation3 + $0x104] sm:$0xf0]  ;;  %v902_v25 = vld [vmem:[#allocation3 + $0x180] sm:$0xf]  ;;  %v768_v29 = vld [vmem:[#allocation3 + $0x78] sm:$0xf0]  ;;  %v775_v37 = vor.u32 %v985_v20, %v774_v19 }
  0x1b   :  { %505 = vmatpush.bf16.msra.mxu3 %v927_v62  ;;  %v1017_v27 = vld [vmem:[#allocation3 + $0x184] sm:$0xf0]  ;;  %v998_v30 = vld [vmem:[#allocation3 + $0xf4] sm:$0xf]  ;;  %v832_v31 = vld [vmem:[#allocation3 + $0xf8] sm:$0xf0]  ;;  %v839_v38 = vor.u32 %v1001_v24, %v838_v23  ;;  %v771_v44 = vor.u32 %v982_v28, %v768_v29 }
  0x1c   :  { %464 = vmatpush.bf16.msra.mxu0 %v727_v4  ;;  %v1014_v32 = vld [vmem:[#allocation3 + $0x174] sm:$0xf]  ;;  %v896_v34 = vld [vmem:[#allocation3 + $0x178] sm:$0xf0]  ;;  %v980_v39 = vld [vmem:[#allocation3 + $0x64] sm:$0xf]  ;;  %v903_v43 = vor.u32 %v1017_v27, %v902_v25  ;;  %v835_v49 = vor.u32 %v998_v30, %v832_v31 }
  0x1d   :  { %478 = vmatpush.bf16.msra.mxu1 %v791_v5  ;;  %v1030_v35 = vld [vmem:[#allocation3 + $0x1f4] sm:$0xf]  ;;  %v960_v36 = vld [vmem:[#allocation3 + $0x1f8] sm:$0xf0]  ;;  %v760_v40 = vld [vmem:[#allocation3 + $0x68] sm:$0xf0]  ;;  %v899_v50 = vor.u32 %v1014_v32, %v896_v34 }
  0x1e   :  { %492 = vmatpush.bf16.msra.mxu2 %v855_v6  ;;  %v702_v41 = vld [vmem:[%s1171_s0 + $0x8] sm:$0xf]  ;;  %v967_v42 = vld [vmem:[%s1171_s0 + $0x14] sm:$0xf0]  ;;  %v996_v45 = vld [vmem:[#allocation3 + $0xe4] sm:$0xf]  ;;  %v963_v54 = vor.u32 %v1030_v35, %v960_v36  ;;  %v763_v63 = vor.u32 %v980_v39, %v760_v40 }
  0x1f   :  { %506 = vmatpush.bf16.msra.mxu3 %v919_v10  ;;  %v824_v46 = vld [vmem:[#allocation3 + $0xe8] sm:$0xf0]  ;;  %v1012_v47 = vld [vmem:[#allocation3 + $0x164] sm:$0xf]  ;;  %v704_v52 = vld [vmem:[%s1171_s0 + $0x18] sm:$0xf0]  ;;  %v1125_v55 = vor.u32 %v967_v42, %v702_v41 }
  0x20   :  { %465 = vmatpush.bf16.msra.mxu0 %v719_v17  ;;  %v888_v48 = vld [vmem:[#allocation3 + $0x168] sm:$0xf0]  ;;  %v694_v53 = vld [vmem:[%s1171_s0] sm:$0xf]  ;;  %v966_v56 = vld [vmem:[%s1171_s0 + $0xc] sm:$0xf0]  ;;  %v827_v1 = vor.u32 %v996_v45, %v824_v46 }
  0x21   :  { %479 = vmatpush.bf16.msra.mxu1 %v783_v21  ;;  %v965_v51 = vld [vmem:[%s1171_s0 + $0xc] sm:$0xf]  ;;  %v964_v57 = vld [vmem:[%s1171_s0 + $0x4] sm:$0xf]  ;;  %v696_v58 = vld [vmem:[%s1171_s0 + $0x10] sm:$0xf0]  ;;  %v1138_v62 = vor.u32 %v966_v56, %v694_v53  ;;  %v891_v2 = vor.u32 %v1012_v47, %v888_v48 }
  0x22   :  { %493 = vmatpush.bf16.msra.mxu2 %v847_v22  ;;  %v1028_v59 = vld [vmem:[#allocation3 + $0x1e4] sm:$0xf]  ;;  %v952_v60 = vld [vmem:[#allocation3 + $0x1e8] sm:$0xf0]  ;;  %v1136_v61 = vor.u32 %v965_v51, %v704_v52  ;;  %v1140_v0 = vor.u32 %v964_v57, %v696_v58  ;;  %v978_v3 = vld [vmem:[#allocation3 + $0x54] sm:$0xf] }
  0x23   :  { %507 = vmatpush.bf16.msra.mxu3 %v911_v26  ;;  %v752_v4 = vld [vmem:[#allocation3 + $0x58] sm:$0xf0]  ;;  %v994_v5 = vld [vmem:[#allocation3 + $0xd4] sm:$0xf]  ;;  %v955_v6 = vor.u32 %v1028_v59, %v952_v60  ;;  %v976_v15 = vld [vmem:[#allocation3 + $0x44] sm:$0xf] }
  0x24   :  { %466 = vmatpush.bf16.msra.mxu0 %v711_v33  ;;  %v816_v7 = vld [vmem:[#allocation3 + $0xd8] sm:$0xf0]  ;;  %v1010_v8 = vld [vmem:[#allocation3 + $0x154] sm:$0xf]  ;;  %v755_v12 = vor.u32 %v978_v3, %v752_v4  ;;  %v744_v16 = vld [vmem:[#allocation3 + $0x48] sm:$0xf0] }
  0x25   :  { %480 = vmatpush.bf16.msra.mxu1 %v775_v37  ;;  %v880_v9 = vld [vmem:[#allocation3 + $0x158] sm:$0xf0]  ;;  %v1026_v10 = vld [vmem:[#allocation3 + $0x1d4] sm:$0xf]  ;;  %v819_v13 = vor.u32 %v994_v5, %v816_v7  ;;  %v992_v17 = vld [vmem:[#allocation3 + $0xc4] sm:$0xf]  ;;  %v747_v24 = vor.u32 %v976_v15, %v744_v16 }
  0x26   :  { %494 = vmatpush.bf16.msra.mxu2 %v839_v38  ;;  %v944_v11 = vld [vmem:[#allocation3 + $0x1d8] sm:$0xf0]  ;;  %v883_v14 = vor.u32 %v1010_v8, %v880_v9  ;;  %v808_v19 = vld [vmem:[#allocation3 + $0xc8] sm:$0xf0]  ;;  %v1008_v20 = vld [vmem:[#allocation3 + $0x144] sm:$0xf] }
  0x27   :  { %508 = vmatpush.bf16.msra.mxu3 %v903_v43  ;;  %467 = vmatmul.bf16.vlgmr.msra.gmra.mxu0 %v1138_v62  ;;  %v947_v18 = vor.u32 %v1026_v10, %v944_v11  ;;  %v872_v21 = vld [vmem:[#allocation3 + $0x148] sm:$0xf0]  ;;  %v1024_v22 = vld [vmem:[#allocation3 + $0x1c4] sm:$0xf]  ;;  %v811_v25 = vor.u32 %v992_v17, %v808_v19  ;;  %v974_v27 = vld [vmem:[#allocation3 + $0x34] sm:$0xf] }
  0x28   :  { %515 = vmatpush.bf16.msrb.mxu0 %v771_v44  ;;  %481 = vmatmul.bf16.vlgmr.msra.gmra.mxu1 %v1140_v0  ;;  %v936_v23 = vld [vmem:[#allocation3 + $0x1c8] sm:$0xf0]  ;;  %v875_v26 = vor.u32 %v1008_v20, %v872_v21  ;;  %v736_v28 = vld [vmem:[#allocation3 + $0x38] sm:$0xf0]  ;;  %v990_v29 = vld [vmem:[#allocation3 + $0xb4] sm:$0xf] }
  0x29   :  { %529 = vmatpush.bf16.msrb.mxu1 %v835_v49  ;;  %495 = vmatmul.bf16.vlgmr.msra.gmra.mxu2 %v1125_v55  ;;  %v939_v30 = vor.u32 %v1024_v22, %v936_v23  ;;  %v800_v31 = vld [vmem:[#allocation3 + $0xb8] sm:$0xf0]  ;;  %v1006_v32 = vld [vmem:[#allocation3 + $0x134] sm:$0xf]  ;;  %v739_v36 = vor.u32 %v974_v27, %v736_v28  ;;  %v972_v39 = vld [vmem:[#allocation3 + $0x24] sm:$0xf] }
  0x2a   :  { %543 = vmatpush.bf16.msrb.mxu2 %v899_v50  ;;  %509 = vmatmul.bf16.vlgmr.msra.gmra.mxu3 %v1136_v61  ;;  %v864_v33 = vld [vmem:[#allocation3 + $0x138] sm:$0xf0]  ;;  %v1022_v34 = vld [vmem:[#allocation3 + $0x1b4] sm:$0xf]  ;;  %v803_v37 = vor.u32 %v990_v29, %v800_v31  ;;  %v728_v40 = vld [vmem:[#allocation3 + $0x28] sm:$0xf0] }
  0x2b   :  { %557 = vmatpush.bf16.msrb.mxu3 %v963_v54  ;;  %v928_v35 = vld [vmem:[#allocation3 + $0x1b8] sm:$0xf0]  ;;  %v867_v38 = vor.u32 %v1006_v32, %v864_v33  ;;  %v988_v41 = vld [vmem:[#allocation3 + $0xa4] sm:$0xf]  ;;  %v792_v43 = vld [vmem:[#allocation3 + $0xa8] sm:$0xf0]  ;;  %v731_v48 = vor.u32 %v972_v39, %v728_v40 }
  0x2c   :  { %516 = vmatpush.bf16.msrb.mxu0 %v763_v63  ;;  %v931_v42 = vor.u32 %v1022_v34, %v928_v35  ;;  %v1004_v44 = vld [vmem:[#allocation3 + $0x124] sm:$0xf]  ;;  %v856_v45 = vld [vmem:[#allocation3 + $0x128] sm:$0xf0]  ;;  %v795_v49 = vor.u32 %v988_v41, %v792_v43  ;;  %v970_v51 = vld [vmem:[#allocation3 + $0x14] sm:$0xf] }
  0x2d   :  { %530 = vmatpush.bf16.msrb.mxu1 %v827_v1  ;;  %v1020_v46 = vld [vmem:[#allocation3 + $0x1a4] sm:$0xf]  ;;  %v920_v47 = vld [vmem:[#allocation3 + $0x1a8] sm:$0xf0]  ;;  %v859_v50 = vor.u32 %v1004_v44, %v856_v45  ;;  %v720_v52 = vld [vmem:[#allocation3 + $0x18] sm:$0xf0] }
  0x2e   :  { %544 = vmatpush.bf16.msrb.mxu2 %v891_v2  ;;  %v986_v53 = vld [vmem:[#allocation3 + $0x94] sm:$0xf]  ;;  %v923_v54 = vor.u32 %v1020_v46, %v920_v47  ;;  %v784_v56 = vld [vmem:[#allocation3 + $0x98] sm:$0xf0]  ;;  %v723_v63 = vor.u32 %v970_v51, %v720_v52  ;;  %v968_v3 = vld [vmem:[#allocation3 + $0x4] sm:$0xf] }
  0x2f   :  { %558 = vmatpush.bf16.msrb.mxu3 %v955_v6  ;;  %v1002_v57 = vld [vmem:[#allocation3 + $0x114] sm:$0xf]  ;;  %v848_v58 = vld [vmem:[#allocation3 + $0x118] sm:$0xf0]  ;;  %v787_v1 = vor.u32 %v986_v53, %v784_v56  ;;  %v712_v4 = vld [vmem:[#allocation3 + $0x8] sm:$0xf0] }
  0x30   :  { %517 = vmatpush.bf16.msrb.mxu0 %v755_v12  ;;  %v1018_v59 = vld [vmem:[#allocation3 + $0x194] sm:$0xf]  ;;  %v912_v60 = vld [vmem:[#allocation3 + $0x198] sm:$0xf0]  ;;  %v851_v2 = vor.u32 %v1002_v57, %v848_v58  ;;  %v984_v5 = vld [vmem:[#allocation3 + $0x84] sm:$0xf]  ;;  %v715_v12 = vor.u32 %v968_v3, %v712_v4 }
  0x31   :  { %531 = vmatpush.bf16.msrb.mxu1 %v819_v13  ;;  %v915_v6 = vor.u32 %v1018_v59, %v912_v60  ;;  %v776_v7 = vld [vmem:[#allocation3 + $0x88] sm:$0xf0]  ;;  %v1000_v8 = vld [vmem:[#allocation3 + $0x104] sm:$0xf]  ;;  %v1071_v60 = vmov 256.0  }
  0x32   :  { %545 = vmatpush.bf16.msrb.mxu2 %v883_v14  ;;  %v840_v9 = vld [vmem:[#allocation3 + $0x108] sm:$0xf0]  ;;  %v1016_v10 = vld [vmem:[#allocation3 + $0x184] sm:$0xf]  ;;  %v779_v13 = vor.u32 %v984_v5, %v776_v7  ;;  %1036 = vrcp.f32 %v1071_v60 }
  0x33   :  { %559 = vmatpush.bf16.msrb.mxu3 %v947_v18  ;;  %v904_v11 = vld [vmem:[#allocation3 + $0x188] sm:$0xf0]  ;;  %v843_v14 = vor.u32 %v1000_v8, %v840_v9  ;;  %v596_v29 = vld [vmem:[%s1174_s3] sm:$0xff] }
  0x34   :  { %518 = vmatpush.bf16.msrb.mxu0 %v747_v24  ;;  %v907_v15 = vor.u32 %v1016_v10, %v904_v11  ;;  %v598_v34 = vunpack.c.l.bf16 %v596_v29  ;;  %v597_v47 = vld [vmem:[%s1174_s3 + $0x8] sm:$0xff] }
  0x35   :  { %532 = vmatpush.bf16.msrb.mxu1 %v811_v25  ;;  %v600_v53 = vunpack.c.l.bf16 %v597_v47 }
  0x36   :  { %546 = vmatpush.bf16.msrb.mxu2 %v875_v26 }
  0x37   :  { %560 = vmatpush.bf16.msrb.mxu3 %v939_v30 }
  0x38   :  { %519 = vmatpush.bf16.msrb.mxu0 %v739_v36 }
  0x39   :  { %533 = vmatpush.bf16.msrb.mxu1 %v803_v37 }
  0x3a   :  { %547 = vmatpush.bf16.msrb.mxu2 %v867_v38  ;;  %v599_v38 = vunpack.c.h.bf16 %v596_v29  ;;  %v673_v29 = vld [vmem:[%s1176_s5] sm:$0x3] }
  0x3b   :  { %561 = vmatpush.bf16.msrb.mxu3 %v931_v42 }
  0x3c   :  { %520 = vmatpush.bf16.msrb.mxu0 %v731_v48 }
  0x3d   :  { %534 = vmatpush.bf16.msrb.mxu1 %v795_v49 }
  0x3e   :  { %548 = vmatpush.bf16.msrb.mxu2 %v859_v50 }
  0x3f   :  { %562 = vmatpush.bf16.msrb.mxu3 %v923_v54  ;;  %v601_v54 = vunpack.c.h.bf16 %v597_v47 }
  0x40   :  { %521 = vmatpush.bf16.msrb.mxu0 %v723_v63  ;;  %v1037_v63 = vpop.eup %1036 }
  0x41   :  { %535 = vmatpush.bf16.msrb.mxu1 %v787_v1  ;;  %v613_v1 = vmul.f32 256.0, %v1037_v63  ;;  %vm617_vm0 = vweird.f32 %v1037_v63 }
  0x42   :  { %549 = vmatpush.bf16.msrb.mxu2 %v851_v2 }
  0x43   :  { %563 = vmatpush.bf16.msrb.mxu3 %v915_v6  ;;  %v614_v2 = vsub.f32 1.0, %v613_v1 }
  0x44   :  { %522 = vmatpush.bf16.msrb.mxu0 %v715_v12 }
  0x45   :  { %536 = vmatpush.bf16.msrb.mxu1 %v779_v13  ;;  %v615_v3 = vmul.f32 %v1037_v63, %v614_v2 }
  0x46   :  { %550 = vmatpush.bf16.msrb.mxu2 %v843_v14 }
  0x47   :  { %564 = vmatpush.bf16.msrb.mxu3 %v907_v15  ;;  %523 = vmatmul.bf16.vlgmr.msrb.gmra.mxu0 %v1138_v62  ;;  %v586_v62 = vld [vmem:[%s1173_s2] sm:$0x3]  ;;  %v616_v4 = vadd.f32 %v1037_v63, %v615_v3 }
  0x48   :  { %537 = vmatmul.bf16.vlgmr.msrb.gmra.mxu1 %v1140_v0  ;;  %v588_v28 = vperm.slane %v586_v62, 0  ;;  %v589_v33 = vperm.slane %v586_v62, 1 }
  0x49   :  { %551 = vmatmul.bf16.vlgmr.msrb.gmra.mxu2 %v1125_v55  ;;  %v618_v5 = vsel %vm617_vm0, %v1037_v63, %v616_v4 }
  0x4a   :  { %565 = vmatmul.bf16.vlgmr.msrb.gmra.mxu3 %v1136_v61 }
  0xa4   :  { %v468_v16 = vpop.f32.mrf.mxu0 }
  0xa5   :  { %v482_v17 = vpop.f32.mrf.mxu1 }
  0xa6   :  { %v483_v22 = vadd.f32 %v482_v17, %v468_v16 }
  0xac   :  { %v496_v18 = vpop.f32.mrf.mxu2  ;;  %v470_v20 = vpop.f32.mrf.mxu0 }
  0xad   :  { %v510_v19 = vpop.f32.mrf.mxu3  ;;  %v484_v21 = vpop.f32.mrf.mxu1  ;;  %v497_v27 = vadd.f32 %v496_v18, %v483_v22 }
  0xae   :  { %v485_v61 = vadd.f32 %v484_v21, %v470_v20 }
  0xaf   :  { %v511_v55 = vadd.f32 %v510_v19, %v497_v27 }
  0xb1   :  { %v592_v35 = vadd.f32 %v588_v28, %v511_v55  ;;  %v663_v55 = vld [vmem:[%s1175_s4] sm:$0x3] }
  0xb3   :  { %v602_v44 = vadd.f32 %v598_v34, %v592_v35 }
  0xb4   :  { %v498_v23 = vpop.f32.mrf.mxu2 }
  0xb5   :  { %v512_v24 = vpop.f32.mrf.mxu3  ;;  %v499_v36 = vadd.f32 %v498_v23, %v485_v61 }
  0xb7   :  { %v513_v42 = vadd.f32 %v512_v24, %v499_v36  ;;  %v675_v36 = vperm.slane %v673_v29, 0 }
  0xb9   :  { %v594_v51 = vadd.f32 %v588_v28, %v513_v42 }
  0xbb   :  { %v604_v57 = vadd.f32 %v600_v53, %v594_v51 }
  0xc4   :  { %v524_v25 = vpop.f32.mrf.mxu0 }
  0xc5   :  { %v538_v26 = vpop.f32.mrf.mxu1 }
  0xc6   :  { %v539_v0 = vadd.f32 %v538_v26, %v524_v25 }
  0xcc   :  { %v552_v30 = vpop.f32.mrf.mxu2  ;;  %v526_v39 = vpop.f32.mrf.mxu0 }
  0xcd   :  { %v553_v31 = vadd.f32 %v552_v30, %v539_v0  ;;  %v566_v32 = vpop.f32.mrf.mxu3  ;;  %v540_v40 = vpop.f32.mrf.mxu1 }
  0xce   :  { %v541_v43 = vadd.f32 %v540_v40, %v526_v39 }
  0xcf   :  { %v567_v37 = vadd.f32 %v566_v32, %v553_v31  ;;  %v665_v32 = vperm.slane %v663_v55, 0 }
  0xd1   :  { %v593_v41 = vadd.f32 %v589_v33, %v567_v37  ;;  %v676_v37 = vperm.slane %v673_v29, 1 }
  0xd3   :  { %v603_v45 = vadd.f32 %v599_v38, %v593_v41 }
  0xd4   :  { %v554_v46 = vpop.f32.mrf.mxu2 }
  0xd5   :  { %v555_v48 = vadd.f32 %v554_v46, %v541_v43  ;;  %v606_v49 = vadd.f32 %v603_v45, %v602_v44  ;;  %v568_v50 = vpop.f32.mrf.mxu3 }
  0xd7   :  { %v569_v52 = vadd.f32 %v568_v50, %v555_v48  ;;  %607 = vadd.xlane.f32.xlu0 %v606_v49 }
  0xd9   :  { %v595_v56 = vadd.f32 %v589_v33, %v569_v52  ;;  %v666_v33 = vperm.slane %v663_v55, 1 }
  0xdb   :  { %v605_v58 = vadd.f32 %v601_v54, %v595_v56 }
  0xdd   :  { %v609_v59 = vadd.f32 %v605_v58, %v604_v57 }
  0xdf   :  { %610 = vadd.xlane.f32.xlu0 %v609_v59 }
 0x14a   :  { %v608_v6 = vpop.xlane.xlu0 %607 }
 0x14b   :  { %v619_v7 = vmul.f32 %v618_v5, %v608_v6 }
 0x14d   :  { %v621_v8 = vsub.f32 %v602_v44, %v619_v7  ;;  %v622_v9 = vsub.f32 %v603_v45, %v619_v7 }
 0x14f   :  { %v625_v10 = vmul.f32 %v621_v8, %v621_v8  ;;  %v626_v11 = vmul.f32 %v622_v9, %v622_v9 }
 0x151   :  { %v629_v12 = vadd.f32 %v626_v11, %v625_v10 }
 0x152   :  { %v611_v13 = vpop.xlane.xlu0 %610 }
 0x153   :  { %v620_v14 = vmul.f32 %v618_v5, %v611_v13  ;;  %630 = vadd.xlane.f32.xlu1 %v629_v12 }
 0x155   :  { %v623_v15 = vsub.f32 %v604_v57, %v620_v14  ;;  %v624_v16 = vsub.f32 %v605_v58, %v620_v14 }
 0x157   :  { %v627_v17 = vmul.f32 %v623_v15, %v623_v15  ;;  %v628_v18 = vmul.f32 %v624_v16, %v624_v16 }
 0x159   :  { %v632_v19 = vadd.f32 %v628_v18, %v627_v17 }
 0x15b   :  { %633 = vadd.xlane.f32.xlu1 %v632_v19 }
 0x1c6   :  { %v631_v20 = vpop.xlane.xlu1 %630 }
 0x1c7   :  { %v635_v21 = vmul.f32 %v631_v20, %v618_v5 }
 0x1c9   :  { %v637_v22 = vadd.f32 1e-12, %v635_v21 }
 0x1cb   :  { %1038 = vrsqrt.f32 %v637_v22  ;;  %vm645_vm2 = vweird.f32 %v637_v22 }
 0x1ce   :  { %v634_v23 = vpop.xlane.xlu1 %633 }
 0x1cf   :  { %v636_v24 = vmul.f32 %v634_v23, %v618_v5 }
 0x1d1   :  { %v1039_v25 = vpop.eup %1038  ;;  %v638_v26 = vadd.f32 1e-12, %v636_v24 }
 0x1d2   :  { %v640_v27 = vmul.f32 %v1039_v25, %v637_v22  ;;  %vm646_vm1 = vweird.f32 %v1039_v25 }
 0x1d3   :  { %1040 = vrsqrt.f32 %v638_v26  ;;  %vm647_vm3 = vmor %vm645_vm2, %vm646_vm1  ;;  %vm655_vm5 = vweird.f32 %v638_v26 }
 0x1d4   :  { %v641_v62 = vmul.f32 %v1039_v25, %v640_v27 }
 0x1d6   :  { %v642_v0 = vmul.f32 0.5, %v641_v62 }
 0x1d8   :  { %v643_v28 = vsub.f32 1.5, %v642_v0 }
 0x1d9   :  { %v1041_v61 = vpop.eup %1040 }
 0x1da   :  { %v644_v30 = vmul.f32 %v1039_v25, %v643_v28  ;;  %v650_v31 = vmul.f32 %v1041_v61, %v638_v26  ;;  %vm656_vm4 = vweird.f32 %v1041_v61 }
 0x1db   :  { %vm657_vm6 = vmor %vm655_vm5, %vm656_vm4 }
 0x1dc   :  { %v648_v34 = vsel %vm647_vm3, %v1039_v25, %v644_v30  ;;  %v651_v35 = vmul.f32 %v1041_v61, %v650_v31 }
 0x1dd   :  { %v659_v38 = vmul.f32 %v648_v34, %v621_v8  ;;  %v660_v39 = vmul.f32 %v648_v34, %v622_v9 }
 0x1de   :  { %v652_v40 = vmul.f32 0.5, %v651_v35 }
 0x1df   :  { %v669_v41 = vmul.f32 %v665_v32, %v659_v38  ;;  %v670_v42 = vmul.f32 %v666_v33, %v660_v39 }
 0x1e0   :  { %v653_v43 = vsub.f32 1.5, %v652_v40 }
 0x1e1   :  { %v679_v44 = vadd.f32 %v675_v36, %v669_v41  ;;  %v680_v45 = vadd.f32 %v676_v37, %v670_v42 }
 0x1e2   :  { %v654_v46 = vmul.f32 %v1041_v61, %v653_v43 }
 0x1e3   :  { %v683_v47 = vpack.c.bf16 %v680_v45, %v679_v44 }
 0x1e4   :  { %v658_v48 = vsel %vm657_vm6, %v1041_v61, %v654_v46 }
 0x1e5   :  { %685 = vst [vmem:[%s1177_s6] sm:$0xff] %v683_v47  ;;  %v661_v49 = vmul.f32 %v658_v48, %v623_v15  ;;  %v662_v50 = vmul.f32 %v658_v48, %v624_v16 }
 0x1e7   :  { %v671_v51 = vmul.f32 %v665_v32, %v661_v49  ;;  %v672_v52 = vmul.f32 %v666_v33, %v662_v50 }
 0x1e9   :  { %v681_v53 = vadd.f32 %v675_v36, %v671_v51  ;;  %v682_v54 = vadd.f32 %v676_v37, %v672_v52 }
 0x1eb   :  { %v684_v56 = vpack.c.bf16 %v682_v54, %v681_v53 }
 0x1ed   :  { %686 = vst [vmem:[%s1177_s6 + $0x8] sm:$0xff] %v684_v56 }
 0x1ee   :  { %691 = vsyncpa [#allocation4], 1 }

// kernel: electra_classifier_forward.15
= control target key start
LH: loop header
LB: loop body
LE: loop exit
PB: predicated region body
PF: predicated region fallthrough
CT: control target
= control target key end

     0   :  { %8 = vsyncpa [#allocation4], 0  ;;  %s1351_s15 = smov [#allocation3]   ;;  %s1352_s17 = smov 256   ;;  %s1648_s0 = inlined_call_operand.vmem [shape: bf16[16,256], index: 0, kind: input, shape index: {}]   ;;  %s1649_s1 = inlined_call_operand.hbm [shape: bf16[256,512], index: 1, kind: input, shape index: {}]   ;;  %s1650_s2 = inlined_call_operand.vmem [shape: f32[1,512], index: 2, kind: input, shape index: {}]   ;;  %s1651_s3 = inlined_call_operand.vmem [shape: bf16[16,512], index: 3, kind: output, shape index: {}]  }
   0x1   :  { %s15_s14 = sshll.u32 %s1649_s1, 4  ;;  %s17_s16 = sshll.u32 %s1351_s15, 4  ;;  %s16_s14 = int_to_ptr.hbm [resolvable:$true] %s15_s14  ;;  %s18_s16 = int_to_ptr.vmem [resolvable:$true] %s17_s16 }
   0x2   :  { %s1353_s18 = smov 16  }
   0x3   :  { %23 = dma.hbm_to_vmem [thread:$0]  %s16_s14, 8192, %s18_s16, [#allocation4], %s1352_s17, %s1352_s17, %s1353_s18  }
   0x4   :  { %1349 = dma.done.wait [#allocation4], 8192  }
   0x5   :  { %1350 = vsyncadd [#allocation4], 4294959104  ;;  %v1090_v0 = vld [vmem:[#allocation3 + $0xe0] sm:$0xf]  ;;  %v1272_v1 = vld [vmem:[#allocation3 + $0xec] sm:$0xf0] }
   0x6   :  { %v1218_v2 = vld [vmem:[#allocation3 + $0x1e0] sm:$0xf]  ;;  %v1091_v3 = vor.u32 %v1272_v1, %v1090_v0  ;;  %v1304_v4 = vld [vmem:[#allocation3 + $0x1ec] sm:$0xf0]  ;;  %v1270_v5 = vld [vmem:[#allocation3 + $0xe4] sm:$0xf] }
   0x7   :  { %v1092_v6 = vld [vmem:[#allocation3 + $0xf0] sm:$0xf0]  ;;  %v1219_v7 = vor.u32 %v1304_v4, %v1218_v2  ;;  %v1302_v9 = vld [vmem:[#allocation3 + $0x1e4] sm:$0xf]  ;;  %v1074_v11 = vld [vmem:[#allocation3 + $0xc0] sm:$0xf] }
   0x8   :  { %v1095_v8 = vor.u32 %v1270_v5, %v1092_v6  ;;  %v1220_v10 = vld [vmem:[#allocation3 + $0x1f0] sm:$0xf0]  ;;  %446 = vmatpush.bf16.msra.mxu0 %v1091_v3  ;;  %v1268_v13 = vld [vmem:[#allocation3 + $0xcc] sm:$0xf0]  ;;  %v1202_v14 = vld [vmem:[#allocation3 + $0x1c0] sm:$0xf] }
   0x9   :  { %v1223_v12 = vor.u32 %v1302_v9, %v1220_v10  ;;  %v1300_v15 = vld [vmem:[#allocation3 + $0x1cc] sm:$0xf0]  ;;  %460 = vmatpush.bf16.msra.mxu1 %v1219_v7  ;;  %v1075_v16 = vor.u32 %v1268_v13, %v1074_v11  ;;  %v1266_v18 = vld [vmem:[#allocation3 + $0xc4] sm:$0xf]  ;;  %v1076_v19 = vld [vmem:[#allocation3 + $0xd0] sm:$0xf0] }
   0xa   :  { %474 = vmatpush.bf16.msra.mxu2 %v1095_v8  ;;  %v1203_v17 = vor.u32 %v1300_v15, %v1202_v14  ;;  %v1298_v20 = vld [vmem:[#allocation3 + $0x1c4] sm:$0xf]  ;;  %v1079_v21 = vor.u32 %v1266_v18, %v1076_v19  ;;  %v1204_v22 = vld [vmem:[#allocation3 + $0x1d0] sm:$0xf0]  ;;  %v1058_v23 = vld [vmem:[#allocation3 + $0xa0] sm:$0xf] }
   0xb   :  { %488 = vmatpush.bf16.msra.mxu3 %v1223_v12  ;;  %v1264_v24 = vld [vmem:[#allocation3 + $0xac] sm:$0xf0]  ;;  %v1207_v25 = vor.u32 %v1298_v20, %v1204_v22  ;;  %v1186_v26 = vld [vmem:[#allocation3 + $0x1a0] sm:$0xf]  ;;  %v1262_v28 = vld [vmem:[#allocation3 + $0xa4] sm:$0xf] }
   0xc   :  { %v1296_v27 = vld [vmem:[#allocation3 + $0x1ac] sm:$0xf0]  ;;  %447 = vmatpush.bf16.msra.mxu0 %v1075_v16  ;;  %v1059_v29 = vor.u32 %v1264_v24, %v1058_v23  ;;  %v1060_v30 = vld [vmem:[#allocation3 + $0xb0] sm:$0xf0]  ;;  %v1294_v31 = vld [vmem:[#allocation3 + $0x1a4] sm:$0xf] }
   0xd   :  { %v1188_v32 = vld [vmem:[#allocation3 + $0x1b0] sm:$0xf0]  ;;  %461 = vmatpush.bf16.msra.mxu1 %v1203_v17  ;;  %v1187_v33 = vor.u32 %v1296_v27, %v1186_v26  ;;  %v1063_v34 = vor.u32 %v1262_v28, %v1060_v30  ;;  %v1042_v35 = vld [vmem:[#allocation3 + $0x80] sm:$0xf]  ;;  %v1260_v36 = vld [vmem:[#allocation3 + $0x8c] sm:$0xf0] }
   0xe   :  { %475 = vmatpush.bf16.msra.mxu2 %v1079_v21  ;;  %v1170_v37 = vld [vmem:[#allocation3 + $0x180] sm:$0xf]  ;;  %v1191_v38 = vor.u32 %v1294_v31, %v1188_v32  ;;  %v1292_v39 = vld [vmem:[#allocation3 + $0x18c] sm:$0xf0]  ;;  %v1258_v40 = vld [vmem:[#allocation3 + $0x84] sm:$0xf]  ;;  %v1043_v44 = vor.u32 %v1260_v36, %v1042_v35 }
   0xf   :  { %489 = vmatpush.bf16.msra.mxu3 %v1207_v25  ;;  %v1044_v41 = vld [vmem:[#allocation3 + $0x90] sm:$0xf0]  ;;  %v1290_v42 = vld [vmem:[#allocation3 + $0x184] sm:$0xf]  ;;  %v1171_v45 = vor.u32 %v1292_v39, %v1170_v37  ;;  %v1026_v47 = vld [vmem:[#allocation3 + $0x60] sm:$0xf] }
  0x10   :  { %v1172_v43 = vld [vmem:[#allocation3 + $0x190] sm:$0xf0]  ;;  %448 = vmatpush.bf16.msra.mxu0 %v1059_v29  ;;  %v1047_v46 = vor.u32 %v1258_v40, %v1044_v41  ;;  %v1256_v48 = vld [vmem:[#allocation3 + $0x6c] sm:$0xf0]  ;;  %v1154_v49 = vld [vmem:[#allocation3 + $0x160] sm:$0xf] }
  0x11   :  { %462 = vmatpush.bf16.msra.mxu1 %v1187_v33  ;;  %v1175_v50 = vor.u32 %v1290_v42, %v1172_v43  ;;  %v1288_v51 = vld [vmem:[#allocation3 + $0x16c] sm:$0xf0]  ;;  %v1254_v52 = vld [vmem:[#allocation3 + $0x64] sm:$0xf]  ;;  %v1028_v53 = vld [vmem:[#allocation3 + $0x70] sm:$0xf0]  ;;  %v1027_v56 = vor.u32 %v1256_v48, %v1026_v47 }
  0x12   :  { %476 = vmatpush.bf16.msra.mxu2 %v1063_v34  ;;  %v1286_v54 = vld [vmem:[#allocation3 + $0x164] sm:$0xf]  ;;  %v1156_v55 = vld [vmem:[#allocation3 + $0x170] sm:$0xf0]  ;;  %v1155_v57 = vor.u32 %v1288_v51, %v1154_v49  ;;  %v1031_v58 = vor.u32 %v1254_v52, %v1028_v53  ;;  %v1010_v59 = vld [vmem:[#allocation3 + $0x40] sm:$0xf] }
  0x13   :  { %490 = vmatpush.bf16.msra.mxu3 %v1191_v38  ;;  %v1252_v60 = vld [vmem:[#allocation3 + $0x4c] sm:$0xf0]  ;;  %v1138_v61 = vld [vmem:[#allocation3 + $0x140] sm:$0xf]  ;;  %v1159_v62 = vor.u32 %v1286_v54, %v1156_v55  ;;  %v1250_v0 = vld [vmem:[#allocation3 + $0x44] sm:$0xf] }
  0x14   :  { %449 = vmatpush.bf16.msra.mxu0 %v1043_v44  ;;  %v1284_v63 = vld [vmem:[#allocation3 + $0x14c] sm:$0xf0]  ;;  %v1012_v1 = vld [vmem:[#allocation3 + $0x50] sm:$0xf0]  ;;  %v1282_v2 = vld [vmem:[#allocation3 + $0x144] sm:$0xf]  ;;  %v1011_v4 = vor.u32 %v1252_v60, %v1010_v59 }
  0x15   :  { %463 = vmatpush.bf16.msra.mxu1 %v1171_v45  ;;  %v1140_v3 = vld [vmem:[#allocation3 + $0x150] sm:$0xf0]  ;;  %v1139_v5 = vor.u32 %v1284_v63, %v1138_v61  ;;  %v1015_v6 = vor.u32 %v1250_v0, %v1012_v1  ;;  %v994_v7 = vld [vmem:[#allocation3 + $0x20] sm:$0xf]  ;;  %v1248_v8 = vld [vmem:[#allocation3 + $0x2c] sm:$0xf0] }
  0x16   :  { %477 = vmatpush.bf16.msra.mxu2 %v1047_v46  ;;  %v1122_v9 = vld [vmem:[#allocation3 + $0x120] sm:$0xf]  ;;  %v1143_v10 = vor.u32 %v1282_v2, %v1140_v3  ;;  %v1280_v11 = vld [vmem:[#allocation3 + $0x12c] sm:$0xf0]  ;;  %v1246_v12 = vld [vmem:[#allocation3 + $0x24] sm:$0xf]  ;;  %v995_v16 = vor.u32 %v1248_v8, %v994_v7 }
  0x17   :  { %491 = vmatpush.bf16.msra.mxu3 %v1175_v50  ;;  %v996_v13 = vld [vmem:[#allocation3 + $0x30] sm:$0xf0]  ;;  %v1278_v14 = vld [vmem:[#allocation3 + $0x124] sm:$0xf]  ;;  %v978_v17 = vld [vmem:[#allocation3] sm:$0xf]  ;;  %v1123_v20 = vor.u32 %v1280_v11, %v1122_v9 }
  0x18   :  { %450 = vmatpush.bf16.msra.mxu0 %v1027_v56  ;;  %v1124_v15 = vld [vmem:[#allocation3 + $0x130] sm:$0xf0]  ;;  %v1244_v18 = vld [vmem:[#allocation3 + $0xc] sm:$0xf0]  ;;  %v1106_v19 = vld [vmem:[#allocation3 + $0x100] sm:$0xf]  ;;  %v999_v21 = vor.u32 %v1246_v12, %v996_v13 }
  0x19   :  { %464 = vmatpush.bf16.msra.mxu1 %v1155_v57  ;;  %v1276_v22 = vld [vmem:[#allocation3 + $0x10c] sm:$0xf0]  ;;  %v1242_v23 = vld [vmem:[#allocation3 + $0x4] sm:$0xf]  ;;  %v980_v24 = vld [vmem:[#allocation3 + $0x10] sm:$0xf0]  ;;  %v1127_v25 = vor.u32 %v1278_v14, %v1124_v15  ;;  %v979_v32 = vor.u32 %v1244_v18, %v978_v17 }
  0x1a   :  { %478 = vmatpush.bf16.msra.mxu2 %v1031_v58  ;;  %v1274_v26 = vld [vmem:[#allocation3 + $0x104] sm:$0xf]  ;;  %v1108_v27 = vld [vmem:[#allocation3 + $0x110] sm:$0xf0]  ;;  %v1098_v28 = vld [vmem:[#allocation3 + $0xe8] sm:$0xf]  ;;  %v1107_v36 = vor.u32 %v1276_v22, %v1106_v19  ;;  %v983_v37 = vor.u32 %v1242_v23, %v980_v24 }
  0x1b   :  { %492 = vmatpush.bf16.msra.mxu3 %v1159_v62  ;;  %v1273_v29 = vld [vmem:[#allocation3 + $0xf4] sm:$0xf0]  ;;  %v1226_v30 = vld [vmem:[#allocation3 + $0x1e8] sm:$0xf]  ;;  %v1271_v33 = vld [vmem:[#allocation3 + $0xec] sm:$0xf]  ;;  %v1111_v41 = vor.u32 %v1274_v26, %v1108_v27 }
  0x1c   :  { %451 = vmatpush.bf16.msra.mxu0 %v1011_v4  ;;  %v1305_v31 = vld [vmem:[#allocation3 + $0x1f4] sm:$0xf0]  ;;  %v1100_v34 = vld [vmem:[#allocation3 + $0xf8] sm:$0xf0]  ;;  %v1303_v35 = vld [vmem:[#allocation3 + $0x1ec] sm:$0xf]  ;;  %v1099_v42 = vor.u32 %v1273_v29, %v1098_v28 }
  0x1d   :  { %465 = vmatpush.bf16.msra.mxu1 %v1139_v5  ;;  %v1228_v38 = vld [vmem:[#allocation3 + $0x1f8] sm:$0xf0]  ;;  %v970_v39 = vld [vmem:[%s1648_s0] sm:$0xf]  ;;  %v1241_v40 = vld [vmem:[%s1648_s0 + $0x4] sm:$0xf0]  ;;  %v1227_v45 = vor.u32 %v1305_v31, %v1226_v30  ;;  %v1103_v46 = vor.u32 %v1271_v33, %v1100_v34 }
  0x1e   :  { %479 = vmatpush.bf16.msra.mxu2 %v1015_v6  ;;  %v1240_v43 = vld [vmem:[%s1648_s0 + $0x4] sm:$0xf]  ;;  %v972_v44 = vld [vmem:[%s1648_s0 + $0x8] sm:$0xf0]  ;;  %v1082_v47 = vld [vmem:[#allocation3 + $0xc8] sm:$0xf]  ;;  %v1231_v50 = vor.u32 %v1303_v35, %v1228_v38  ;;  %v1389_v51 = vor.u32 %v1241_v40, %v970_v39 }
  0x1f   :  { %493 = vmatpush.bf16.msra.mxu3 %v1143_v10  ;;  %v1269_v48 = vld [vmem:[#allocation3 + $0xd4] sm:$0xf0]  ;;  %v1210_v49 = vld [vmem:[#allocation3 + $0x1c8] sm:$0xf]  ;;  %v1267_v53 = vld [vmem:[#allocation3 + $0xcc] sm:$0xf]  ;;  %v1391_v55 = vor.u32 %v1240_v43, %v972_v44 }
  0x20   :  { %452 = vmatpush.bf16.msra.mxu0 %v995_v16  ;;  %v1301_v52 = vld [vmem:[#allocation3 + $0x1d4] sm:$0xf0]  ;;  %v1084_v54 = vld [vmem:[#allocation3 + $0xd8] sm:$0xf0]  ;;  %v1299_v56 = vld [vmem:[#allocation3 + $0x1cc] sm:$0xf]  ;;  %v1083_v58 = vor.u32 %v1269_v48, %v1082_v47 }
  0x21   :  { %466 = vmatpush.bf16.msra.mxu1 %v1123_v20  ;;  %v1212_v57 = vld [vmem:[#allocation3 + $0x1d8] sm:$0xf0]  ;;  %v1211_v59 = vor.u32 %v1301_v52, %v1210_v49  ;;  %v1087_v60 = vor.u32 %v1267_v53, %v1084_v54  ;;  %v1066_v61 = vld [vmem:[#allocation3 + $0xa8] sm:$0xf]  ;;  %v1265_v62 = vld [vmem:[#allocation3 + $0xb4] sm:$0xf0] }
  0x22   :  { %480 = vmatpush.bf16.msra.mxu2 %v999_v21  ;;  %v1194_v63 = vld [vmem:[#allocation3 + $0x1a8] sm:$0xf]  ;;  %v1215_v0 = vor.u32 %v1299_v56, %v1212_v57  ;;  %v1297_v1 = vld [vmem:[#allocation3 + $0x1b4] sm:$0xf0]  ;;  %v1263_v2 = vld [vmem:[#allocation3 + $0xac] sm:$0xf]  ;;  %v1067_v6 = vor.u32 %v1265_v62, %v1066_v61 }
  0x23   :  { %494 = vmatpush.bf16.msra.mxu3 %v1127_v25  ;;  %v1068_v3 = vld [vmem:[#allocation3 + $0xb8] sm:$0xf0]  ;;  %v1295_v4 = vld [vmem:[#allocation3 + $0x1ac] sm:$0xf]  ;;  %v1195_v7 = vor.u32 %v1297_v1, %v1194_v63  ;;  %v1050_v9 = vld [vmem:[#allocation3 + $0x88] sm:$0xf] }
  0x24   :  { %453 = vmatpush.bf16.msra.mxu0 %v979_v32  ;;  %v1196_v5 = vld [vmem:[#allocation3 + $0x1b8] sm:$0xf0]  ;;  %v1071_v8 = vor.u32 %v1263_v2, %v1068_v3  ;;  %v1261_v10 = vld [vmem:[#allocation3 + $0x94] sm:$0xf0]  ;;  %v1178_v11 = vld [vmem:[#allocation3 + $0x188] sm:$0xf] }
  0x25   :  { %467 = vmatpush.bf16.msra.mxu1 %v1107_v36  ;;  %v1199_v12 = vor.u32 %v1295_v4, %v1196_v5  ;;  %v1293_v13 = vld [vmem:[#allocation3 + $0x194] sm:$0xf0]  ;;  %v1259_v14 = vld [vmem:[#allocation3 + $0x8c] sm:$0xf]  ;;  %v1052_v15 = vld [vmem:[#allocation3 + $0x98] sm:$0xf0]  ;;  %v1051_v18 = vor.u32 %v1261_v10, %v1050_v9 }
  0x26   :  { %481 = vmatpush.bf16.msra.mxu2 %v983_v37  ;;  %v1291_v16 = vld [vmem:[#allocation3 + $0x18c] sm:$0xf]  ;;  %v1180_v17 = vld [vmem:[#allocation3 + $0x198] sm:$0xf0]  ;;  %v1179_v19 = vor.u32 %v1293_v13, %v1178_v11  ;;  %v1055_v20 = vor.u32 %v1259_v14, %v1052_v15  ;;  %v1034_v21 = vld [vmem:[#allocation3 + $0x68] sm:$0xf] }
  0x27   :  { %495 = vmatpush.bf16.msra.mxu3 %v1111_v41  ;;  %454 = vmatmul.bf16.vlgmr.msra.gmra.mxu0 %v1389_v51  ;;  %v1257_v22 = vld [vmem:[#allocation3 + $0x74] sm:$0xf0]  ;;  %v1162_v23 = vld [vmem:[#allocation3 + $0x168] sm:$0xf]  ;;  %v1183_v24 = vor.u32 %v1291_v16, %v1180_v17  ;;  %v1255_v26 = vld [vmem:[#allocation3 + $0x6c] sm:$0xf] }
  0x28   :  { %502 = vmatpush.bf16.msrb.mxu0 %v1099_v42  ;;  %468 = vmatmul.bf16.vlgmr.msra.gmra.mxu1 %v1391_v55  ;;  %v1289_v25 = vld [vmem:[#allocation3 + $0x174] sm:$0xf0]  ;;  %v1036_v27 = vld [vmem:[#allocation3 + $0x78] sm:$0xf0]  ;;  %v1287_v28 = vld [vmem:[#allocation3 + $0x16c] sm:$0xf]  ;;  %v1035_v30 = vor.u32 %v1257_v22, %v1034_v21 }
  0x29   :  { %516 = vmatpush.bf16.msrb.mxu1 %v1227_v45  ;;  %482 = vmatmul.bf16.vlgmr.msra.gmra.mxu2 %v1389_v51  ;;  %v1164_v29 = vld [vmem:[#allocation3 + $0x178] sm:$0xf0]  ;;  %v1163_v31 = vor.u32 %v1289_v25, %v1162_v23  ;;  %v1039_v32 = vor.u32 %v1255_v26, %v1036_v27  ;;  %v1018_v33 = vld [vmem:[#allocation3 + $0x48] sm:$0xf]  ;;  %v1253_v34 = vld [vmem:[#allocation3 + $0x54] sm:$0xf0] }
  0x2a   :  { %530 = vmatpush.bf16.msrb.mxu2 %v1103_v46  ;;  %496 = vmatmul.bf16.vlgmr.msra.gmra.mxu3 %v1391_v55  ;;  %v1146_v35 = vld [vmem:[#allocation3 + $0x148] sm:$0xf]  ;;  %v1167_v36 = vor.u32 %v1287_v28, %v1164_v29  ;;  %v1285_v37 = vld [vmem:[#allocation3 + $0x154] sm:$0xf0]  ;;  %v1251_v38 = vld [vmem:[#allocation3 + $0x4c] sm:$0xf]  ;;  %v1019_v42 = vor.u32 %v1253_v34, %v1018_v33 }
  0x2b   :  { %544 = vmatpush.bf16.msrb.mxu3 %v1231_v50  ;;  %v1020_v39 = vld [vmem:[#allocation3 + $0x58] sm:$0xf0]  ;;  %v1283_v40 = vld [vmem:[#allocation3 + $0x14c] sm:$0xf]  ;;  %v1147_v43 = vor.u32 %v1285_v37, %v1146_v35  ;;  %v1002_v45 = vld [vmem:[#allocation3 + $0x28] sm:$0xf] }
  0x2c   :  { %503 = vmatpush.bf16.msrb.mxu0 %v1083_v58  ;;  %v1148_v41 = vld [vmem:[#allocation3 + $0x158] sm:$0xf0]  ;;  %v1023_v44 = vor.u32 %v1251_v38, %v1020_v39  ;;  %v1249_v46 = vld [vmem:[#allocation3 + $0x34] sm:$0xf0]  ;;  %v1130_v47 = vld [vmem:[#allocation3 + $0x128] sm:$0xf] }
  0x2d   :  { %517 = vmatpush.bf16.msrb.mxu1 %v1211_v59  ;;  %v1151_v48 = vor.u32 %v1283_v40, %v1148_v41  ;;  %v1281_v49 = vld [vmem:[#allocation3 + $0x134] sm:$0xf0]  ;;  %v1247_v50 = vld [vmem:[#allocation3 + $0x2c] sm:$0xf]  ;;  %v1004_v52 = vld [vmem:[#allocation3 + $0x38] sm:$0xf0]  ;;  %v1003_v56 = vor.u32 %v1249_v46, %v1002_v45 }
  0x2e   :  { %531 = vmatpush.bf16.msrb.mxu2 %v1087_v60  ;;  %v1279_v53 = vld [vmem:[#allocation3 + $0x12c] sm:$0xf]  ;;  %v1132_v54 = vld [vmem:[#allocation3 + $0x138] sm:$0xf0]  ;;  %v1131_v57 = vor.u32 %v1281_v49, %v1130_v47  ;;  %v1007_v58 = vor.u32 %v1247_v50, %v1004_v52  ;;  %v986_v59 = vld [vmem:[#allocation3 + $0x8] sm:$0xf] }
  0x2f   :  { %545 = vmatpush.bf16.msrb.mxu3 %v1215_v0  ;;  %v1245_v60 = vld [vmem:[#allocation3 + $0x14] sm:$0xf0]  ;;  %v1114_v61 = vld [vmem:[#allocation3 + $0x108] sm:$0xf]  ;;  %v1135_v62 = vor.u32 %v1279_v53, %v1132_v54  ;;  %v1243_v0 = vld [vmem:[#allocation3 + $0xc] sm:$0xf] }
  0x30   :  { %504 = vmatpush.bf16.msrb.mxu0 %v1067_v6  ;;  %v1277_v63 = vld [vmem:[#allocation3 + $0x114] sm:$0xf0]  ;;  %v988_v1 = vld [vmem:[#allocation3 + $0x18] sm:$0xf0]  ;;  %v1275_v2 = vld [vmem:[#allocation3 + $0x10c] sm:$0xf]  ;;  %v987_v4 = vor.u32 %v1245_v60, %v986_v59 }
  0x31   :  { %518 = vmatpush.bf16.msrb.mxu1 %v1195_v7  ;;  %v1116_v3 = vld [vmem:[#allocation3 + $0x118] sm:$0xf0]  ;;  %v1115_v5 = vor.u32 %v1277_v63, %v1114_v61  ;;  %v991_v6 = vor.u32 %v1243_v0, %v988_v1 }
  0x32   :  { %532 = vmatpush.bf16.msrb.mxu2 %v1071_v8  ;;  %v1119_v7 = vor.u32 %v1275_v2, %v1116_v3  ;;  %v1404_v8 = vld [vmem:[%s1650_s2] sm:$0xf] }
  0x33   :  { %546 = vmatpush.bf16.msrb.mxu3 %v1199_v12  ;;  %v587_v10 = vperm.slane %v1404_v8, 0 }
  0x34   :  { %505 = vmatpush.bf16.msrb.mxu0 %v1051_v18 }
  0x35   :  { %519 = vmatpush.bf16.msrb.mxu1 %v1179_v19 }
  0x36   :  { %533 = vmatpush.bf16.msrb.mxu2 %v1055_v20 }
  0x37   :  { %547 = vmatpush.bf16.msrb.mxu3 %v1183_v24 }
  0x38   :  { %506 = vmatpush.bf16.msrb.mxu0 %v1035_v30 }
  0x39   :  { %520 = vmatpush.bf16.msrb.mxu1 %v1163_v31 }
  0x3a   :  { %534 = vmatpush.bf16.msrb.mxu2 %v1039_v32 }
  0x3b   :  { %548 = vmatpush.bf16.msrb.mxu3 %v1167_v36 }
  0x3c   :  { %507 = vmatpush.bf16.msrb.mxu0 %v1019_v42 }
  0x3d   :  { %521 = vmatpush.bf16.msrb.mxu1 %v1147_v43 }
  0x3e   :  { %535 = vmatpush.bf16.msrb.mxu2 %v1023_v44 }
  0x3f   :  { %549 = vmatpush.bf16.msrb.mxu3 %v1151_v48 }
  0x40   :  { %508 = vmatpush.bf16.msrb.mxu0 %v1003_v56 }
  0x41   :  { %522 = vmatpush.bf16.msrb.mxu1 %v1131_v57 }
  0x42   :  { %536 = vmatpush.bf16.msrb.mxu2 %v1007_v58 }
  0x43   :  { %550 = vmatpush.bf16.msrb.mxu3 %v1135_v62 }
  0x44   :  { %509 = vmatpush.bf16.msrb.mxu0 %v987_v4 }
  0x45   :  { %523 = vmatpush.bf16.msrb.mxu1 %v1115_v5 }
  0x46   :  { %537 = vmatpush.bf16.msrb.mxu2 %v991_v6 }
  0x47   :  { %551 = vmatpush.bf16.msrb.mxu3 %v1119_v7  ;;  %510 = vmatmul.bf16.vlgmr.msrb.gmra.mxu0 %v1389_v51 }
  0x48   :  { %524 = vmatmul.bf16.vlgmr.msrb.gmra.mxu1 %v1391_v55 }
  0x49   :  { %538 = vmatmul.bf16.vlgmr.msrb.gmra.mxu2 %v1389_v51  ;;  %v588_v51 = vperm.slane %v1404_v8, 1 }
  0x4a   :  { %552 = vmatmul.bf16.vlgmr.msrb.gmra.mxu3 %v1391_v55 }
  0xa4   :  { %v455_v9 = vpop.f32.mrf.mxu0 }
  0xa5   :  { %v469_v11 = vpop.f32.mrf.mxu1 }
  0xa6   :  { %v470_v12 = vadd.f32 %v469_v11, %v455_v9 }
  0xa8   :  { %v1407_v13 = vadd.f32 %v587_v10, %v470_v12 }
  0xaa   :  { %v1410_v14 = vmul.f32 0.70710677, %v1407_v13 }
  0xac   :  { %v483_v15 = vpop.f32.mrf.mxu2  ;;  %v619_v55 = vmul.f32 %v1410_v14, %v1410_v14  ;;  %v457_v17 = vpop.f32.mrf.mxu0 }
  0xad   :  { %v497_v16 = vpop.f32.mrf.mxu3  ;;  %v471_v19 = vpop.f32.mrf.mxu1 }
  0xae   :  { %v498_v18 = vadd.f32 %v497_v16, %v483_v15  ;;  %v1415_v20 = vmin.f32 %v619_v55, 16.0  ;;  %v472_v21 = vadd.f32 %v471_v19, %v457_v17 }
  0xb0   :  { %v1417_v22 = vadd.f32 %v588_v51, %v498_v18  ;;  %v621_v23 = vmul.f32 2.1237322e-06, %v1415_v20  ;;  %v632_v24 = vmul.f32 3.8918573e-05, %v1415_v20  ;;  %v1421_v25 = vadd.f32 %v587_v10, %v472_v21 }
  0xb2   :  { %v1424_v26 = vmul.f32 0.70710677, %v1417_v22  ;;  %v622_v27 = vadd.f32 0.00028619796, %v621_v23  ;;  %v633_v28 = vadd.f32 0.001143296, %v632_v24 }
  0xb3   :  { %v1429_v30 = vmul.f32 0.70710677, %v1421_v25 }
  0xb4   :  { %v659_v29 = vmul.f32 %v1424_v26, %v1424_v26  ;;  %v485_v31 = vpop.f32.mrf.mxu2  ;;  %v623_v32 = vmul.f32 %v622_v27, %v1415_v20  ;;  %v634_v33 = vmul.f32 %v633_v28, %v1415_v20 }
  0xb5   :  { %v499_v34 = vpop.f32.mrf.mxu3  ;;  %v779_v36 = vmul.f32 %v1429_v30, %v1429_v30 }
  0xb6   :  { %v660_v35 = vmin.f32 %v659_v29, 16.0  ;;  %v500_v37 = vadd.f32 %v499_v34, %v485_v31  ;;  %v624_v38 = vadd.f32 0.0036580483, %v623_v32  ;;  %v635_v39 = vadd.f32 0.014752088, %v634_v33 }
  0xb7   :  { %v1435_v42 = vmin.f32 %v779_v36, 16.0  ;;  %v589_v33 = vperm.slane %v1404_v8, 2 }
  0xb8   :  { %v661_v40 = vmul.f32 2.1237322e-06, %v660_v35  ;;  %v672_v41 = vmul.f32 3.8918573e-05, %v660_v35  ;;  %v625_v43 = vmul.f32 %v624_v38, %v1415_v20  ;;  %v636_v44 = vmul.f32 %v635_v39, %v1415_v20 }
  0xb9   :  { %v1439_v45 = vadd.f32 %v588_v51, %v500_v37  ;;  %v781_v48 = vmul.f32 2.1237322e-06, %v1435_v42  ;;  %v792_v50 = vmul.f32 3.8918573e-05, %v1435_v42 }
  0xba   :  { %v662_v46 = vadd.f32 0.00028619796, %v661_v40  ;;  %v673_v47 = vadd.f32 0.001143296, %v672_v41  ;;  %v637_v49 = vadd.f32 0.112945676, %v636_v44 }
  0xbb   :  { %v782_v54 = vadd.f32 0.00028619796, %v781_v48  ;;  %v626_v56 = vadd.f32 0.05243302, %v625_v43  ;;  %v793_v58 = vadd.f32 0.001143296, %v792_v50 }
  0xbc   :  { %v663_v52 = vmul.f32 %v662_v46, %v660_v35  ;;  %v674_v53 = vmul.f32 %v673_v47, %v660_v35  ;;  %v638_v57 = vmul.f32 %v637_v49, %v1415_v20  ;;  %v1445_v59 = vmul.f32 0.70710677, %v1439_v45 }
  0xbd   :  { %v783_v62 = vmul.f32 %v782_v54, %v1435_v42  ;;  %v794_v0 = vmul.f32 %v793_v58, %v1435_v42  ;;  %v627_v5 = vmul.f32 %v626_v56, %v1415_v20  ;;  %v1476_v54 = vmul.f32 0.5, %v1417_v22 }
  0xbe   :  { %v664_v60 = vadd.f32 0.0036580483, %v663_v52  ;;  %v675_v61 = vadd.f32 0.014752088, %v674_v53  ;;  %v639_v63 = vadd.f32 0.4994258, %v638_v57  ;;  %v819_v1 = vmul.f32 %v1445_v59, %v1445_v59 }
  0xbf   :  { %v784_v4 = vadd.f32 0.0036580483, %v783_v62  ;;  %v795_v7 = vadd.f32 0.014752088, %v794_v0  ;;  %v628_v21 = vadd.f32 0.18741608, %v627_v5 }
  0xc0   :  { %v665_v2 = vmul.f32 %v664_v60, %v660_v35  ;;  %v676_v3 = vmul.f32 %v675_v61, %v660_v35  ;;  %v640_v6 = vmul.f32 %v639_v63, %v1415_v20  ;;  %v1453_v9 = vmin.f32 %v819_v1, 16.0 }
  0xc1   :  { %v785_v12 = vmul.f32 %v784_v4, %v1435_v42  ;;  %v796_v51 = vmul.f32 %v795_v7, %v1435_v42  ;;  %v629_v36 = vmul.f32 %v628_v21, %v1415_v20  ;;  %v1472_v20 = vmul.f32 0.5, %v1407_v13 }
  0xc2   :  { %v666_v10 = vadd.f32 0.05243302, %v665_v2  ;;  %v677_v11 = vadd.f32 0.112945676, %v676_v3  ;;  %v641_v15 = vadd.f32 1.0, %v640_v6  ;;  %v590_v6 = vperm.slane %v1404_v8, 3 }
  0xc3   :  { %v821_v55 = vmul.f32 2.1237322e-06, %v1453_v9  ;;  %v832_v23 = vmul.f32 3.8918573e-05, %v1453_v9  ;;  %v786_v28 = vadd.f32 0.05243302, %v785_v12 }
  0xc4   :  { %v667_v16 = vmul.f32 %v666_v10, %v660_v35  ;;  %v678_v17 = vmul.f32 %v677_v11, %v660_v35  ;;  %v511_v18 = vpop.f32.mrf.mxu0  ;;  %1309 = vrcp.f32 %v641_v15  ;;  %v797_v29 = vadd.f32 0.112945676, %v796_v51 }
  0xc5   :  { %v525_v19 = vpop.f32.mrf.mxu1  ;;  %v822_v31 = vadd.f32 0.00028619796, %v821_v55  ;;  %v833_v39 = vadd.f32 0.001143296, %v832_v23  ;;  %v787_v43 = vmul.f32 %v786_v28, %v1435_v42  ;;  %v651_v52 = vand.u32 2147483647, %v641_v15 }
  0xc6   :  { %v668_v24 = vadd.f32 0.18741608, %v667_v16  ;;  %v679_v27 = vadd.f32 0.4994258, %v678_v17  ;;  %v526_v32 = vadd.f32 %v525_v19, %v511_v18  ;;  %v798_v37 = vmul.f32 %v797_v29, %v1435_v42 }
  0xc7   :  { %v823_v38 = vmul.f32 %v822_v31, %v1453_v9  ;;  %v834_v48 = vmul.f32 %v833_v39, %v1453_v9  ;;  %v653_v53 = vand.u32 2147483648, %v641_v15  ;;  %v788_v62 = vadd.f32 0.18741608, %v787_v43 }
  0xc8   :  { %v680_v34 = vmul.f32 %v679_v27, %v660_v35  ;;  %v669_v40 = vmul.f32 %v668_v24, %v660_v35  ;;  %v799_v46 = vadd.f32 0.4994258, %v798_v37  ;;  %v1469_v49 = vadd.f32 %v589_v33, %v526_v32 }
  0xc9   :  { %v824_v47 = vadd.f32 0.0036580483, %v823_v38  ;;  %v630_v35 = vadd.f32 1.1283791, %v629_v36  ;;  %v835_v60 = vadd.f32 0.014752088, %v834_v48  ;;  %vm647_vm1 = vweird.f32 %v641_v15 }
  0xca   :  { %v1463_v41 = vadd.f32 1.0, %v680_v34  ;;  %v1310_v44 = vpop.eup %1309  ;;  %v800_v57 = vmul.f32 %v799_v46, %v1435_v42  ;;  %v670_v61 = vadd.f32 1.1283791, %v669_v40  ;;  %v1481_v13 = vmul.f32 0.70710677, %v1469_v49 }
  0xcb   :  { %v643_v50 = vmul.f32 %v1310_v44, %v641_v15  ;;  %v825_v58 = vmul.f32 %v824_v47, %v1453_v9  ;;  %vm648_vm0 = vweird.f32 %v1310_v44  ;;  %v836_v2 = vmul.f32 %v835_v60, %v1453_v9 }
  0xcc   :  { %1311 = vrcp.f32 %v1463_v41  ;;  %v1483_v0 = vadd.f32 1.0, %v800_v57  ;;  %v631_v22 = vmul.f32 %v630_v35, %v1410_v14  ;;  %v699_v3 = vmul.f32 %v1481_v13, %v1481_v13  ;;  %v539_v4 = vpop.f32.mrf.mxu2  ;;  %vm649_vm3 = vmor %vm647_vm1, %vm648_vm0  ;;  %v513_v27 = vpop.f32.mrf.mxu0 }
  0xcd   :  { %v644_v56 = vsub.f32 1.0, %v643_v50  ;;  %v826_v1 = vadd.f32 0.05243302, %v825_v58  ;;  %v553_v5 = vpop.f32.mrf.mxu3  ;;  %vm652_vm2 = vcmp.eq.f32.partialorder %v651_v52, 8.507059e+37  ;;  %v654_v11 = vor.u32 1.1754944e-38, %v653_v53  ;;  %v527_v28 = vpop.f32.mrf.mxu1 }
  0xce   :  { %1313 = vrcp.f32 %v1483_v0  ;;  %v671_v12 = vmul.f32 %v670_v61, %v1424_v26  ;;  %v691_v15 = vand.u32 2147483647, %v1463_v41  ;;  %v789_v51 = vmul.f32 %v788_v62, %v1435_v42 }
  0xcf   :  { %v645_v63 = vmul.f32 %v1310_v44, %v644_v56  ;;  %v827_v16 = vmul.f32 %v826_v1, %v1453_v9  ;;  %v837_v17 = vadd.f32 0.112945676, %v836_v2  ;;  %v1497_v18 = vmin.f32 %v699_v3, 16.0 }
  0xd0   :  { %v693_v23 = vand.u32 2147483648, %v1463_v41  ;;  %v554_v24 = vadd.f32 %v553_v5, %v539_v4  ;;  %vm687_vm4 = vweird.f32 %v1463_v41  ;;  %v790_v32 = vadd.f32 1.1283791, %v789_v51 }
  0xd1   :  { %v646_v10 = vadd.f32 %v1310_v44, %v645_v63  ;;  %v838_v29 = vmul.f32 %v837_v17, %v1453_v9  ;;  %v712_v42 = vmul.f32 3.8918573e-05, %v1497_v18  ;;  %v701_v34 = vmul.f32 2.1237322e-06, %v1497_v18 }
  0xd2   :  { %v1312_v7 = vpop.eup %1311  ;;  %vm1504_vm6 = vcmp.eq.f32.partialorder %v691_v15, 8.507059e+37  ;;  %v828_v38 = vadd.f32 0.18741608, %v827_v16  ;;  %v528_v40 = vadd.f32 %v527_v28, %v513_v27  ;;  %v1511_v47 = vadd.f32 %v590_v6, %v554_v24 }
  0xd3   :  { %v683_v14 = vmul.f32 %v1312_v7, %v1463_v41  ;;  %v650_v55 = vsel %vm649_vm3, %v1310_v44, %v646_v10  ;;  %vm688_vm5 = vweird.f32 %v1312_v7  ;;  %v839_v39 = vadd.f32 0.4994258, %v838_v29 }
  0xd4   :  { %v655_v19 = vsel %vm652_vm2, %v654_v11, %v650_v55  ;;  %v1314_v36 = vpop.eup %1313  ;;  %v694_v44 = vor.u32 1.1754944e-38, %v693_v23  ;;  %vm689_vm7 = vmor %vm687_vm4, %vm688_vm5  ;;  %v811_v50 = vand.u32 2147483647, %v1483_v0  ;;  %v713_v52 = vadd.f32 0.001143296, %v712_v42  ;;  %v541_v60 = vpop.f32.mrf.mxu2 }
  0xd5   :  { %v684_v21 = vsub.f32 1.0, %v683_v14  ;;  %v656_v26 = vmul.f32 %v655_v19, %v631_v22  ;;  %v803_v46 = vmul.f32 %v1314_v36, %v1483_v0  ;;  %v840_v35 = vmul.f32 %v839_v39, %v1453_v9  ;;  %v555_v61 = vpop.f32.mrf.mxu3 }
  0xd6   :  { %v813_v57 = vand.u32 2147483648, %v1483_v0  ;;  %v702_v58 = vadd.f32 0.00028619796, %v701_v34  ;;  %v829_v63 = vmul.f32 %v828_v38, %v1453_v9  ;;  %v1525_v41 = vadd.f32 %v589_v33, %v528_v40 }
  0xd7   :  { %v685_v31 = vmul.f32 %v1312_v7, %v684_v21  ;;  %v1232_v48 = vclamps-f32 %v656_v26, 1.0  ;;  %v804_v56 = vsub.f32 1.0, %v803_v46  ;;  %v1521_v1 = vadd.f32 1.0, %v840_v35 }
  0xd8   :  { %v714_v3 = vmul.f32 %v713_v52, %v1497_v18  ;;  %v1529_v4 = vmul.f32 0.70710677, %v1511_v47  ;;  %vm808_vm8 = vweird.f32 %v1314_v36  ;;  %v703_v11 = vmul.f32 %v702_v58, %v1497_v18 }
  0xd9   :  { %v686_v43 = vadd.f32 %v1312_v7, %v685_v31  ;;  %v805_v22 = vmul.f32 %v1314_v36, %v804_v56  ;;  %v939_v5 = vadd.f32 1.0, %v1232_v48  ;;  %1315 = vrcp.f32 %v1521_v1 }
  0xda   :  { %v715_v14 = vadd.f32 0.014752088, %v714_v3  ;;  %v791_v33 = vmul.f32 %v790_v32, %v1429_v30  ;;  %vm807_vm9 = vweird.f32 %v1483_v0  ;;  %v739_v15 = vmul.f32 %v1529_v4, %v1529_v4 }
  0xdb   :  { %v690_v53 = vsel %vm689_vm7, %v1312_v7, %v686_v43  ;;  %v556_v7 = vadd.f32 %v555_v61, %v541_v60  ;;  %v806_v9 = vadd.f32 %v1314_v36, %v805_v22  ;;  %vm1537_vm10 = vmor %vm807_vm9, %vm808_vm8  ;;  %vm1541_vm11 = vcmp.eq.f32.partialorder %v811_v50, 8.507059e+37 }
  0xdc   :  { %v695_v62 = vsel %vm1504_vm6, %v694_v44, %v690_v53  ;;  %v814_v17 = vor.u32 1.1754944e-38, %v813_v57  ;;  %v716_v19 = vmul.f32 %v715_v14, %v1497_v18  ;;  %v947_v30 = vmul.f32 %v939_v5, %v1472_v20 }
  0xdd   :  { %v696_v2 = vmul.f32 %v695_v62, %v671_v12  ;;  %v830_v12 = vadd.f32 1.1283791, %v829_v63  ;;  %v810_v0 = vsel %vm1537_vm10, %v1314_v36, %v806_v9  ;;  %v1549_v21 = vmin.f32 %v739_v15, 16.0 }
  0xde   :  { %v1552_v23 = vmul.f32 0.70710677, %v1525_v41  ;;  %v704_v27 = vadd.f32 0.0036580483, %v703_v11  ;;  %v717_v28 = vadd.f32 0.112945676, %v716_v19  ;;  %v1557_v26 = vadd.f32 %v590_v6, %v556_v7 }
  0xdf   :  { %v1233_v10 = vclamps-f32 %v696_v2, 1.0  ;;  %v1316_v29 = vpop.eup %1315  ;;  %v831_v42 = vmul.f32 %v830_v12, %v1445_v59  ;;  %v741_v20 = vmul.f32 2.1237322e-06, %v1549_v21  ;;  %v752_v31 = vmul.f32 3.8918573e-05, %v1549_v21 }
  0xe0   :  { %v859_v32 = vmul.f32 %v1552_v23, %v1552_v23  ;;  %v843_v36 = vmul.f32 %v1316_v29, %v1521_v1  ;;  %v851_v8 = vand.u32 2147483647, %v1521_v1  ;;  %v853_v6 = vand.u32 2147483648, %v1521_v1 }
  0xe1   :  { %v940_v51 = vadd.f32 1.0, %v1233_v10  ;;  %v718_v37 = vmul.f32 %v717_v28, %v1497_v18  ;;  %v742_v59 = vadd.f32 0.00028619796, %v741_v20  ;;  %v753_v38 = vadd.f32 0.001143296, %v752_v31 }
  0xe2   :  { %v844_v39 = vsub.f32 1.0, %v843_v36  ;;  %v705_v40 = vmul.f32 %v704_v27, %v1497_v18  ;;  %v1574_v43 = vmin.f32 %v859_v32, 16.0  ;;  %v1577_v44 = vmul.f32 0.70710677, %v1557_v26 }
  0xe3   :  { %v948_v24 = vmul.f32 %v940_v51, %v1476_v54  ;;  %v815_v54 = vsel %vm1541_vm11, %v814_v17, %v810_v0  ;;  %v719_v48 = vadd.f32 0.4994258, %v718_v37  ;;  %v743_v50 = vmul.f32 %v742_v59, %v1549_v21 }
  0xe4   :  { %v816_v46 = vmul.f32 %v815_v54, %v791_v33  ;;  %v754_v35 = vmul.f32 %v753_v38, %v1549_v21  ;;  %v845_v52 = vmul.f32 %v1316_v29, %v844_v39  ;;  %vm848_vm12 = vweird.f32 %v1316_v29 }
  0xe5   :  { %v955_v34 = vpack.c.bf16 %v948_v24, %v947_v30  ;;  %v861_v53 = vmul.f32 2.1237322e-06, %v1574_v43  ;;  %v872_v56 = vmul.f32 3.8918573e-05, %v1574_v43  ;;  %vm847_vm13 = vweird.f32 %v1521_v1 }
  0xe6   :  { %v720_v57 = vmul.f32 %v719_v48, %v1497_v18  ;;  %v744_v58 = vadd.f32 0.0036580483, %v743_v50  ;;  %v755_v60 = vadd.f32 0.014752088, %v754_v35  ;;  %v846_v61 = vadd.f32 %v1316_v29, %v845_v52  ;;  %vm849_vm15 = vmor %vm847_vm13, %vm848_vm12 }
  0xe7   :  { %959 = vst [vmem:[%s1651_s3] sm:$0xff] %v955_v34  ;;  %vm852_vm14 = vcmp.eq.f32.partialorder %v851_v8, 8.507059e+37  ;;  %v873_v62 = vadd.f32 0.001143296, %v872_v56  ;;  %v899_v63 = vmul.f32 %v1577_v44, %v1577_v44  ;;  %v854_v2 = vor.u32 1.1754944e-38, %v853_v6 }
  0xe8   :  { %v706_v22 = vadd.f32 0.05243302, %v705_v40  ;;  %v1587_v3 = vadd.f32 1.0, %v720_v57  ;;  %v756_v5 = vmul.f32 %v755_v60, %v1549_v21  ;;  %v1236_v7 = vclamps-f32 %v816_v46, 1.0 }
  0xe9   :  { %v850_v10 = vsel %vm849_vm15, %v1316_v29, %v846_v61  ;;  %v862_v1 = vadd.f32 0.00028619796, %v861_v53  ;;  %v874_v9 = vmul.f32 %v873_v62, %v1574_v43  ;;  %v745_v14 = vmul.f32 %v744_v58, %v1549_v21 }
  0xea   :  { %v855_v11 = vsel %vm852_vm14, %v854_v2, %v850_v10  ;;  %1317 = vrcp.f32 %v1587_v3  ;;  %v1593_v33 = vmin.f32 %v899_v63, 16.0  ;;  %v757_v15 = vadd.f32 0.112945676, %v756_v5 }
  0xeb   :  { %v856_v12 = vmul.f32 %v855_v11, %v831_v42  ;;  %v607_v51 = vmul.f32 0.5, %v1421_v25  ;;  %v875_v55 = vadd.f32 0.014752088, %v874_v9  ;;  %v943_v16 = vadd.f32 1.0, %v1236_v7 }
  0xec   :  { %v707_v19 = vmul.f32 %v706_v22, %v1497_v18  ;;  %v758_v30 = vmul.f32 %v757_v15, %v1549_v21  ;;  %v746_v0 = vadd.f32 0.05243302, %v745_v14  ;;  %v863_v24 = vmul.f32 %v862_v1, %v1574_v43 }
  0xed   :  { %v1237_v17 = vclamps-f32 %v856_v12, 1.0  ;;  %v876_v27 = vmul.f32 %v875_v55, %v1574_v43  ;;  %v901_v28 = vmul.f32 2.1237322e-06, %v1593_v33  ;;  %v608_v29 = vmul.f32 0.5, %v1439_v45 }
  0xee   :  { %v759_v20 = vadd.f32 0.4994258, %v758_v30  ;;  %v912_v25 = vmul.f32 3.8918573e-05, %v1593_v33  ;;  %v951_v54 = vmul.f32 %v943_v16, %v607_v51  ;;  %v708_v6 = vadd.f32 0.18741608, %v707_v19 }
  0xef   :  { %v944_v42 = vadd.f32 1.0, %v1237_v17  ;;  %v877_v32 = vadd.f32 0.112945676, %v876_v27  ;;  %v902_v34 = vadd.f32 0.00028619796, %v901_v28  ;;  %v747_v45 = vmul.f32 %v746_v0, %v1549_v21 }
  0xf0   :  { %v1318_v31 = vpop.eup %1317  ;;  %v760_v37 = vmul.f32 %v759_v20, %v1549_v21  ;;  %v864_v59 = vadd.f32 0.0036580483, %v863_v24  ;;  %v913_v46 = vadd.f32 0.001143296, %v912_v25  ;;  %v709_v56 = vmul.f32 %v708_v6, %v1497_v18 }
  0xf1   :  { %v952_v36 = vmul.f32 %v944_v42, %v608_v29  ;;  %v723_v8 = vmul.f32 %v1318_v31, %v1587_v3  ;;  %v878_v38 = vmul.f32 %v877_v32, %v1574_v43  ;;  %v903_v35 = vmul.f32 %v902_v34, %v1593_v33 }
  0xf2   :  { %v761_v48 = vadd.f32 1.0, %v760_v37  ;;  %v914_v53 = vmul.f32 %v913_v46, %v1593_v33  ;;  %v865_v57 = vmul.f32 %v864_v59, %v1574_v43  ;;  %vm728_vm0 = vweird.f32 %v1318_v31 }
  0xf3   :  { %v957_v39 = vpack.c.bf16 %v952_v36, %v951_v54  ;;  %v724_v40 = vsub.f32 1.0, %v723_v8  ;;  %v879_v50 = vadd.f32 0.4994258, %v878_v38  ;;  %v748_v60 = vadd.f32 0.18741608, %v747_v45 }
  0xf4   :  { %1319 = vrcp.f32 %v761_v48  ;;  %v733_v62 = vand.u32 2147483648, %v1587_v3  ;;  %v904_v63 = vadd.f32 0.0036580483, %v903_v35  ;;  %v915_v2 = vadd.f32 0.014752088, %v914_v53 }
  0xf5   :  { %961 = vst [vmem:[%s1651_s3 + $0x10] sm:$0xff] %v957_v39  ;;  %v725_v52 = vmul.f32 %v1318_v31, %v724_v40  ;;  %v880_v61 = vmul.f32 %v879_v50, %v1574_v43  ;;  %vm727_vm1 = vweird.f32 %v1587_v3  ;;  %v731_v22 = vand.u32 2147483647, %v1587_v3 }
  0xf6   :  { %v710_v7 = vadd.f32 1.1283791, %v709_v56  ;;  %vm729_vm2 = vmor %vm727_vm1, %vm728_vm0  ;;  %v916_v18 = vmul.f32 %v915_v2, %v1593_v33  ;;  %v749_v1 = vmul.f32 %v748_v60, %v1549_v21  ;;  %v866_v9 = vadd.f32 0.05243302, %v865_v57 }
  0xf7   :  { %v726_v58 = vadd.f32 %v1318_v31, %v725_v52  ;;  %v1618_v5 = vadd.f32 1.0, %v880_v61  ;;  %v734_v14 = vor.u32 1.1754944e-38, %v733_v62  ;;  %v905_v12 = vmul.f32 %v904_v63, %v1593_v33 }
  0xf8   :  { %v917_v15 = vadd.f32 0.112945676, %v916_v18  ;;  %vm732_vm3 = vcmp.eq.f32.partialorder %v731_v22, 8.507059e+37  ;;  %v711_v16 = vmul.f32 %v710_v7, %v1481_v13  ;;  %v750_v17 = vadd.f32 1.1283791, %v749_v1 }
  0xf9   :  { %v730_v10 = vsel %vm729_vm2, %v1318_v31, %v726_v58  ;;  %1321 = vrcp.f32 %v1618_v5  ;;  %v867_v30 = vmul.f32 %v866_v9, %v1574_v43  ;;  %v773_v21 = vand.u32 2147483648, %v761_v48 }
  0xfa   :  { %v1320_v11 = vpop.eup %1319  ;;  %v735_v3 = vsel %vm732_vm3, %v734_v14, %v730_v10  ;;  %v918_v55 = vmul.f32 %v917_v15, %v1593_v33  ;;  %v906_v0 = vadd.f32 0.05243302, %v905_v12  ;;  %v771_v42 = vand.u32 2147483647, %v761_v48 }
  0xfb   :  { %v763_v51 = vmul.f32 %v1320_v11, %v761_v48  ;;  %v736_v28 = vmul.f32 %v735_v3, %v711_v16  ;;  %vm768_vm4 = vweird.f32 %v1320_v11  ;;  %vm767_vm5 = vweird.f32 %v761_v48 }
  0xfc   :  { %v919_v24 = vadd.f32 0.4994258, %v918_v55  ;;  %v868_v32 = vadd.f32 0.18741608, %v867_v30  ;;  %vm769_vm6 = vmor %vm767_vm5, %vm768_vm4  ;;  %v774_v13 = vor.u32 1.1754944e-38, %v773_v21  ;;  %v907_v54 = vmul.f32 %v906_v0, %v1593_v33 }
  0xfd   :  { %v764_v19 = vsub.f32 1.0, %v763_v51  ;;  %v1234_v8 = vclamps-f32 %v736_v28, 1.0  ;;  %v751_v6 = vmul.f32 %v750_v17, %v1529_v4  ;;  %vm772_vm7 = vcmp.eq.f32.partialorder %v771_v42, 8.507059e+37 }
  0xfe   :  { %v920_v25 = vmul.f32 %v919_v24, %v1593_v33  ;;  %v869_v40 = vmul.f32 %v868_v32, %v1574_v43  ;;  %v893_v46 = vand.u32 2147483648, %v1618_v5  ;;  %v908_v48 = vadd.f32 0.18741608, %v907_v54 }
  0xff   :  { %v1322_v27 = vpop.eup %1321  ;;  %v765_v29 = vmul.f32 %v1320_v11, %v764_v19  ;;  %v941_v50 = vadd.f32 1.0, %v1234_v8  ;;  %vm887_vm9 = vweird.f32 %v1618_v5  ;;  %v891_v52 = vand.u32 2147483647, %v1618_v5 }
 0x100   :  { %v883_v20 = vmul.f32 %v1322_v27, %v1618_v5  ;;  %v921_v36 = vadd.f32 1.0, %v920_v25  ;;  %vm888_vm8 = vweird.f32 %v1322_v27  ;;  %v605_v4 = vmul.f32 0.5, %v1469_v49 }
 0x101   :  { %v766_v31 = vadd.f32 %v1320_v11, %v765_v29  ;;  %vm889_vm10 = vmor %vm887_vm9, %vm888_vm8  ;;  %v606_v53 = vmul.f32 0.5, %v1511_v47  ;;  %v870_v57 = vadd.f32 1.1283791, %v869_v40  ;;  %v894_v60 = vor.u32 1.1754944e-38, %v893_v46 }
 0x102   :  { %v884_v34 = vsub.f32 1.0, %v883_v20  ;;  %1323 = vrcp.f32 %v921_v36  ;;  %v909_v61 = vmul.f32 %v908_v48, %v1593_v33  ;;  %v949_v62 = vmul.f32 %v941_v50, %v605_v4 }
 0x103   :  { %v770_v37 = vsel %vm769_vm6, %v1320_v11, %v766_v31  ;;  %vm892_vm11 = vcmp.eq.f32.partialorder %v891_v52, 8.507059e+37  ;;  %v871_v5 = vmul.f32 %v870_v57, %v1552_v23  ;;  %v933_v10 = vand.u32 2147483648, %v921_v36 }
 0x104   :  { %v775_v59 = vsel %vm772_vm7, %v774_v13, %v770_v37  ;;  %v885_v38 = vmul.f32 %v1322_v27, %v884_v34  ;;  %v910_v49 = vadd.f32 1.1283791, %v909_v61  ;;  %v931_v9 = vand.u32 2147483647, %v921_v36 }
 0x105   :  { %v776_v39 = vmul.f32 %v775_v59, %v751_v6  ;;  %vm927_vm13 = vweird.f32 %v921_v36  ;;  %v934_v11 = vor.u32 1.1754944e-38, %v933_v10  ;;  %v609_v16 = vmul.f32 0.5, %v1525_v41 }
 0x106   :  { %v886_v45 = vadd.f32 %v1322_v27, %v885_v38  ;;  %v911_v12 = vmul.f32 %v910_v49, %v1577_v44  ;;  %vm932_vm15 = vcmp.eq.f32.partialorder %v931_v9, 8.507059e+37  ;;  %v610_v17 = vmul.f32 0.5, %v1557_v26 }
 0x107   :  { %v1235_v35 = vclamps-f32 %v776_v39, 1.0 }
 0x108   :  { %v890_v58 = vsel %vm889_vm10, %v1322_v27, %v886_v45  ;;  %v1324_v43 = vpop.eup %1323 }
 0x109   :  { %v942_v56 = vadd.f32 1.0, %v1235_v35  ;;  %v923_v2 = vmul.f32 %v1324_v43, %v921_v36  ;;  %v895_v22 = vsel %vm892_vm11, %v894_v60, %v890_v58  ;;  %vm928_vm12 = vweird.f32 %v1324_v43 }
 0x10a   :  { %v896_v47 = vmul.f32 %v895_v22, %v871_v5  ;;  %vm929_vm14 = vmor %vm927_vm13, %vm928_vm12 }
 0x10b   :  { %v950_v63 = vmul.f32 %v942_v56, %v606_v53  ;;  %v924_v18 = vsub.f32 1.0, %v923_v2 }
 0x10c   :  { %v1238_v14 = vclamps-f32 %v896_v47, 1.0 }
 0x10d   :  { %v956_v7 = vpack.c.bf16 %v950_v63, %v949_v62  ;;  %v925_v1 = vmul.f32 %v1324_v43, %v924_v18 }
 0x10e   :  { %v945_v3 = vadd.f32 1.0, %v1238_v14 }
 0x10f   :  { %960 = vst [vmem:[%s1651_s3 + $0x8] sm:$0xff] %v956_v7  ;;  %v926_v33 = vadd.f32 %v1324_v43, %v925_v1 }
 0x110   :  { %v953_v30 = vmul.f32 %v945_v3, %v609_v16 }
 0x111   :  { %v930_v15 = vsel %vm929_vm14, %v1324_v43, %v926_v33 }
 0x112   :  { %v935_v23 = vsel %vm932_vm15, %v934_v11, %v930_v15 }
 0x113   :  { %v936_v51 = vmul.f32 %v935_v23, %v911_v12 }
 0x115   :  { %v1239_v55 = vclamps-f32 %v936_v51, 1.0 }
 0x117   :  { %v946_v19 = vadd.f32 1.0, %v1239_v55 }
 0x119   :  { %v954_v21 = vmul.f32 %v946_v19, %v610_v17 }
 0x11b   :  { %v958_v0 = vpack.c.bf16 %v954_v21, %v953_v30 }
 0x11d   :  { %962 = vst [vmem:[%s1651_s3 + $0x18] sm:$0xff] %v958_v0 }
 0x11e   :  { %967 = vsyncpa [#allocation4], 1 }

</bundles_post_ra>
